<compile_context>
chip_gen: v7x
topology: tpu7x:2x2x1
jax: 0.10.0
libtpu: 0.0.40
codegen_flags: <defaults>
</compile_context>

<pallas_src>
import functools

import jax
import jax.numpy as jnp
from jax import lax
from jax.experimental import pallas as pl
from jax.experimental.pallas import tpu as pltpu


# Halo width (in lanes) on each side of the flattened image inside the scratch.
# Must be >= 2*W + 2 (max |tap shift|) and a multiple of 128 so the per-layer
# interior store is lane-tile aligned.
_PAD = 128


def _transfer_kernel(x_ref, w_ref, b_ref, o_ref, pbuf_ref, *,
                     H, W, C, num_blocks, res_scale):
    """Entire `transfer` forward for one image, fully resident in VMEM.

    x_ref   : (1, C, H*W)        input image   (channels padded to C)
    w_ref   : (L, 5, C, 5*C)     packed conv weights, bf16 (w[l,kh][co, kw*C+ci])
    b_ref   : (L, C, 1)          conv biases, f32
    o_ref   : (1, C, H*W)        output (channels padded to C)
    pbuf_ref: (C, _PAD+H*W+_PAD) zero-haloed flat activation scratch, f32
    """
    f32 = jnp.float32
    bf16 = jnp.bfloat16
    HW = H * W
    PADW = pbuf_ref.shape[1]

    # Zero only the halo borders; the interior is fully rewritten by every stage().
    # Re-zeroed every invocation (2 aligned (C,128) stores, negligible) so this is
    # also correct under megacore grid partitioning (per-core scratch on v7x).
    pbuf_ref[:, :_PAD] = jnp.zeros((C, _PAD), f32)
    pbuf_ref[:, _PAD + HW:] = jnp.zeros((C, PADW - _PAD - HW), f32)

    # x-coordinate of every lane (pixel); used to mask row wrap-around for kw taps.
    col = lax.broadcasted_iota(jnp.int32, (C, HW), 1) % W

    def stage(a):
        # Lane-tile-aligned, full-width store of the current activation (C, HW).
        pbuf_ref[:, _PAD:_PAD + HW] = a

    def conv(lidx, relu):
        # 5x5 "same" conv as 5 MXU contractions (one per kernel row kh):
        #   out(C, HW) += w[lidx, kh](C, 5C) @ patches_kh(5C, HW)
        # patches_kh is built along the sublane axis from 5 lane-shifted reads of
        # the zero-haloed flat buffer (tile-aligned concat, offsets multiple of C).
        acc = jnp.zeros((C, HW), f32)
        for kh in range(5):
            pieces = []
            for kw in range(5):
                dx = kw - 2
                start = _PAD + (kh - 2) * W + dx
                raw = pbuf_ref[:, start:start + HW]            # (C, HW) f32
                if dx != 0:
                    # Zero pixels whose shifted x falls outside [0, W) (the flat
                    # read would otherwise pick them up from the adjacent row).
                    valid = (col >= -dx) & (col < W - dx)
                    raw = jnp.where(valid, raw, 0.0)
                pieces.append(raw)
            patch = jnp.concatenate(pieces, axis=0).astype(bf16)  # (5C, HW) bf16
            acc = acc + jnp.dot(w_ref[lidx, kh], patch,
                                preferred_element_type=f32)
        acc = acc + b_ref[lidx]                                   # (C, 1) broadcast
        if relu:
            acc = jnp.maximum(acc, 0.0)
        return acc                                                # (C, HW) f32

    # ---- head: x1 = relu(head(x)) ----
    stage(x_ref[0].astype(f32))
    x1 = conv(0, relu=True)

    # ---- resblocks: x = conv2(relu(conv1(x))) * res_scale + x ----
    def body(i, a):
        x_init = a
        stage(a)
        h = conv(1 + 2 * i, relu=True)
        stage(h)
        h = conv(2 + 2 * i, relu=False)
        return h * f32(res_scale) + x_init

    a = lax.fori_loop(0, num_blocks, body, x1)

    # ---- tail_1 + long skip ----
    stage(a)
    a = conv(1 + 2 * num_blocks, relu=False) + x1

    # ---- tail_2 ----
    stage(a)
    a = conv(2 + 2 * num_blocks, relu=False)

    o_ref[0] = a.astype(o_ref.dtype)


def _pack_layer(w, b, C):
    """OIHW (cout,cin,5,5) weight + (cout,) bias -> (5, C, 5*C) wmat, (C, 1) bias.

    wmat[kh, co, kw*C + ci] = w[co, ci, kh, kw]
    """
    cout, cin = w.shape[0], w.shape[1]
    w = jnp.pad(w, ((0, C - cout), (0, C - cin), (0, 0), (0, 0)))
    b = jnp.pad(b, ((0, C - cout),))
    wmat = jnp.transpose(w, (2, 0, 3, 1)).reshape(5, C, 5 * C)
    return wmat, b.reshape(C, 1)


def transfer_forward(x, params, *, num_blocks, res_scale):
    """Fused `transfer` forward.  x: (N, Cin, H, W) NCHW; params in OIHW layout."""
    N, cin, H, W = x.shape
    n_feats = params["head_w"].shape[0]
    cout = params["tail2_w"].shape[0]
    C = max(cin, cout, n_feats)
    C = (C + 7) // 8 * 8                    # sublane-align the common channel width
    HW = H * W
    assert 2 * W + 2 <= _PAD, "image width too large for the fixed halo width"

    ws, bs = [], []

    def add(w, b):
        wm, bm = _pack_layer(w, b, C)
        ws.append(wm)
        bs.append(bm)

    add(params["head_w"], params["head_b"])
    for (w1, b1, w2, b2) in params["blocks"]:
        add(w1, b1)
        add(w2, b2)
    add(params["tail1_w"], params["tail1_b"])
    add(params["tail2_w"], params["tail2_b"])

    # Stacked weights (bf16 MXU operands; at realistic n_feats, 5*C >= 128 so the
    # last dim is lane-dense).  Biases stay f32.
    w_all = jnp.stack(ws).astype(jnp.bfloat16)   # (L, 5, C, 5*C)
    b_all = jnp.stack(bs).astype(jnp.float32)    # (L, C, 1)
    L = w_all.shape[0]

    # Lane-dense activation layout for the kernel: (N, C, H*W), spatial on lanes.
    x_p = jnp.pad(x.reshape(N, cin, HW), ((0, 0), (0, C - cin), (0, 0)))

    kernel = functools.partial(
        _transfer_kernel, H=H, W=W, C=C,
        num_blocks=num_blocks, res_scale=float(res_scale))

    out = pl.pallas_call(
        kernel,
        out_shape=jax.ShapeDtypeStruct((N, C, HW), x.dtype),
        grid_spec=pltpu.PrefetchScalarGridSpec(
            num_scalar_prefetch=0,
            grid=(N,),
            in_specs=[
                pl.BlockSpec((1, C, HW), lambda n: (n, 0, 0)),
                pl.BlockSpec((L, 5, C, 5 * C), lambda n: (0, 0, 0, 0)),
                pl.BlockSpec((L, C, 1), lambda n: (0, 0, 0)),
            ],
            out_specs=pl.BlockSpec((1, C, HW), lambda n: (n, 0, 0)),
            scratch_shapes=[
                pltpu.VMEM((C, _PAD + HW + _PAD), jnp.float32),  # haloed flat act
            ],
        ),
        compiler_params=pltpu.CompilerParams(
            dimension_semantics=("parallel",),   # batch across TensorCores (v7x)
        ),
    )(x_p, w_all, b_all)

    # Layout plumbing back to NCHW + channel un-padding (wrapper-side, cheap).
    return out.reshape(N, C, H, W)[:, :cout]


# ------------------------------- pure-JAX ref --------------------------------

def _ref_conv(x, w, b):
    y = lax.conv_general_dilated(
        x, w, window_strides=(1, 1), padding="SAME",
        dimension_numbers=("NCHW", "OIHW", "NCHW"),
    )
    return y + b[None, :, None, None]


def transfer_forward_ref(x, params, *, num_blocks, res_scale):
    x = jax.nn.relu(_ref_conv(x, params["head_w"], params["head_b"]))
    x1 = x
    for i in range(num_blocks):
        w1, b1, w2, b2 = params["blocks"][i]
        h = jax.nn.relu(_ref_conv(x, w1, b1))
        x = _ref_conv(h, w2, b2) * res_scale + x
    x = _ref_conv(x, params["tail1_w"], params["tail1_b"]) + x1
    return _ref_conv(x, params["tail2_w"], params["tail2_b"])


# ---------------------------------- main --------------------------------------

if __name__ == "__main__":
    num_blocks = 2
    in_channel = 4
    out_channel = 4
    n_feats = 8
    res_scale = 0.5
    N, H, W = 2, 16, 16

    key = jax.random.PRNGKey(0)

    def conv_params(key, cin, cout):
        kw_, kb_ = jax.random.split(key)
        w = jax.random.normal(kw_, (cout, cin, 5, 5), jnp.float32) * 0.05
        b = jax.random.normal(kb_, (cout,), jnp.float32) * 0.05
        return w, b

    keys = jax.random.split(key, 4 + 2 * num_blocks)
    head_w, head_b = conv_params(keys[0], in_channel, n_feats)
    blocks = []
    for i in range(num_blocks):
        w1, b1 = conv_params(keys[1 + 2 * i], n_feats, n_feats)
        w2, b2 = conv_params(keys[2 + 2 * i], n_feats, n_feats)
        blocks.append((w1, b1, w2, b2))
    tail1_w, tail1_b = conv_params(keys[1 + 2 * num_blocks], n_feats, n_feats)
    tail2_w, tail2_b = conv_params(keys[2 + 2 * num_blocks], n_feats, out_channel)

    params = dict(
        head_w=head_w, head_b=head_b, blocks=blocks,
        tail1_w=tail1_w, tail1_b=tail1_b,
        tail2_w=tail2_w, tail2_b=tail2_b,
    )

    x = jax.random.normal(keys[3 + 2 * num_blocks],
                          (N, in_channel, H, W), jnp.float32)

    fwd = jax.jit(
        functools.partial(transfer_forward, num_blocks=num_blocks, res_scale=res_scale)
    )
    out = jax.block_until_ready(fwd(x, params))

    ref = transfer_forward_ref(x, params, num_blocks=num_blocks, res_scale=res_scale)
    assert out.shape == (N, out_channel, H, W), out.shape
    # bf16 MXU operands with f32 accumulation -> looser tolerance than pure f32.
    max_err = float(jnp.max(jnp.abs(out - ref)))
    assert jnp.allclose(out, ref, rtol=5e-2, atol=5e-2), max_err

    print("KERNEL_OK")
</pallas_src>

<mosaic_0001>
module attributes {stable_mosaic.version = 11 : i64} {
  func.func @_transfer_kernel(%arg0: i32, %arg1: memref<1x8x256xf32, #tpu.memory_space<vmem>>, %arg2: memref<7x5x8x40xbf16, #tpu.memory_space<vmem>>, %arg3: memref<7x8x1xf32, #tpu.memory_space<vmem>>, %arg4: memref<1x8x256xf32, #tpu.memory_space<vmem>>, %arg5: memref<8x512xf32, #tpu.memory_space<vmem>>) attributes {dimension_semantics = [#tpu.dimension_semantics<parallel>], iteration_bounds = array<i64: 2>, scalar_prefetch = 0 : i64, scratch_operands = 1 : i64, tpu.core_type = #tpu.core_type<tc>, window_params = [{transform_indices = @transform_0, window_bounds = array<i64: 1, 8, 256>}, {pipeline_mode = #tpu.pipeline_mode<synchronous>, transform_indices = @transform_1, window_bounds = array<i64: 7, 5, 8, 40>}, {pipeline_mode = #tpu.pipeline_mode<synchronous>, transform_indices = @transform_2, window_bounds = array<i64: 7, 8, 1>}, {transform_indices = @transform_3, window_bounds = array<i64: 1, 8, 256>}]} {
    %cst = arith.constant 0.000000e+00 : f32
    %0 = vector.broadcast %cst : f32 to vector<8x128xf32>
    %c0 = arith.constant 0 : index
    %c0_0 = arith.constant 0 : index
    %1 = vector.load %arg5[%c0, %c0_0] : memref<8x512xf32, #tpu.memory_space<vmem>>, vector<8x128xf32>
    tpu.vector_store %arg5[%c0, %c0_0], %0 {strides = array<i32>} : memref<8x512xf32, #tpu.memory_space<vmem>>, vector<8x128xf32>,
    %cst_1 = arith.constant 0.000000e+00 : f32
    %2 = vector.broadcast %cst_1 : f32 to vector<8x128xf32>
    %c0_2 = arith.constant 0 : index
    %c384 = arith.constant 384 : index
    %3 = vector.load %arg5[%c0_2, %c384] : memref<8x512xf32, #tpu.memory_space<vmem>>, vector<8x128xf32>
    tpu.vector_store %arg5[%c0_2, %c384], %2 {strides = array<i32>} : memref<8x512xf32, #tpu.memory_space<vmem>>, vector<8x128xf32>,
    %4 = tpu.iota {dimensions = array<i32: 1>} : vector<8x256xi32>
    %c16_i32 = arith.constant 16 : i32
    %c0_i32 = arith.constant 0 : i32
    %5 = arith.cmpi eq, %c16_i32, %c0_i32 : i32
    %c1_i32 = arith.constant 1 : i32
    %6 = arith.select %5, %c1_i32, %c16_i32 : i32
    %7 = vector.broadcast %6 : i32 to vector<8x256xi32>
    %8 = arith.remsi %4, %7 : vector<8x256xi32>
    %c0_i32_3 = arith.constant 0 : i32
    %9 = vector.broadcast %c0_i32_3 : i32 to vector<8x256xi32>
    %10 = arith.cmpi ne, %8, %9 : vector<8x256xi32>
    %c0_i32_4 = arith.constant 0 : i32
    %11 = vector.broadcast %c0_i32_4 : i32 to vector<8x256xi32>
    %12 = arith.cmpi slt, %8, %11 : vector<8x256xi32>
    %c0_i32_5 = arith.constant 0 : i32
    %13 = arith.cmpi slt, %6, %c0_i32_5 : i32
    %14 = vector.broadcast %13 : i1 to vector<8x256xi1>
    %15 = vector.broadcast %14 : vector<8x256xi1> to vector<8x256xi1>
    %16 = arith.xori %12, %15 : vector<8x256xi1>
    %17 = arith.andi %16, %10 : vector<8x256xi1>
    %18 = vector.broadcast %6 : i32 to vector<8x256xi32>
    %19 = arith.addi %8, %18 : vector<8x256xi32>
    %20 = arith.select %17, %19, %8 : vector<8x256xi1>, vector<8x256xi32>
    %c0_6 = arith.constant 0 : index
    %c0_7 = arith.constant 0 : index
    %c0_8 = arith.constant 0 : index
    %21 = vector.load %arg1[%c0_6, %c0_7, %c0_8] : memref<1x8x256xf32, #tpu.memory_space<vmem>>, vector<1x8x256xf32>
    %22 = vector.shape_cast %21 : vector<1x8x256xf32> to vector<8x256xf32>
    %c0_9 = arith.constant 0 : index
    %c128 = arith.constant 128 : index
    %23 = vector.load %arg5[%c0_9, %c128] : memref<8x512xf32, #tpu.memory_space<vmem>>, vector<8x256xf32>
    tpu.vector_store %arg5[%c0_9, %c128], %22 {strides = array<i32>} : memref<8x512xf32, #tpu.memory_space<vmem>>, vector<8x256xf32>,
    %cst_10 = arith.constant 0.000000e+00 : f32
    %24 = vector.broadcast %cst_10 : f32 to vector<8x256xf32>
    %c0_11 = arith.constant 0 : index
    %c94 = arith.constant 94 : index
    %25 = vector.load %arg5[%c0_11, %c94] : memref<8x512xf32, #tpu.memory_space<vmem>>, vector<8x256xf32>
    %c2_i32 = arith.constant 2 : i32
    %26 = vector.broadcast %c2_i32 : i32 to vector<8x256xi32>
    %27 = arith.cmpi sge, %20, %26 : vector<8x256xi32>
    %c18_i32 = arith.constant 18 : i32
    %28 = vector.broadcast %c18_i32 : i32 to vector<8x256xi32>
    %29 = arith.cmpi slt, %20, %28 : vector<8x256xi32>
    %30 = arith.andi %27, %29 : vector<8x256xi1>
    %cst_12 = arith.constant 0.000000e+00 : f32
    %31 = vector.broadcast %cst_12 : f32 to vector<8x256xf32>
    %32 = arith.select %30, %25, %31 : vector<8x256xi1>, vector<8x256xf32>
    %c0_13 = arith.constant 0 : index
    %c95 = arith.constant 95 : index
    %33 = vector.load %arg5[%c0_13, %c95] : memref<8x512xf32, #tpu.memory_space<vmem>>, vector<8x256xf32>
    %c1_i32_14 = arith.constant 1 : i32
    %34 = vector.broadcast %c1_i32_14 : i32 to vector<8x256xi32>
    %35 = arith.cmpi sge, %20, %34 : vector<8x256xi32>
    %c17_i32 = arith.constant 17 : i32
    %36 = vector.broadcast %c17_i32 : i32 to vector<8x256xi32>
    %37 = arith.cmpi slt, %20, %36 : vector<8x256xi32>
    %38 = arith.andi %35, %37 : vector<8x256xi1>
    %cst_15 = arith.constant 0.000000e+00 : f32
    %39 = vector.broadcast %cst_15 : f32 to vector<8x256xf32>
    %40 = arith.select %38, %33, %39 : vector<8x256xi1>, vector<8x256xf32>
    %c0_16 = arith.constant 0 : index
    %c96 = arith.constant 96 : index
    %41 = vector.load %arg5[%c0_16, %c96] : memref<8x512xf32, #tpu.memory_space<vmem>>, vector<8x256xf32>
    %c0_17 = arith.constant 0 : index
    %c97 = arith.constant 97 : index
    %42 = vector.load %arg5[%c0_17, %c97] : memref<8x512xf32, #tpu.memory_space<vmem>>, vector<8x256xf32>
    %c-1_i32 = arith.constant -1 : i32
    %43 = vector.broadcast %c-1_i32 : i32 to vector<8x256xi32>
    %44 = arith.cmpi sge, %20, %43 : vector<8x256xi32>
    %c15_i32 = arith.constant 15 : i32
    %45 = vector.broadcast %c15_i32 : i32 to vector<8x256xi32>
    %46 = arith.cmpi slt, %20, %45 : vector<8x256xi32>
    %47 = arith.andi %44, %46 : vector<8x256xi1>
    %cst_18 = arith.constant 0.000000e+00 : f32
    %48 = vector.broadcast %cst_18 : f32 to vector<8x256xf32>
    %49 = arith.select %47, %42, %48 : vector<8x256xi1>, vector<8x256xf32>
    %c0_19 = arith.constant 0 : index
    %c98 = arith.constant 98 : index
    %50 = vector.load %arg5[%c0_19, %c98] : memref<8x512xf32, #tpu.memory_space<vmem>>, vector<8x256xf32>
    %c-2_i32 = arith.constant -2 : i32
    %51 = vector.broadcast %c-2_i32 : i32 to vector<8x256xi32>
    %52 = arith.cmpi sge, %20, %51 : vector<8x256xi32>
    %c14_i32 = arith.constant 14 : i32
    %53 = vector.broadcast %c14_i32 : i32 to vector<8x256xi32>
    %54 = arith.cmpi slt, %20, %53 : vector<8x256xi32>
    %55 = arith.andi %52, %54 : vector<8x256xi1>
    %cst_20 = arith.constant 0.000000e+00 : f32
    %56 = vector.broadcast %cst_20 : f32 to vector<8x256xf32>
    %57 = arith.select %55, %50, %56 : vector<8x256xi1>, vector<8x256xf32>
    %58 = tpu.concatenate %32, %40, %41, %49, %57 in 0 : vector<8x256xf32>, vector<8x256xf32>, vector<8x256xf32>, vector<8x256xf32>, vector<8x256xf32> -> vector<40x256xf32>
    %59 = arith.truncf %58 : vector<40x256xf32> to vector<40x256xbf16>
    %c0_21 = arith.constant 0 : index
    %c0_22 = arith.constant 0 : index
    %c0_23 = arith.constant 0 : index
    %c0_24 = arith.constant 0 : index
    %60 = vector.load %arg2[%c0_21, %c0_22, %c0_23, %c0_24] : memref<7x5x8x40xbf16, #tpu.memory_space<vmem>>, vector<1x1x8x40xbf16>
    %61 = vector.shape_cast %60 : vector<1x1x8x40xbf16> to vector<8x40xbf16>
    %cst_25 = arith.constant dense<0.000000e+00> : vector<8x256xf32>
    %62 = tpu.matmul %61, %59, %cst_25 {dimension_numbers = #tpu.dot_dimension_numbers<[1], [0], [0], [1], [0, 0, 1, 1], [], []>} : vector<8x40xbf16>, vector<40x256xbf16>, vector<8x256xf32> -> vector<8x256xf32>
    %63 = arith.addf %24, %62 : vector<8x256xf32>
    %c0_26 = arith.constant 0 : index
    %c110 = arith.constant 110 : index
    %64 = vector.load %arg5[%c0_26, %c110] : memref<8x512xf32, #tpu.memory_space<vmem>>, vector<8x256xf32>
    %c2_i32_27 = arith.constant 2 : i32
    %65 = vector.broadcast %c2_i32_27 : i32 to vector<8x256xi32>
    %66 = arith.cmpi sge, %20, %65 : vector<8x256xi32>
    %c18_i32_28 = arith.constant 18 : i32
    %67 = vector.broadcast %c18_i32_28 : i32 to vector<8x256xi32>
    %68 = arith.cmpi slt, %20, %67 : vector<8x256xi32>
    %69 = arith.andi %66, %68 : vector<8x256xi1>
    %cst_29 = arith.constant 0.000000e+00 : f32
    %70 = vector.broadcast %cst_29 : f32 to vector<8x256xf32>
    %71 = arith.select %69, %64, %70 : vector<8x256xi1>, vector<8x256xf32>
    %c0_30 = arith.constant 0 : index
    %c111 = arith.constant 111 : index
    %72 = vector.load %arg5[%c0_30, %c111] : memref<8x512xf32, #tpu.memory_space<vmem>>, vector<8x256xf32>
    %c1_i32_31 = arith.constant 1 : i32
    %73 = vector.broadcast %c1_i32_31 : i32 to vector<8x256xi32>
    %74 = arith.cmpi sge, %20, %73 : vector<8x256xi32>
    %c17_i32_32 = arith.constant 17 : i32
    %75 = vector.broadcast %c17_i32_32 : i32 to vector<8x256xi32>
    %76 = arith.cmpi slt, %20, %75 : vector<8x256xi32>
    %77 = arith.andi %74, %76 : vector<8x256xi1>
    %cst_33 = arith.constant 0.000000e+00 : f32
    %78 = vector.broadcast %cst_33 : f32 to vector<8x256xf32>
    %79 = arith.select %77, %72, %78 : vector<8x256xi1>, vector<8x256xf32>
    %c0_34 = arith.constant 0 : index
    %c112 = arith.constant 112 : index
    %80 = vector.load %arg5[%c0_34, %c112] : memref<8x512xf32, #tpu.memory_space<vmem>>, vector<8x256xf32>
    %c0_35 = arith.constant 0 : index
    %c113 = arith.constant 113 : index
    %81 = vector.load %arg5[%c0_35, %c113] : memref<8x512xf32, #tpu.memory_space<vmem>>, vector<8x256xf32>
    %c-1_i32_36 = arith.constant -1 : i32
    %82 = vector.broadcast %c-1_i32_36 : i32 to vector<8x256xi32>
    %83 = arith.cmpi sge, %20, %82 : vector<8x256xi32>
    %c15_i32_37 = arith.constant 15 : i32
    %84 = vector.broadcast %c15_i32_37 : i32 to vector<8x256xi32>
    %85 = arith.cmpi slt, %20, %84 : vector<8x256xi32>
    %86 = arith.andi %83, %85 : vector<8x256xi1>
    %cst_38 = arith.constant 0.000000e+00 : f32
    %87 = vector.broadcast %cst_38 : f32 to vector<8x256xf32>
    %88 = arith.select %86, %81, %87 : vector<8x256xi1>, vector<8x256xf32>
    %c0_39 = arith.constant 0 : index
    %c114 = arith.constant 114 : index
    %89 = vector.load %arg5[%c0_39, %c114] : memref<8x512xf32, #tpu.memory_space<vmem>>, vector<8x256xf32>
    %c-2_i32_40 = arith.constant -2 : i32
    %90 = vector.broadcast %c-2_i32_40 : i32 to vector<8x256xi32>
    %91 = arith.cmpi sge, %20, %90 : vector<8x256xi32>
    %c14_i32_41 = arith.constant 14 : i32
    %92 = vector.broadcast %c14_i32_41 : i32 to vector<8x256xi32>
    %93 = arith.cmpi slt, %20, %92 : vector<8x256xi32>
    %94 = arith.andi %91, %93 : vector<8x256xi1>
    %cst_42 = arith.constant 0.000000e+00 : f32
    %95 = vector.broadcast %cst_42 : f32 to vector<8x256xf32>
    %96 = arith.select %94, %89, %95 : vector<8x256xi1>, vector<8x256xf32>
    %97 = tpu.concatenate %71, %79, %80, %88, %96 in 0 : vector<8x256xf32>, vector<8x256xf32>, vector<8x256xf32>, vector<8x256xf32>, vector<8x256xf32> -> vector<40x256xf32>
    %98 = arith.truncf %97 : vector<40x256xf32> to vector<40x256xbf16>
    %c0_43 = arith.constant 0 : index
    %c1 = arith.constant 1 : index
    %c0_44 = arith.constant 0 : index
    %c0_45 = arith.constant 0 : index
    %99 = vector.load %arg2[%c0_43, %c1, %c0_44, %c0_45] : memref<7x5x8x40xbf16, #tpu.memory_space<vmem>>, vector<1x1x8x40xbf16>
    %100 = vector.shape_cast %99 : vector<1x1x8x40xbf16> to vector<8x40xbf16>
    %cst_46 = arith.constant dense<0.000000e+00> : vector<8x256xf32>
    %101 = tpu.matmul %100, %98, %cst_46 {dimension_numbers = #tpu.dot_dimension_numbers<[1], [0], [0], [1], [0, 0, 1, 1], [], []>} : vector<8x40xbf16>, vector<40x256xbf16>, vector<8x256xf32> -> vector<8x256xf32>
    %102 = arith.addf %63, %101 : vector<8x256xf32>
    %c0_47 = arith.constant 0 : index
    %c126 = arith.constant 126 : index
    %103 = vector.load %arg5[%c0_47, %c126] : memref<8x512xf32, #tpu.memory_space<vmem>>, vector<8x256xf32>
    %c2_i32_48 = arith.constant 2 : i32
    %104 = vector.broadcast %c2_i32_48 : i32 to vector<8x256xi32>
    %105 = arith.cmpi sge, %20, %104 : vector<8x256xi32>
    %c18_i32_49 = arith.constant 18 : i32
    %106 = vector.broadcast %c18_i32_49 : i32 to vector<8x256xi32>
    %107 = arith.cmpi slt, %20, %106 : vector<8x256xi32>
    %108 = arith.andi %105, %107 : vector<8x256xi1>
    %cst_50 = arith.constant 0.000000e+00 : f32
    %109 = vector.broadcast %cst_50 : f32 to vector<8x256xf32>
    %110 = arith.select %108, %103, %109 : vector<8x256xi1>, vector<8x256xf32>
    %c0_51 = arith.constant 0 : index
    %c127 = arith.constant 127 : index
    %111 = vector.load %arg5[%c0_51, %c127] : memref<8x512xf32, #tpu.memory_space<vmem>>, vector<8x256xf32>
    %c1_i32_52 = arith.constant 1 : i32
    %112 = vector.broadcast %c1_i32_52 : i32 to vector<8x256xi32>
    %113 = arith.cmpi sge, %20, %112 : vector<8x256xi32>
    %c17_i32_53 = arith.constant 17 : i32
    %114 = vector.broadcast %c17_i32_53 : i32 to vector<8x256xi32>
    %115 = arith.cmpi slt, %20, %114 : vector<8x256xi32>
    %116 = arith.andi %113, %115 : vector<8x256xi1>
    %cst_54 = arith.constant 0.000000e+00 : f32
    %117 = vector.broadcast %cst_54 : f32 to vector<8x256xf32>
    %118 = arith.select %116, %111, %117 : vector<8x256xi1>, vector<8x256xf32>
    %c0_55 = arith.constant 0 : index
    %c128_56 = arith.constant 128 : index
    %119 = vector.load %arg5[%c0_55, %c128_56] : memref<8x512xf32, #tpu.memory_space<vmem>>, vector<8x256xf32>
    %c0_57 = arith.constant 0 : index
    %c129 = arith.constant 129 : index
    %120 = vector.load %arg5[%c0_57, %c129] : memref<8x512xf32, #tpu.memory_space<vmem>>, vector<8x256xf32>
    %c-1_i32_58 = arith.constant -1 : i32
    %121 = vector.broadcast %c-1_i32_58 : i32 to vector<8x256xi32>
    %122 = arith.cmpi sge, %20, %121 : vector<8x256xi32>
    %c15_i32_59 = arith.constant 15 : i32
    %123 = vector.broadcast %c15_i32_59 : i32 to vector<8x256xi32>
    %124 = arith.cmpi slt, %20, %123 : vector<8x256xi32>
    %125 = arith.andi %122, %124 : vector<8x256xi1>
    %cst_60 = arith.constant 0.000000e+00 : f32
    %126 = vector.broadcast %cst_60 : f32 to vector<8x256xf32>
    %127 = arith.select %125, %120, %126 : vector<8x256xi1>, vector<8x256xf32>
    %c0_61 = arith.constant 0 : index
    %c130 = arith.constant 130 : index
    %128 = vector.load %arg5[%c0_61, %c130] : memref<8x512xf32, #tpu.memory_space<vmem>>, vector<8x256xf32>
    %c-2_i32_62 = arith.constant -2 : i32
    %129 = vector.broadcast %c-2_i32_62 : i32 to vector<8x256xi32>
    %130 = arith.cmpi sge, %20, %129 : vector<8x256xi32>
    %c14_i32_63 = arith.constant 14 : i32
    %131 = vector.broadcast %c14_i32_63 : i32 to vector<8x256xi32>
    %132 = arith.cmpi slt, %20, %131 : vector<8x256xi32>
    %133 = arith.andi %130, %132 : vector<8x256xi1>
    %cst_64 = arith.constant 0.000000e+00 : f32
    %134 = vector.broadcast %cst_64 : f32 to vector<8x256xf32>
    %135 = arith.select %133, %128, %134 : vector<8x256xi1>, vector<8x256xf32>
    %136 = tpu.concatenate %110, %118, %119, %127, %135 in 0 : vector<8x256xf32>, vector<8x256xf32>, vector<8x256xf32>, vector<8x256xf32>, vector<8x256xf32> -> vector<40x256xf32>
    %137 = arith.truncf %136 : vector<40x256xf32> to vector<40x256xbf16>
    %c0_65 = arith.constant 0 : index
    %c2 = arith.constant 2 : index
    %c0_66 = arith.constant 0 : index
    %c0_67 = arith.constant 0 : index
    %138 = vector.load %arg2[%c0_65, %c2, %c0_66, %c0_67] : memref<7x5x8x40xbf16, #tpu.memory_space<vmem>>, vector<1x1x8x40xbf16>
    %139 = vector.shape_cast %138 : vector<1x1x8x40xbf16> to vector<8x40xbf16>
    %cst_68 = arith.constant dense<0.000000e+00> : vector<8x256xf32>
    %140 = tpu.matmul %139, %137, %cst_68 {dimension_numbers = #tpu.dot_dimension_numbers<[1], [0], [0], [1], [0, 0, 1, 1], [], []>} : vector<8x40xbf16>, vector<40x256xbf16>, vector<8x256xf32> -> vector<8x256xf32>
    %141 = arith.addf %102, %140 : vector<8x256xf32>
    %c0_69 = arith.constant 0 : index
    %c142 = arith.constant 142 : index
    %142 = vector.load %arg5[%c0_69, %c142] : memref<8x512xf32, #tpu.memory_space<vmem>>, vector<8x256xf32>
    %c2_i32_70 = arith.constant 2 : i32
    %143 = vector.broadcast %c2_i32_70 : i32 to vector<8x256xi32>
    %144 = arith.cmpi sge, %20, %143 : vector<8x256xi32>
    %c18_i32_71 = arith.constant 18 : i32
    %145 = vector.broadcast %c18_i32_71 : i32 to vector<8x256xi32>
    %146 = arith.cmpi slt, %20, %145 : vector<8x256xi32>
    %147 = arith.andi %144, %146 : vector<8x256xi1>
    %cst_72 = arith.constant 0.000000e+00 : f32
    %148 = vector.broadcast %cst_72 : f32 to vector<8x256xf32>
    %149 = arith.select %147, %142, %148 : vector<8x256xi1>, vector<8x256xf32>
    %c0_73 = arith.constant 0 : index
    %c143 = arith.constant 143 : index
    %150 = vector.load %arg5[%c0_73, %c143] : memref<8x512xf32, #tpu.memory_space<vmem>>, vector<8x256xf32>
    %c1_i32_74 = arith.constant 1 : i32
    %151 = vector.broadcast %c1_i32_74 : i32 to vector<8x256xi32>
    %152 = arith.cmpi sge, %20, %151 : vector<8x256xi32>
    %c17_i32_75 = arith.constant 17 : i32
    %153 = vector.broadcast %c17_i32_75 : i32 to vector<8x256xi32>
    %154 = arith.cmpi slt, %20, %153 : vector<8x256xi32>
    %155 = arith.andi %152, %154 : vector<8x256xi1>
    %cst_76 = arith.constant 0.000000e+00 : f32
    %156 = vector.broadcast %cst_76 : f32 to vector<8x256xf32>
    %157 = arith.select %155, %150, %156 : vector<8x256xi1>, vector<8x256xf32>
    %c0_77 = arith.constant 0 : index
    %c144 = arith.constant 144 : index
    %158 = vector.load %arg5[%c0_77, %c144] : memref<8x512xf32, #tpu.memory_space<vmem>>, vector<8x256xf32>
    %c0_78 = arith.constant 0 : index
    %c145 = arith.constant 145 : index
    %159 = vector.load %arg5[%c0_78, %c145] : memref<8x512xf32, #tpu.memory_space<vmem>>, vector<8x256xf32>
    %c-1_i32_79 = arith.constant -1 : i32
    %160 = vector.broadcast %c-1_i32_79 : i32 to vector<8x256xi32>
    %161 = arith.cmpi sge, %20, %160 : vector<8x256xi32>
    %c15_i32_80 = arith.constant 15 : i32
    %162 = vector.broadcast %c15_i32_80 : i32 to vector<8x256xi32>
    %163 = arith.cmpi slt, %20, %162 : vector<8x256xi32>
    %164 = arith.andi %161, %163 : vector<8x256xi1>
    %cst_81 = arith.constant 0.000000e+00 : f32
    %165 = vector.broadcast %cst_81 : f32 to vector<8x256xf32>
    %166 = arith.select %164, %159, %165 : vector<8x256xi1>, vector<8x256xf32>
    %c0_82 = arith.constant 0 : index
    %c146 = arith.constant 146 : index
    %167 = vector.load %arg5[%c0_82, %c146] : memref<8x512xf32, #tpu.memory_space<vmem>>, vector<8x256xf32>
    %c-2_i32_83 = arith.constant -2 : i32
    %168 = vector.broadcast %c-2_i32_83 : i32 to vector<8x256xi32>
    %169 = arith.cmpi sge, %20, %168 : vector<8x256xi32>
    %c14_i32_84 = arith.constant 14 : i32
    %170 = vector.broadcast %c14_i32_84 : i32 to vector<8x256xi32>
    %171 = arith.cmpi slt, %20, %170 : vector<8x256xi32>
    %172 = arith.andi %169, %171 : vector<8x256xi1>
    %cst_85 = arith.constant 0.000000e+00 : f32
    %173 = vector.broadcast %cst_85 : f32 to vector<8x256xf32>
    %174 = arith.select %172, %167, %173 : vector<8x256xi1>, vector<8x256xf32>
    %175 = tpu.concatenate %149, %157, %158, %166, %174 in 0 : vector<8x256xf32>, vector<8x256xf32>, vector<8x256xf32>, vector<8x256xf32>, vector<8x256xf32> -> vector<40x256xf32>
    %176 = arith.truncf %175 : vector<40x256xf32> to vector<40x256xbf16>
    %c0_86 = arith.constant 0 : index
    %c3 = arith.constant 3 : index
    %c0_87 = arith.constant 0 : index
    %c0_88 = arith.constant 0 : index
    %177 = vector.load %arg2[%c0_86, %c3, %c0_87, %c0_88] : memref<7x5x8x40xbf16, #tpu.memory_space<vmem>>, vector<1x1x8x40xbf16>
    %178 = vector.shape_cast %177 : vector<1x1x8x40xbf16> to vector<8x40xbf16>
    %cst_89 = arith.constant dense<0.000000e+00> : vector<8x256xf32>
    %179 = tpu.matmul %178, %176, %cst_89 {dimension_numbers = #tpu.dot_dimension_numbers<[1], [0], [0], [1], [0, 0, 1, 1], [], []>} : vector<8x40xbf16>, vector<40x256xbf16>, vector<8x256xf32> -> vector<8x256xf32>
    %180 = arith.addf %141, %179 : vector<8x256xf32>
    %c0_90 = arith.constant 0 : index
    %c158 = arith.constant 158 : index
    %181 = vector.load %arg5[%c0_90, %c158] : memref<8x512xf32, #tpu.memory_space<vmem>>, vector<8x256xf32>
    %c2_i32_91 = arith.constant 2 : i32
    %182 = vector.broadcast %c2_i32_91 : i32 to vector<8x256xi32>
    %183 = arith.cmpi sge, %20, %182 : vector<8x256xi32>
    %c18_i32_92 = arith.constant 18 : i32
    %184 = vector.broadcast %c18_i32_92 : i32 to vector<8x256xi32>
    %185 = arith.cmpi slt, %20, %184 : vector<8x256xi32>
    %186 = arith.andi %183, %185 : vector<8x256xi1>
    %cst_93 = arith.constant 0.000000e+00 : f32
    %187 = vector.broadcast %cst_93 : f32 to vector<8x256xf32>
    %188 = arith.select %186, %181, %187 : vector<8x256xi1>, vector<8x256xf32>
    %c0_94 = arith.constant 0 : index
    %c159 = arith.constant 159 : index
    %189 = vector.load %arg5[%c0_94, %c159] : memref<8x512xf32, #tpu.memory_space<vmem>>, vector<8x256xf32>
    %c1_i32_95 = arith.constant 1 : i32
    %190 = vector.broadcast %c1_i32_95 : i32 to vector<8x256xi32>
    %191 = arith.cmpi sge, %20, %190 : vector<8x256xi32>
    %c17_i32_96 = arith.constant 17 : i32
    %192 = vector.broadcast %c17_i32_96 : i32 to vector<8x256xi32>
    %193 = arith.cmpi slt, %20, %192 : vector<8x256xi32>
    %194 = arith.andi %191, %193 : vector<8x256xi1>
    %cst_97 = arith.constant 0.000000e+00 : f32
    %195 = vector.broadcast %cst_97 : f32 to vector<8x256xf32>
    %196 = arith.select %194, %189, %195 : vector<8x256xi1>, vector<8x256xf32>
    %c0_98 = arith.constant 0 : index
    %c160 = arith.constant 160 : index
    %197 = vector.load %arg5[%c0_98, %c160] : memref<8x512xf32, #tpu.memory_space<vmem>>, vector<8x256xf32>
    %c0_99 = arith.constant 0 : index
    %c161 = arith.constant 161 : index
    %198 = vector.load %arg5[%c0_99, %c161] : memref<8x512xf32, #tpu.memory_space<vmem>>, vector<8x256xf32>
    %c-1_i32_100 = arith.constant -1 : i32
    %199 = vector.broadcast %c-1_i32_100 : i32 to vector<8x256xi32>
    %200 = arith.cmpi sge, %20, %199 : vector<8x256xi32>
    %c15_i32_101 = arith.constant 15 : i32
    %201 = vector.broadcast %c15_i32_101 : i32 to vector<8x256xi32>
    %202 = arith.cmpi slt, %20, %201 : vector<8x256xi32>
    %203 = arith.andi %200, %202 : vector<8x256xi1>
    %cst_102 = arith.constant 0.000000e+00 : f32
    %204 = vector.broadcast %cst_102 : f32 to vector<8x256xf32>
    %205 = arith.select %203, %198, %204 : vector<8x256xi1>, vector<8x256xf32>
    %c0_103 = arith.constant 0 : index
    %c162 = arith.constant 162 : index
    %206 = vector.load %arg5[%c0_103, %c162] : memref<8x512xf32, #tpu.memory_space<vmem>>, vector<8x256xf32>
    %c-2_i32_104 = arith.constant -2 : i32
    %207 = vector.broadcast %c-2_i32_104 : i32 to vector<8x256xi32>
    %208 = arith.cmpi sge, %20, %207 : vector<8x256xi32>
    %c14_i32_105 = arith.constant 14 : i32
    %209 = vector.broadcast %c14_i32_105 : i32 to vector<8x256xi32>
    %210 = arith.cmpi slt, %20, %209 : vector<8x256xi32>
    %211 = arith.andi %208, %210 : vector<8x256xi1>
    %cst_106 = arith.constant 0.000000e+00 : f32
    %212 = vector.broadcast %cst_106 : f32 to vector<8x256xf32>
    %213 = arith.select %211, %206, %212 : vector<8x256xi1>, vector<8x256xf32>
    %214 = tpu.concatenate %188, %196, %197, %205, %213 in 0 : vector<8x256xf32>, vector<8x256xf32>, vector<8x256xf32>, vector<8x256xf32>, vector<8x256xf32> -> vector<40x256xf32>
    %215 = arith.truncf %214 : vector<40x256xf32> to vector<40x256xbf16>
    %c0_107 = arith.constant 0 : index
    %c4 = arith.constant 4 : index
    %c0_108 = arith.constant 0 : index
    %c0_109 = arith.constant 0 : index
    %216 = vector.load %arg2[%c0_107, %c4, %c0_108, %c0_109] : memref<7x5x8x40xbf16, #tpu.memory_space<vmem>>, vector<1x1x8x40xbf16>
    %217 = vector.shape_cast %216 : vector<1x1x8x40xbf16> to vector<8x40xbf16>
    %cst_110 = arith.constant dense<0.000000e+00> : vector<8x256xf32>
    %218 = tpu.matmul %217, %215, %cst_110 {dimension_numbers = #tpu.dot_dimension_numbers<[1], [0], [0], [1], [0, 0, 1, 1], [], []>} : vector<8x40xbf16>, vector<40x256xbf16>, vector<8x256xf32> -> vector<8x256xf32>
    %219 = arith.addf %180, %218 : vector<8x256xf32>
    %c0_111 = arith.constant 0 : index
    %c0_112 = arith.constant 0 : index
    %c0_113 = arith.constant 0 : index
    %220 = vector.load %arg3[%c0_111, %c0_112, %c0_113] : memref<7x8x1xf32, #tpu.memory_space<vmem>>, vector<1x8x1xf32>
    %221 = vector.shape_cast %220 : vector<1x8x1xf32> to vector<8x1xf32>
    %222 = vector.broadcast %221 : vector<8x1xf32> to vector<8x256xf32>
    %223 = arith.addf %219, %222 : vector<8x256xf32>
    %cst_114 = arith.constant 0.000000e+00 : f32
    %224 = vector.broadcast %cst_114 : f32 to vector<8x256xf32>
    %225 = arith.maximumf %223, %224 : vector<8x256xf32>
    %c0_i32_115 = arith.constant 0 : i32
    %c2_i32_116 = arith.constant 2 : i32
    %226 = arith.addi %c0_i32_115, %c2_i32_116 : i32
    %c1_i32_117 = arith.constant 1 : i32
    %227 = scf.for %arg6 = %c0_i32_115 to %226 step %c1_i32_117 iter_args(%arg7 = %225) -> (vector<8x256xf32>)  : i32 {
      %c0_402 = arith.constant 0 : index
      %c128_403 = arith.constant 128 : index
      %634 = vector.load %arg5[%c0_402, %c128_403] : memref<8x512xf32, #tpu.memory_space<vmem>>, vector<8x256xf32>
      tpu.vector_store %arg5[%c0_402, %c128_403], %arg7 {strides = array<i32>} : memref<8x512xf32, #tpu.memory_space<vmem>>, vector<8x256xf32>,
      %c2_i32_404 = arith.constant 2 : i32
      %635 = arith.muli %c2_i32_404, %arg6 : i32
      %c1_i32_405 = arith.constant 1 : i32
      %636 = arith.addi %c1_i32_405, %635 : i32
      %cst_406 = arith.constant 0.000000e+00 : f32
      %637 = vector.broadcast %cst_406 : f32 to vector<8x256xf32>
      %c0_407 = arith.constant 0 : index
      %c94_408 = arith.constant 94 : index
      %638 = vector.load %arg5[%c0_407, %c94_408] : memref<8x512xf32, #tpu.memory_space<vmem>>, vector<8x256xf32>
      %c2_i32_409 = arith.constant 2 : i32
      %639 = vector.broadcast %c2_i32_409 : i32 to vector<8x256xi32>
      %640 = arith.cmpi sge, %20, %639 : vector<8x256xi32>
      %c18_i32_410 = arith.constant 18 : i32
      %641 = vector.broadcast %c18_i32_410 : i32 to vector<8x256xi32>
      %642 = arith.cmpi slt, %20, %641 : vector<8x256xi32>
      %643 = arith.andi %640, %642 : vector<8x256xi1>
      %cst_411 = arith.constant 0.000000e+00 : f32
      %644 = vector.broadcast %cst_411 : f32 to vector<8x256xf32>
      %645 = arith.select %643, %638, %644 : vector<8x256xi1>, vector<8x256xf32>
      %c0_412 = arith.constant 0 : index
      %c95_413 = arith.constant 95 : index
      %646 = vector.load %arg5[%c0_412, %c95_413] : memref<8x512xf32, #tpu.memory_space<vmem>>, vector<8x256xf32>
      %c1_i32_414 = arith.constant 1 : i32
      %647 = vector.broadcast %c1_i32_414 : i32 to vector<8x256xi32>
      %648 = arith.cmpi sge, %20, %647 : vector<8x256xi32>
      %c17_i32_415 = arith.constant 17 : i32
      %649 = vector.broadcast %c17_i32_415 : i32 to vector<8x256xi32>
      %650 = arith.cmpi slt, %20, %649 : vector<8x256xi32>
      %651 = arith.andi %648, %650 : vector<8x256xi1>
      %cst_416 = arith.constant 0.000000e+00 : f32
      %652 = vector.broadcast %cst_416 : f32 to vector<8x256xf32>
      %653 = arith.select %651, %646, %652 : vector<8x256xi1>, vector<8x256xf32>
      %c0_417 = arith.constant 0 : index
      %c96_418 = arith.constant 96 : index
      %654 = vector.load %arg5[%c0_417, %c96_418] : memref<8x512xf32, #tpu.memory_space<vmem>>, vector<8x256xf32>
      %c0_419 = arith.constant 0 : index
      %c97_420 = arith.constant 97 : index
      %655 = vector.load %arg5[%c0_419, %c97_420] : memref<8x512xf32, #tpu.memory_space<vmem>>, vector<8x256xf32>
      %c-1_i32_421 = arith.constant -1 : i32
      %656 = vector.broadcast %c-1_i32_421 : i32 to vector<8x256xi32>
      %657 = arith.cmpi sge, %20, %656 : vector<8x256xi32>
      %c15_i32_422 = arith.constant 15 : i32
      %658 = vector.broadcast %c15_i32_422 : i32 to vector<8x256xi32>
      %659 = arith.cmpi slt, %20, %658 : vector<8x256xi32>
      %660 = arith.andi %657, %659 : vector<8x256xi1>
      %cst_423 = arith.constant 0.000000e+00 : f32
      %661 = vector.broadcast %cst_423 : f32 to vector<8x256xf32>
      %662 = arith.select %660, %655, %661 : vector<8x256xi1>, vector<8x256xf32>
      %c0_424 = arith.constant 0 : index
      %c98_425 = arith.constant 98 : index
      %663 = vector.load %arg5[%c0_424, %c98_425] : memref<8x512xf32, #tpu.memory_space<vmem>>, vector<8x256xf32>
      %c-2_i32_426 = arith.constant -2 : i32
      %664 = vector.broadcast %c-2_i32_426 : i32 to vector<8x256xi32>
      %665 = arith.cmpi sge, %20, %664 : vector<8x256xi32>
      %c14_i32_427 = arith.constant 14 : i32
      %666 = vector.broadcast %c14_i32_427 : i32 to vector<8x256xi32>
      %667 = arith.cmpi slt, %20, %666 : vector<8x256xi32>
      %668 = arith.andi %665, %667 : vector<8x256xi1>
      %cst_428 = arith.constant 0.000000e+00 : f32
      %669 = vector.broadcast %cst_428 : f32 to vector<8x256xf32>
      %670 = arith.select %668, %663, %669 : vector<8x256xi1>, vector<8x256xf32>
      %671 = tpu.concatenate %645, %653, %654, %662, %670 in 0 : vector<8x256xf32>, vector<8x256xf32>, vector<8x256xf32>, vector<8x256xf32>, vector<8x256xf32> -> vector<40x256xf32>
      %672 = arith.truncf %671 : vector<40x256xf32> to vector<40x256xbf16>
      %673 = arith.index_cast %636 : i32 to index
      %c0_429 = arith.constant 0 : index
      %c0_430 = arith.constant 0 : index
      %c0_431 = arith.constant 0 : index
      %674 = vector.load %arg2[%673, %c0_429, %c0_430, %c0_431] : memref<7x5x8x40xbf16, #tpu.memory_space<vmem>>, vector<1x1x8x40xbf16>
      %675 = vector.shape_cast %674 : vector<1x1x8x40xbf16> to vector<8x40xbf16>
      %cst_432 = arith.constant dense<0.000000e+00> : vector<8x256xf32>
      %676 = tpu.matmul %675, %672, %cst_432 {dimension_numbers = #tpu.dot_dimension_numbers<[1], [0], [0], [1], [0, 0, 1, 1], [], []>} : vector<8x40xbf16>, vector<40x256xbf16>, vector<8x256xf32> -> vector<8x256xf32>
      %677 = arith.addf %637, %676 : vector<8x256xf32>
      %c0_433 = arith.constant 0 : index
      %c110_434 = arith.constant 110 : index
      %678 = vector.load %arg5[%c0_433, %c110_434] : memref<8x512xf32, #tpu.memory_space<vmem>>, vector<8x256xf32>
      %c2_i32_435 = arith.constant 2 : i32
      %679 = vector.broadcast %c2_i32_435 : i32 to vector<8x256xi32>
      %680 = arith.cmpi sge, %20, %679 : vector<8x256xi32>
      %c18_i32_436 = arith.constant 18 : i32
      %681 = vector.broadcast %c18_i32_436 : i32 to vector<8x256xi32>
      %682 = arith.cmpi slt, %20, %681 : vector<8x256xi32>
      %683 = arith.andi %680, %682 : vector<8x256xi1>
      %cst_437 = arith.constant 0.000000e+00 : f32
      %684 = vector.broadcast %cst_437 : f32 to vector<8x256xf32>
      %685 = arith.select %683, %678, %684 : vector<8x256xi1>, vector<8x256xf32>
      %c0_438 = arith.constant 0 : index
      %c111_439 = arith.constant 111 : index
      %686 = vector.load %arg5[%c0_438, %c111_439] : memref<8x512xf32, #tpu.memory_space<vmem>>, vector<8x256xf32>
      %c1_i32_440 = arith.constant 1 : i32
      %687 = vector.broadcast %c1_i32_440 : i32 to vector<8x256xi32>
      %688 = arith.cmpi sge, %20, %687 : vector<8x256xi32>
      %c17_i32_441 = arith.constant 17 : i32
      %689 = vector.broadcast %c17_i32_441 : i32 to vector<8x256xi32>
      %690 = arith.cmpi slt, %20, %689 : vector<8x256xi32>
      %691 = arith.andi %688, %690 : vector<8x256xi1>
      %cst_442 = arith.constant 0.000000e+00 : f32
      %692 = vector.broadcast %cst_442 : f32 to vector<8x256xf32>
      %693 = arith.select %691, %686, %692 : vector<8x256xi1>, vector<8x256xf32>
      %c0_443 = arith.constant 0 : index
      %c112_444 = arith.constant 112 : index
      %694 = vector.load %arg5[%c0_443, %c112_444] : memref<8x512xf32, #tpu.memory_space<vmem>>, vector<8x256xf32>
      %c0_445 = arith.constant 0 : index
      %c113_446 = arith.constant 113 : index
      %695 = vector.load %arg5[%c0_445, %c113_446] : memref<8x512xf32, #tpu.memory_space<vmem>>, vector<8x256xf32>
      %c-1_i32_447 = arith.constant -1 : i32
      %696 = vector.broadcast %c-1_i32_447 : i32 to vector<8x256xi32>
      %697 = arith.cmpi sge, %20, %696 : vector<8x256xi32>
      %c15_i32_448 = arith.constant 15 : i32
      %698 = vector.broadcast %c15_i32_448 : i32 to vector<8x256xi32>
      %699 = arith.cmpi slt, %20, %698 : vector<8x256xi32>
      %700 = arith.andi %697, %699 : vector<8x256xi1>
      %cst_449 = arith.constant 0.000000e+00 : f32
      %701 = vector.broadcast %cst_449 : f32 to vector<8x256xf32>
      %702 = arith.select %700, %695, %701 : vector<8x256xi1>, vector<8x256xf32>
      %c0_450 = arith.constant 0 : index
      %c114_451 = arith.constant 114 : index
      %703 = vector.load %arg5[%c0_450, %c114_451] : memref<8x512xf32, #tpu.memory_space<vmem>>, vector<8x256xf32>
      %c-2_i32_452 = arith.constant -2 : i32
      %704 = vector.broadcast %c-2_i32_452 : i32 to vector<8x256xi32>
      %705 = arith.cmpi sge, %20, %704 : vector<8x256xi32>
      %c14_i32_453 = arith.constant 14 : i32
      %706 = vector.broadcast %c14_i32_453 : i32 to vector<8x256xi32>
      %707 = arith.cmpi slt, %20, %706 : vector<8x256xi32>
      %708 = arith.andi %705, %707 : vector<8x256xi1>
      %cst_454 = arith.constant 0.000000e+00 : f32
      %709 = vector.broadcast %cst_454 : f32 to vector<8x256xf32>
      %710 = arith.select %708, %703, %709 : vector<8x256xi1>, vector<8x256xf32>
      %711 = tpu.concatenate %685, %693, %694, %702, %710 in 0 : vector<8x256xf32>, vector<8x256xf32>, vector<8x256xf32>, vector<8x256xf32>, vector<8x256xf32> -> vector<40x256xf32>
      %712 = arith.truncf %711 : vector<40x256xf32> to vector<40x256xbf16>
      %713 = arith.index_cast %636 : i32 to index
      %c1_455 = arith.constant 1 : index
      %c0_456 = arith.constant 0 : index
      %c0_457 = arith.constant 0 : index
      %714 = vector.load %arg2[%713, %c1_455, %c0_456, %c0_457] : memref<7x5x8x40xbf16, #tpu.memory_space<vmem>>, vector<1x1x8x40xbf16>
      %715 = vector.shape_cast %714 : vector<1x1x8x40xbf16> to vector<8x40xbf16>
      %cst_458 = arith.constant dense<0.000000e+00> : vector<8x256xf32>
      %716 = tpu.matmul %715, %712, %cst_458 {dimension_numbers = #tpu.dot_dimension_numbers<[1], [0], [0], [1], [0, 0, 1, 1], [], []>} : vector<8x40xbf16>, vector<40x256xbf16>, vector<8x256xf32> -> vector<8x256xf32>
      %717 = arith.addf %677, %716 : vector<8x256xf32>
      %c0_459 = arith.constant 0 : index
      %c126_460 = arith.constant 126 : index
      %718 = vector.load %arg5[%c0_459, %c126_460] : memref<8x512xf32, #tpu.memory_space<vmem>>, vector<8x256xf32>
      %c2_i32_461 = arith.constant 2 : i32
      %719 = vector.broadcast %c2_i32_461 : i32 to vector<8x256xi32>
      %720 = arith.cmpi sge, %20, %719 : vector<8x256xi32>
      %c18_i32_462 = arith.constant 18 : i32
      %721 = vector.broadcast %c18_i32_462 : i32 to vector<8x256xi32>
      %722 = arith.cmpi slt, %20, %721 : vector<8x256xi32>
      %723 = arith.andi %720, %722 : vector<8x256xi1>
      %cst_463 = arith.constant 0.000000e+00 : f32
      %724 = vector.broadcast %cst_463 : f32 to vector<8x256xf32>
      %725 = arith.select %723, %718, %724 : vector<8x256xi1>, vector<8x256xf32>
      %c0_464 = arith.constant 0 : index
      %c127_465 = arith.constant 127 : index
      %726 = vector.load %arg5[%c0_464, %c127_465] : memref<8x512xf32, #tpu.memory_space<vmem>>, vector<8x256xf32>
      %c1_i32_466 = arith.constant 1 : i32
      %727 = vector.broadcast %c1_i32_466 : i32 to vector<8x256xi32>
      %728 = arith.cmpi sge, %20, %727 : vector<8x256xi32>
      %c17_i32_467 = arith.constant 17 : i32
      %729 = vector.broadcast %c17_i32_467 : i32 to vector<8x256xi32>
      %730 = arith.cmpi slt, %20, %729 : vector<8x256xi32>
      %731 = arith.andi %728, %730 : vector<8x256xi1>
      %cst_468 = arith.constant 0.000000e+00 : f32
      %732 = vector.broadcast %cst_468 : f32 to vector<8x256xf32>
      %733 = arith.select %731, %726, %732 : vector<8x256xi1>, vector<8x256xf32>
      %c0_469 = arith.constant 0 : index
      %c128_470 = arith.constant 128 : index
      %734 = vector.load %arg5[%c0_469, %c128_470] : memref<8x512xf32, #tpu.memory_space<vmem>>, vector<8x256xf32>
      %c0_471 = arith.constant 0 : index
      %c129_472 = arith.constant 129 : index
      %735 = vector.load %arg5[%c0_471, %c129_472] : memref<8x512xf32, #tpu.memory_space<vmem>>, vector<8x256xf32>
      %c-1_i32_473 = arith.constant -1 : i32
      %736 = vector.broadcast %c-1_i32_473 : i32 to vector<8x256xi32>
      %737 = arith.cmpi sge, %20, %736 : vector<8x256xi32>
      %c15_i32_474 = arith.constant 15 : i32
      %738 = vector.broadcast %c15_i32_474 : i32 to vector<8x256xi32>
      %739 = arith.cmpi slt, %20, %738 : vector<8x256xi32>
      %740 = arith.andi %737, %739 : vector<8x256xi1>
      %cst_475 = arith.constant 0.000000e+00 : f32
      %741 = vector.broadcast %cst_475 : f32 to vector<8x256xf32>
      %742 = arith.select %740, %735, %741 : vector<8x256xi1>, vector<8x256xf32>
      %c0_476 = arith.constant 0 : index
      %c130_477 = arith.constant 130 : index
      %743 = vector.load %arg5[%c0_476, %c130_477] : memref<8x512xf32, #tpu.memory_space<vmem>>, vector<8x256xf32>
      %c-2_i32_478 = arith.constant -2 : i32
      %744 = vector.broadcast %c-2_i32_478 : i32 to vector<8x256xi32>
      %745 = arith.cmpi sge, %20, %744 : vector<8x256xi32>
      %c14_i32_479 = arith.constant 14 : i32
      %746 = vector.broadcast %c14_i32_479 : i32 to vector<8x256xi32>
      %747 = arith.cmpi slt, %20, %746 : vector<8x256xi32>
      %748 = arith.andi %745, %747 : vector<8x256xi1>
      %cst_480 = arith.constant 0.000000e+00 : f32
      %749 = vector.broadcast %cst_480 : f32 to vector<8x256xf32>
      %750 = arith.select %748, %743, %749 : vector<8x256xi1>, vector<8x256xf32>
      %751 = tpu.concatenate %725, %733, %734, %742, %750 in 0 : vector<8x256xf32>, vector<8x256xf32>, vector<8x256xf32>, vector<8x256xf32>, vector<8x256xf32> -> vector<40x256xf32>
      %752 = arith.truncf %751 : vector<40x256xf32> to vector<40x256xbf16>
      %753 = arith.index_cast %636 : i32 to index
      %c2_481 = arith.constant 2 : index
      %c0_482 = arith.constant 0 : index
      %c0_483 = arith.constant 0 : index
      %754 = vector.load %arg2[%753, %c2_481, %c0_482, %c0_483] : memref<7x5x8x40xbf16, #tpu.memory_space<vmem>>, vector<1x1x8x40xbf16>
      %755 = vector.shape_cast %754 : vector<1x1x8x40xbf16> to vector<8x40xbf16>
      %cst_484 = arith.constant dense<0.000000e+00> : vector<8x256xf32>
      %756 = tpu.matmul %755, %752, %cst_484 {dimension_numbers = #tpu.dot_dimension_numbers<[1], [0], [0], [1], [0, 0, 1, 1], [], []>} : vector<8x40xbf16>, vector<40x256xbf16>, vector<8x256xf32> -> vector<8x256xf32>
      %757 = arith.addf %717, %756 : vector<8x256xf32>
      %c0_485 = arith.constant 0 : index
      %c142_486 = arith.constant 142 : index
      %758 = vector.load %arg5[%c0_485, %c142_486] : memref<8x512xf32, #tpu.memory_space<vmem>>, vector<8x256xf32>
      %c2_i32_487 = arith.constant 2 : i32
      %759 = vector.broadcast %c2_i32_487 : i32 to vector<8x256xi32>
      %760 = arith.cmpi sge, %20, %759 : vector<8x256xi32>
      %c18_i32_488 = arith.constant 18 : i32
      %761 = vector.broadcast %c18_i32_488 : i32 to vector<8x256xi32>
      %762 = arith.cmpi slt, %20, %761 : vector<8x256xi32>
      %763 = arith.andi %760, %762 : vector<8x256xi1>
      %cst_489 = arith.constant 0.000000e+00 : f32
      %764 = vector.broadcast %cst_489 : f32 to vector<8x256xf32>
      %765 = arith.select %763, %758, %764 : vector<8x256xi1>, vector<8x256xf32>
      %c0_490 = arith.constant 0 : index
      %c143_491 = arith.constant 143 : index
      %766 = vector.load %arg5[%c0_490, %c143_491] : memref<8x512xf32, #tpu.memory_space<vmem>>, vector<8x256xf32>
      %c1_i32_492 = arith.constant 1 : i32
      %767 = vector.broadcast %c1_i32_492 : i32 to vector<8x256xi32>
      %768 = arith.cmpi sge, %20, %767 : vector<8x256xi32>
      %c17_i32_493 = arith.constant 17 : i32
      %769 = vector.broadcast %c17_i32_493 : i32 to vector<8x256xi32>
      %770 = arith.cmpi slt, %20, %769 : vector<8x256xi32>
      %771 = arith.andi %768, %770 : vector<8x256xi1>
      %cst_494 = arith.constant 0.000000e+00 : f32
      %772 = vector.broadcast %cst_494 : f32 to vector<8x256xf32>
      %773 = arith.select %771, %766, %772 : vector<8x256xi1>, vector<8x256xf32>
      %c0_495 = arith.constant 0 : index
      %c144_496 = arith.constant 144 : index
      %774 = vector.load %arg5[%c0_495, %c144_496] : memref<8x512xf32, #tpu.memory_space<vmem>>, vector<8x256xf32>
      %c0_497 = arith.constant 0 : index
      %c145_498 = arith.constant 145 : index
      %775 = vector.load %arg5[%c0_497, %c145_498] : memref<8x512xf32, #tpu.memory_space<vmem>>, vector<8x256xf32>
      %c-1_i32_499 = arith.constant -1 : i32
      %776 = vector.broadcast %c-1_i32_499 : i32 to vector<8x256xi32>
      %777 = arith.cmpi sge, %20, %776 : vector<8x256xi32>
      %c15_i32_500 = arith.constant 15 : i32
      %778 = vector.broadcast %c15_i32_500 : i32 to vector<8x256xi32>
      %779 = arith.cmpi slt, %20, %778 : vector<8x256xi32>
      %780 = arith.andi %777, %779 : vector<8x256xi1>
      %cst_501 = arith.constant 0.000000e+00 : f32
      %781 = vector.broadcast %cst_501 : f32 to vector<8x256xf32>
      %782 = arith.select %780, %775, %781 : vector<8x256xi1>, vector<8x256xf32>
      %c0_502 = arith.constant 0 : index
      %c146_503 = arith.constant 146 : index
      %783 = vector.load %arg5[%c0_502, %c146_503] : memref<8x512xf32, #tpu.memory_space<vmem>>, vector<8x256xf32>
      %c-2_i32_504 = arith.constant -2 : i32
      %784 = vector.broadcast %c-2_i32_504 : i32 to vector<8x256xi32>
      %785 = arith.cmpi sge, %20, %784 : vector<8x256xi32>
      %c14_i32_505 = arith.constant 14 : i32
      %786 = vector.broadcast %c14_i32_505 : i32 to vector<8x256xi32>
      %787 = arith.cmpi slt, %20, %786 : vector<8x256xi32>
      %788 = arith.andi %785, %787 : vector<8x256xi1>
      %cst_506 = arith.constant 0.000000e+00 : f32
      %789 = vector.broadcast %cst_506 : f32 to vector<8x256xf32>
      %790 = arith.select %788, %783, %789 : vector<8x256xi1>, vector<8x256xf32>
      %791 = tpu.concatenate %765, %773, %774, %782, %790 in 0 : vector<8x256xf32>, vector<8x256xf32>, vector<8x256xf32>, vector<8x256xf32>, vector<8x256xf32> -> vector<40x256xf32>
      %792 = arith.truncf %791 : vector<40x256xf32> to vector<40x256xbf16>
      %793 = arith.index_cast %636 : i32 to index
      %c3_507 = arith.constant 3 : index
      %c0_508 = arith.constant 0 : index
      %c0_509 = arith.constant 0 : index
      %794 = vector.load %arg2[%793, %c3_507, %c0_508, %c0_509] : memref<7x5x8x40xbf16, #tpu.memory_space<vmem>>, vector<1x1x8x40xbf16>
      %795 = vector.shape_cast %794 : vector<1x1x8x40xbf16> to vector<8x40xbf16>
      %cst_510 = arith.constant dense<0.000000e+00> : vector<8x256xf32>
      %796 = tpu.matmul %795, %792, %cst_510 {dimension_numbers = #tpu.dot_dimension_numbers<[1], [0], [0], [1], [0, 0, 1, 1], [], []>} : vector<8x40xbf16>, vector<40x256xbf16>, vector<8x256xf32> -> vector<8x256xf32>
      %797 = arith.addf %757, %796 : vector<8x256xf32>
      %c0_511 = arith.constant 0 : index
      %c158_512 = arith.constant 158 : index
      %798 = vector.load %arg5[%c0_511, %c158_512] : memref<8x512xf32, #tpu.memory_space<vmem>>, vector<8x256xf32>
      %c2_i32_513 = arith.constant 2 : i32
      %799 = vector.broadcast %c2_i32_513 : i32 to vector<8x256xi32>
      %800 = arith.cmpi sge, %20, %799 : vector<8x256xi32>
      %c18_i32_514 = arith.constant 18 : i32
      %801 = vector.broadcast %c18_i32_514 : i32 to vector<8x256xi32>
      %802 = arith.cmpi slt, %20, %801 : vector<8x256xi32>
      %803 = arith.andi %800, %802 : vector<8x256xi1>
      %cst_515 = arith.constant 0.000000e+00 : f32
      %804 = vector.broadcast %cst_515 : f32 to vector<8x256xf32>
      %805 = arith.select %803, %798, %804 : vector<8x256xi1>, vector<8x256xf32>
      %c0_516 = arith.constant 0 : index
      %c159_517 = arith.constant 159 : index
      %806 = vector.load %arg5[%c0_516, %c159_517] : memref<8x512xf32, #tpu.memory_space<vmem>>, vector<8x256xf32>
      %c1_i32_518 = arith.constant 1 : i32
      %807 = vector.broadcast %c1_i32_518 : i32 to vector<8x256xi32>
      %808 = arith.cmpi sge, %20, %807 : vector<8x256xi32>
      %c17_i32_519 = arith.constant 17 : i32
      %809 = vector.broadcast %c17_i32_519 : i32 to vector<8x256xi32>
      %810 = arith.cmpi slt, %20, %809 : vector<8x256xi32>
      %811 = arith.andi %808, %810 : vector<8x256xi1>
      %cst_520 = arith.constant 0.000000e+00 : f32
      %812 = vector.broadcast %cst_520 : f32 to vector<8x256xf32>
      %813 = arith.select %811, %806, %812 : vector<8x256xi1>, vector<8x256xf32>
      %c0_521 = arith.constant 0 : index
      %c160_522 = arith.constant 160 : index
      %814 = vector.load %arg5[%c0_521, %c160_522] : memref<8x512xf32, #tpu.memory_space<vmem>>, vector<8x256xf32>
      %c0_523 = arith.constant 0 : index
      %c161_524 = arith.constant 161 : index
      %815 = vector.load %arg5[%c0_523, %c161_524] : memref<8x512xf32, #tpu.memory_space<vmem>>, vector<8x256xf32>
      %c-1_i32_525 = arith.constant -1 : i32
      %816 = vector.broadcast %c-1_i32_525 : i32 to vector<8x256xi32>
      %817 = arith.cmpi sge, %20, %816 : vector<8x256xi32>
      %c15_i32_526 = arith.constant 15 : i32
      %818 = vector.broadcast %c15_i32_526 : i32 to vector<8x256xi32>
      %819 = arith.cmpi slt, %20, %818 : vector<8x256xi32>
      %820 = arith.andi %817, %819 : vector<8x256xi1>
      %cst_527 = arith.constant 0.000000e+00 : f32
      %821 = vector.broadcast %cst_527 : f32 to vector<8x256xf32>
      %822 = arith.select %820, %815, %821 : vector<8x256xi1>, vector<8x256xf32>
      %c0_528 = arith.constant 0 : index
      %c162_529 = arith.constant 162 : index
      %823 = vector.load %arg5[%c0_528, %c162_529] : memref<8x512xf32, #tpu.memory_space<vmem>>, vector<8x256xf32>
      %c-2_i32_530 = arith.constant -2 : i32
      %824 = vector.broadcast %c-2_i32_530 : i32 to vector<8x256xi32>
      %825 = arith.cmpi sge, %20, %824 : vector<8x256xi32>
      %c14_i32_531 = arith.constant 14 : i32
      %826 = vector.broadcast %c14_i32_531 : i32 to vector<8x256xi32>
      %827 = arith.cmpi slt, %20, %826 : vector<8x256xi32>
      %828 = arith.andi %825, %827 : vector<8x256xi1>
      %cst_532 = arith.constant 0.000000e+00 : f32
      %829 = vector.broadcast %cst_532 : f32 to vector<8x256xf32>
      %830 = arith.select %828, %823, %829 : vector<8x256xi1>, vector<8x256xf32>
      %831 = tpu.concatenate %805, %813, %814, %822, %830 in 0 : vector<8x256xf32>, vector<8x256xf32>, vector<8x256xf32>, vector<8x256xf32>, vector<8x256xf32> -> vector<40x256xf32>
      %832 = arith.truncf %831 : vector<40x256xf32> to vector<40x256xbf16>
      %833 = arith.index_cast %636 : i32 to index
      %c4_533 = arith.constant 4 : index
      %c0_534 = arith.constant 0 : index
      %c0_535 = arith.constant 0 : index
      %834 = vector.load %arg2[%833, %c4_533, %c0_534, %c0_535] : memref<7x5x8x40xbf16, #tpu.memory_space<vmem>>, vector<1x1x8x40xbf16>
      %835 = vector.shape_cast %834 : vector<1x1x8x40xbf16> to vector<8x40xbf16>
      %cst_536 = arith.constant dense<0.000000e+00> : vector<8x256xf32>
      %836 = tpu.matmul %835, %832, %cst_536 {dimension_numbers = #tpu.dot_dimension_numbers<[1], [0], [0], [1], [0, 0, 1, 1], [], []>} : vector<8x40xbf16>, vector<40x256xbf16>, vector<8x256xf32> -> vector<8x256xf32>
      %837 = arith.addf %797, %836 : vector<8x256xf32>
      %838 = arith.index_cast %636 : i32 to index
      %c0_537 = arith.constant 0 : index
      %c0_538 = arith.constant 0 : index
      %839 = vector.load %arg3[%838, %c0_537, %c0_538] : memref<7x8x1xf32, #tpu.memory_space<vmem>>, vector<1x8x1xf32>
      %840 = vector.shape_cast %839 : vector<1x8x1xf32> to vector<8x1xf32>
      %841 = vector.broadcast %840 : vector<8x1xf32> to vector<8x256xf32>
      %842 = arith.addf %837, %841 : vector<8x256xf32>
      %cst_539 = arith.constant 0.000000e+00 : f32
      %843 = vector.broadcast %cst_539 : f32 to vector<8x256xf32>
      %844 = arith.maximumf %842, %843 : vector<8x256xf32>
      %c0_540 = arith.constant 0 : index
      %c128_541 = arith.constant 128 : index
      %845 = vector.load %arg5[%c0_540, %c128_541] : memref<8x512xf32, #tpu.memory_space<vmem>>, vector<8x256xf32>
      tpu.vector_store %arg5[%c0_540, %c128_541], %844 {strides = array<i32>} : memref<8x512xf32, #tpu.memory_space<vmem>>, vector<8x256xf32>,
      %c2_i32_542 = arith.constant 2 : i32
      %846 = arith.muli %c2_i32_542, %arg6 : i32
      %c2_i32_543 = arith.constant 2 : i32
      %847 = arith.addi %c2_i32_543, %846 : i32
      %cst_544 = arith.constant 0.000000e+00 : f32
      %848 = vector.broadcast %cst_544 : f32 to vector<8x256xf32>
      %c0_545 = arith.constant 0 : index
      %c94_546 = arith.constant 94 : index
      %849 = vector.load %arg5[%c0_545, %c94_546] : memref<8x512xf32, #tpu.memory_space<vmem>>, vector<8x256xf32>
      %c2_i32_547 = arith.constant 2 : i32
      %850 = vector.broadcast %c2_i32_547 : i32 to vector<8x256xi32>
      %851 = arith.cmpi sge, %20, %850 : vector<8x256xi32>
      %c18_i32_548 = arith.constant 18 : i32
      %852 = vector.broadcast %c18_i32_548 : i32 to vector<8x256xi32>
      %853 = arith.cmpi slt, %20, %852 : vector<8x256xi32>
      %854 = arith.andi %851, %853 : vector<8x256xi1>
      %cst_549 = arith.constant 0.000000e+00 : f32
      %855 = vector.broadcast %cst_549 : f32 to vector<8x256xf32>
      %856 = arith.select %854, %849, %855 : vector<8x256xi1>, vector<8x256xf32>
      %c0_550 = arith.constant 0 : index
      %c95_551 = arith.constant 95 : index
      %857 = vector.load %arg5[%c0_550, %c95_551] : memref<8x512xf32, #tpu.memory_space<vmem>>, vector<8x256xf32>
      %c1_i32_552 = arith.constant 1 : i32
      %858 = vector.broadcast %c1_i32_552 : i32 to vector<8x256xi32>
      %859 = arith.cmpi sge, %20, %858 : vector<8x256xi32>
      %c17_i32_553 = arith.constant 17 : i32
      %860 = vector.broadcast %c17_i32_553 : i32 to vector<8x256xi32>
      %861 = arith.cmpi slt, %20, %860 : vector<8x256xi32>
      %862 = arith.andi %859, %861 : vector<8x256xi1>
      %cst_554 = arith.constant 0.000000e+00 : f32
      %863 = vector.broadcast %cst_554 : f32 to vector<8x256xf32>
      %864 = arith.select %862, %857, %863 : vector<8x256xi1>, vector<8x256xf32>
      %c0_555 = arith.constant 0 : index
      %c96_556 = arith.constant 96 : index
      %865 = vector.load %arg5[%c0_555, %c96_556] : memref<8x512xf32, #tpu.memory_space<vmem>>, vector<8x256xf32>
      %c0_557 = arith.constant 0 : index
      %c97_558 = arith.constant 97 : index
      %866 = vector.load %arg5[%c0_557, %c97_558] : memref<8x512xf32, #tpu.memory_space<vmem>>, vector<8x256xf32>
      %c-1_i32_559 = arith.constant -1 : i32
      %867 = vector.broadcast %c-1_i32_559 : i32 to vector<8x256xi32>
      %868 = arith.cmpi sge, %20, %867 : vector<8x256xi32>
      %c15_i32_560 = arith.constant 15 : i32
      %869 = vector.broadcast %c15_i32_560 : i32 to vector<8x256xi32>
      %870 = arith.cmpi slt, %20, %869 : vector<8x256xi32>
      %871 = arith.andi %868, %870 : vector<8x256xi1>
      %cst_561 = arith.constant 0.000000e+00 : f32
      %872 = vector.broadcast %cst_561 : f32 to vector<8x256xf32>
      %873 = arith.select %871, %866, %872 : vector<8x256xi1>, vector<8x256xf32>
      %c0_562 = arith.constant 0 : index
      %c98_563 = arith.constant 98 : index
      %874 = vector.load %arg5[%c0_562, %c98_563] : memref<8x512xf32, #tpu.memory_space<vmem>>, vector<8x256xf32>
      %c-2_i32_564 = arith.constant -2 : i32
      %875 = vector.broadcast %c-2_i32_564 : i32 to vector<8x256xi32>
      %876 = arith.cmpi sge, %20, %875 : vector<8x256xi32>
      %c14_i32_565 = arith.constant 14 : i32
      %877 = vector.broadcast %c14_i32_565 : i32 to vector<8x256xi32>
      %878 = arith.cmpi slt, %20, %877 : vector<8x256xi32>
      %879 = arith.andi %876, %878 : vector<8x256xi1>
      %cst_566 = arith.constant 0.000000e+00 : f32
      %880 = vector.broadcast %cst_566 : f32 to vector<8x256xf32>
      %881 = arith.select %879, %874, %880 : vector<8x256xi1>, vector<8x256xf32>
      %882 = tpu.concatenate %856, %864, %865, %873, %881 in 0 : vector<8x256xf32>, vector<8x256xf32>, vector<8x256xf32>, vector<8x256xf32>, vector<8x256xf32> -> vector<40x256xf32>
      %883 = arith.truncf %882 : vector<40x256xf32> to vector<40x256xbf16>
      %884 = arith.index_cast %847 : i32 to index
      %c0_567 = arith.constant 0 : index
      %c0_568 = arith.constant 0 : index
      %c0_569 = arith.constant 0 : index
      %885 = vector.load %arg2[%884, %c0_567, %c0_568, %c0_569] : memref<7x5x8x40xbf16, #tpu.memory_space<vmem>>, vector<1x1x8x40xbf16>
      %886 = vector.shape_cast %885 : vector<1x1x8x40xbf16> to vector<8x40xbf16>
      %cst_570 = arith.constant dense<0.000000e+00> : vector<8x256xf32>
      %887 = tpu.matmul %886, %883, %cst_570 {dimension_numbers = #tpu.dot_dimension_numbers<[1], [0], [0], [1], [0, 0, 1, 1], [], []>} : vector<8x40xbf16>, vector<40x256xbf16>, vector<8x256xf32> -> vector<8x256xf32>
      %888 = arith.addf %848, %887 : vector<8x256xf32>
      %c0_571 = arith.constant 0 : index
      %c110_572 = arith.constant 110 : index
      %889 = vector.load %arg5[%c0_571, %c110_572] : memref<8x512xf32, #tpu.memory_space<vmem>>, vector<8x256xf32>
      %c2_i32_573 = arith.constant 2 : i32
      %890 = vector.broadcast %c2_i32_573 : i32 to vector<8x256xi32>
      %891 = arith.cmpi sge, %20, %890 : vector<8x256xi32>
      %c18_i32_574 = arith.constant 18 : i32
      %892 = vector.broadcast %c18_i32_574 : i32 to vector<8x256xi32>
      %893 = arith.cmpi slt, %20, %892 : vector<8x256xi32>
      %894 = arith.andi %891, %893 : vector<8x256xi1>
      %cst_575 = arith.constant 0.000000e+00 : f32
      %895 = vector.broadcast %cst_575 : f32 to vector<8x256xf32>
      %896 = arith.select %894, %889, %895 : vector<8x256xi1>, vector<8x256xf32>
      %c0_576 = arith.constant 0 : index
      %c111_577 = arith.constant 111 : index
      %897 = vector.load %arg5[%c0_576, %c111_577] : memref<8x512xf32, #tpu.memory_space<vmem>>, vector<8x256xf32>
      %c1_i32_578 = arith.constant 1 : i32
      %898 = vector.broadcast %c1_i32_578 : i32 to vector<8x256xi32>
      %899 = arith.cmpi sge, %20, %898 : vector<8x256xi32>
      %c17_i32_579 = arith.constant 17 : i32
      %900 = vector.broadcast %c17_i32_579 : i32 to vector<8x256xi32>
      %901 = arith.cmpi slt, %20, %900 : vector<8x256xi32>
      %902 = arith.andi %899, %901 : vector<8x256xi1>
      %cst_580 = arith.constant 0.000000e+00 : f32
      %903 = vector.broadcast %cst_580 : f32 to vector<8x256xf32>
      %904 = arith.select %902, %897, %903 : vector<8x256xi1>, vector<8x256xf32>
      %c0_581 = arith.constant 0 : index
      %c112_582 = arith.constant 112 : index
      %905 = vector.load %arg5[%c0_581, %c112_582] : memref<8x512xf32, #tpu.memory_space<vmem>>, vector<8x256xf32>
      %c0_583 = arith.constant 0 : index
      %c113_584 = arith.constant 113 : index
      %906 = vector.load %arg5[%c0_583, %c113_584] : memref<8x512xf32, #tpu.memory_space<vmem>>, vector<8x256xf32>
      %c-1_i32_585 = arith.constant -1 : i32
      %907 = vector.broadcast %c-1_i32_585 : i32 to vector<8x256xi32>
      %908 = arith.cmpi sge, %20, %907 : vector<8x256xi32>
      %c15_i32_586 = arith.constant 15 : i32
      %909 = vector.broadcast %c15_i32_586 : i32 to vector<8x256xi32>
      %910 = arith.cmpi slt, %20, %909 : vector<8x256xi32>
      %911 = arith.andi %908, %910 : vector<8x256xi1>
      %cst_587 = arith.constant 0.000000e+00 : f32
      %912 = vector.broadcast %cst_587 : f32 to vector<8x256xf32>
      %913 = arith.select %911, %906, %912 : vector<8x256xi1>, vector<8x256xf32>
      %c0_588 = arith.constant 0 : index
      %c114_589 = arith.constant 114 : index
      %914 = vector.load %arg5[%c0_588, %c114_589] : memref<8x512xf32, #tpu.memory_space<vmem>>, vector<8x256xf32>
      %c-2_i32_590 = arith.constant -2 : i32
      %915 = vector.broadcast %c-2_i32_590 : i32 to vector<8x256xi32>
      %916 = arith.cmpi sge, %20, %915 : vector<8x256xi32>
      %c14_i32_591 = arith.constant 14 : i32
      %917 = vector.broadcast %c14_i32_591 : i32 to vector<8x256xi32>
      %918 = arith.cmpi slt, %20, %917 : vector<8x256xi32>
      %919 = arith.andi %916, %918 : vector<8x256xi1>
      %cst_592 = arith.constant 0.000000e+00 : f32
      %920 = vector.broadcast %cst_592 : f32 to vector<8x256xf32>
      %921 = arith.select %919, %914, %920 : vector<8x256xi1>, vector<8x256xf32>
      %922 = tpu.concatenate %896, %904, %905, %913, %921 in 0 : vector<8x256xf32>, vector<8x256xf32>, vector<8x256xf32>, vector<8x256xf32>, vector<8x256xf32> -> vector<40x256xf32>
      %923 = arith.truncf %922 : vector<40x256xf32> to vector<40x256xbf16>
      %924 = arith.index_cast %847 : i32 to index
      %c1_593 = arith.constant 1 : index
      %c0_594 = arith.constant 0 : index
      %c0_595 = arith.constant 0 : index
      %925 = vector.load %arg2[%924, %c1_593, %c0_594, %c0_595] : memref<7x5x8x40xbf16, #tpu.memory_space<vmem>>, vector<1x1x8x40xbf16>
      %926 = vector.shape_cast %925 : vector<1x1x8x40xbf16> to vector<8x40xbf16>
      %cst_596 = arith.constant dense<0.000000e+00> : vector<8x256xf32>
      %927 = tpu.matmul %926, %923, %cst_596 {dimension_numbers = #tpu.dot_dimension_numbers<[1], [0], [0], [1], [0, 0, 1, 1], [], []>} : vector<8x40xbf16>, vector<40x256xbf16>, vector<8x256xf32> -> vector<8x256xf32>
      %928 = arith.addf %888, %927 : vector<8x256xf32>
      %c0_597 = arith.constant 0 : index
      %c126_598 = arith.constant 126 : index
      %929 = vector.load %arg5[%c0_597, %c126_598] : memref<8x512xf32, #tpu.memory_space<vmem>>, vector<8x256xf32>
      %c2_i32_599 = arith.constant 2 : i32
      %930 = vector.broadcast %c2_i32_599 : i32 to vector<8x256xi32>
      %931 = arith.cmpi sge, %20, %930 : vector<8x256xi32>
      %c18_i32_600 = arith.constant 18 : i32
      %932 = vector.broadcast %c18_i32_600 : i32 to vector<8x256xi32>
      %933 = arith.cmpi slt, %20, %932 : vector<8x256xi32>
      %934 = arith.andi %931, %933 : vector<8x256xi1>
      %cst_601 = arith.constant 0.000000e+00 : f32
      %935 = vector.broadcast %cst_601 : f32 to vector<8x256xf32>
      %936 = arith.select %934, %929, %935 : vector<8x256xi1>, vector<8x256xf32>
      %c0_602 = arith.constant 0 : index
      %c127_603 = arith.constant 127 : index
      %937 = vector.load %arg5[%c0_602, %c127_603] : memref<8x512xf32, #tpu.memory_space<vmem>>, vector<8x256xf32>
      %c1_i32_604 = arith.constant 1 : i32
      %938 = vector.broadcast %c1_i32_604 : i32 to vector<8x256xi32>
      %939 = arith.cmpi sge, %20, %938 : vector<8x256xi32>
      %c17_i32_605 = arith.constant 17 : i32
      %940 = vector.broadcast %c17_i32_605 : i32 to vector<8x256xi32>
      %941 = arith.cmpi slt, %20, %940 : vector<8x256xi32>
      %942 = arith.andi %939, %941 : vector<8x256xi1>
      %cst_606 = arith.constant 0.000000e+00 : f32
      %943 = vector.broadcast %cst_606 : f32 to vector<8x256xf32>
      %944 = arith.select %942, %937, %943 : vector<8x256xi1>, vector<8x256xf32>
      %c0_607 = arith.constant 0 : index
      %c128_608 = arith.constant 128 : index
      %945 = vector.load %arg5[%c0_607, %c128_608] : memref<8x512xf32, #tpu.memory_space<vmem>>, vector<8x256xf32>
      %c0_609 = arith.constant 0 : index
      %c129_610 = arith.constant 129 : index
      %946 = vector.load %arg5[%c0_609, %c129_610] : memref<8x512xf32, #tpu.memory_space<vmem>>, vector<8x256xf32>
      %c-1_i32_611 = arith.constant -1 : i32
      %947 = vector.broadcast %c-1_i32_611 : i32 to vector<8x256xi32>
      %948 = arith.cmpi sge, %20, %947 : vector<8x256xi32>
      %c15_i32_612 = arith.constant 15 : i32
      %949 = vector.broadcast %c15_i32_612 : i32 to vector<8x256xi32>
      %950 = arith.cmpi slt, %20, %949 : vector<8x256xi32>
      %951 = arith.andi %948, %950 : vector<8x256xi1>
      %cst_613 = arith.constant 0.000000e+00 : f32
      %952 = vector.broadcast %cst_613 : f32 to vector<8x256xf32>
      %953 = arith.select %951, %946, %952 : vector<8x256xi1>, vector<8x256xf32>
      %c0_614 = arith.constant 0 : index
      %c130_615 = arith.constant 130 : index
      %954 = vector.load %arg5[%c0_614, %c130_615] : memref<8x512xf32, #tpu.memory_space<vmem>>, vector<8x256xf32>
      %c-2_i32_616 = arith.constant -2 : i32
      %955 = vector.broadcast %c-2_i32_616 : i32 to vector<8x256xi32>
      %956 = arith.cmpi sge, %20, %955 : vector<8x256xi32>
      %c14_i32_617 = arith.constant 14 : i32
      %957 = vector.broadcast %c14_i32_617 : i32 to vector<8x256xi32>
      %958 = arith.cmpi slt, %20, %957 : vector<8x256xi32>
      %959 = arith.andi %956, %958 : vector<8x256xi1>
      %cst_618 = arith.constant 0.000000e+00 : f32
      %960 = vector.broadcast %cst_618 : f32 to vector<8x256xf32>
      %961 = arith.select %959, %954, %960 : vector<8x256xi1>, vector<8x256xf32>
      %962 = tpu.concatenate %936, %944, %945, %953, %961 in 0 : vector<8x256xf32>, vector<8x256xf32>, vector<8x256xf32>, vector<8x256xf32>, vector<8x256xf32> -> vector<40x256xf32>
      %963 = arith.truncf %962 : vector<40x256xf32> to vector<40x256xbf16>
      %964 = arith.index_cast %847 : i32 to index
      %c2_619 = arith.constant 2 : index
      %c0_620 = arith.constant 0 : index
      %c0_621 = arith.constant 0 : index
      %965 = vector.load %arg2[%964, %c2_619, %c0_620, %c0_621] : memref<7x5x8x40xbf16, #tpu.memory_space<vmem>>, vector<1x1x8x40xbf16>
      %966 = vector.shape_cast %965 : vector<1x1x8x40xbf16> to vector<8x40xbf16>
      %cst_622 = arith.constant dense<0.000000e+00> : vector<8x256xf32>
      %967 = tpu.matmul %966, %963, %cst_622 {dimension_numbers = #tpu.dot_dimension_numbers<[1], [0], [0], [1], [0, 0, 1, 1], [], []>} : vector<8x40xbf16>, vector<40x256xbf16>, vector<8x256xf32> -> vector<8x256xf32>
      %968 = arith.addf %928, %967 : vector<8x256xf32>
      %c0_623 = arith.constant 0 : index
      %c142_624 = arith.constant 142 : index
      %969 = vector.load %arg5[%c0_623, %c142_624] : memref<8x512xf32, #tpu.memory_space<vmem>>, vector<8x256xf32>
      %c2_i32_625 = arith.constant 2 : i32
      %970 = vector.broadcast %c2_i32_625 : i32 to vector<8x256xi32>
      %971 = arith.cmpi sge, %20, %970 : vector<8x256xi32>
      %c18_i32_626 = arith.constant 18 : i32
      %972 = vector.broadcast %c18_i32_626 : i32 to vector<8x256xi32>
      %973 = arith.cmpi slt, %20, %972 : vector<8x256xi32>
      %974 = arith.andi %971, %973 : vector<8x256xi1>
      %cst_627 = arith.constant 0.000000e+00 : f32
      %975 = vector.broadcast %cst_627 : f32 to vector<8x256xf32>
      %976 = arith.select %974, %969, %975 : vector<8x256xi1>, vector<8x256xf32>
      %c0_628 = arith.constant 0 : index
      %c143_629 = arith.constant 143 : index
      %977 = vector.load %arg5[%c0_628, %c143_629] : memref<8x512xf32, #tpu.memory_space<vmem>>, vector<8x256xf32>
      %c1_i32_630 = arith.constant 1 : i32
      %978 = vector.broadcast %c1_i32_630 : i32 to vector<8x256xi32>
      %979 = arith.cmpi sge, %20, %978 : vector<8x256xi32>
      %c17_i32_631 = arith.constant 17 : i32
      %980 = vector.broadcast %c17_i32_631 : i32 to vector<8x256xi32>
      %981 = arith.cmpi slt, %20, %980 : vector<8x256xi32>
      %982 = arith.andi %979, %981 : vector<8x256xi1>
      %cst_632 = arith.constant 0.000000e+00 : f32
      %983 = vector.broadcast %cst_632 : f32 to vector<8x256xf32>
      %984 = arith.select %982, %977, %983 : vector<8x256xi1>, vector<8x256xf32>
      %c0_633 = arith.constant 0 : index
      %c144_634 = arith.constant 144 : index
      %985 = vector.load %arg5[%c0_633, %c144_634] : memref<8x512xf32, #tpu.memory_space<vmem>>, vector<8x256xf32>
      %c0_635 = arith.constant 0 : index
      %c145_636 = arith.constant 145 : index
      %986 = vector.load %arg5[%c0_635, %c145_636] : memref<8x512xf32, #tpu.memory_space<vmem>>, vector<8x256xf32>
      %c-1_i32_637 = arith.constant -1 : i32
      %987 = vector.broadcast %c-1_i32_637 : i32 to vector<8x256xi32>
      %988 = arith.cmpi sge, %20, %987 : vector<8x256xi32>
      %c15_i32_638 = arith.constant 15 : i32
      %989 = vector.broadcast %c15_i32_638 : i32 to vector<8x256xi32>
      %990 = arith.cmpi slt, %20, %989 : vector<8x256xi32>
      %991 = arith.andi %988, %990 : vector<8x256xi1>
      %cst_639 = arith.constant 0.000000e+00 : f32
      %992 = vector.broadcast %cst_639 : f32 to vector<8x256xf32>
      %993 = arith.select %991, %986, %992 : vector<8x256xi1>, vector<8x256xf32>
      %c0_640 = arith.constant 0 : index
      %c146_641 = arith.constant 146 : index
      %994 = vector.load %arg5[%c0_640, %c146_641] : memref<8x512xf32, #tpu.memory_space<vmem>>, vector<8x256xf32>
      %c-2_i32_642 = arith.constant -2 : i32
      %995 = vector.broadcast %c-2_i32_642 : i32 to vector<8x256xi32>
      %996 = arith.cmpi sge, %20, %995 : vector<8x256xi32>
      %c14_i32_643 = arith.constant 14 : i32
      %997 = vector.broadcast %c14_i32_643 : i32 to vector<8x256xi32>
      %998 = arith.cmpi slt, %20, %997 : vector<8x256xi32>
      %999 = arith.andi %996, %998 : vector<8x256xi1>
      %cst_644 = arith.constant 0.000000e+00 : f32
      %1000 = vector.broadcast %cst_644 : f32 to vector<8x256xf32>
      %1001 = arith.select %999, %994, %1000 : vector<8x256xi1>, vector<8x256xf32>
      %1002 = tpu.concatenate %976, %984, %985, %993, %1001 in 0 : vector<8x256xf32>, vector<8x256xf32>, vector<8x256xf32>, vector<8x256xf32>, vector<8x256xf32> -> vector<40x256xf32>
      %1003 = arith.truncf %1002 : vector<40x256xf32> to vector<40x256xbf16>
      %1004 = arith.index_cast %847 : i32 to index
      %c3_645 = arith.constant 3 : index
      %c0_646 = arith.constant 0 : index
      %c0_647 = arith.constant 0 : index
      %1005 = vector.load %arg2[%1004, %c3_645, %c0_646, %c0_647] : memref<7x5x8x40xbf16, #tpu.memory_space<vmem>>, vector<1x1x8x40xbf16>
      %1006 = vector.shape_cast %1005 : vector<1x1x8x40xbf16> to vector<8x40xbf16>
      %cst_648 = arith.constant dense<0.000000e+00> : vector<8x256xf32>
      %1007 = tpu.matmul %1006, %1003, %cst_648 {dimension_numbers = #tpu.dot_dimension_numbers<[1], [0], [0], [1], [0, 0, 1, 1], [], []>} : vector<8x40xbf16>, vector<40x256xbf16>, vector<8x256xf32> -> vector<8x256xf32>
      %1008 = arith.addf %968, %1007 : vector<8x256xf32>
      %c0_649 = arith.constant 0 : index
      %c158_650 = arith.constant 158 : index
      %1009 = vector.load %arg5[%c0_649, %c158_650] : memref<8x512xf32, #tpu.memory_space<vmem>>, vector<8x256xf32>
      %c2_i32_651 = arith.constant 2 : i32
      %1010 = vector.broadcast %c2_i32_651 : i32 to vector<8x256xi32>
      %1011 = arith.cmpi sge, %20, %1010 : vector<8x256xi32>
      %c18_i32_652 = arith.constant 18 : i32
      %1012 = vector.broadcast %c18_i32_652 : i32 to vector<8x256xi32>
      %1013 = arith.cmpi slt, %20, %1012 : vector<8x256xi32>
      %1014 = arith.andi %1011, %1013 : vector<8x256xi1>
      %cst_653 = arith.constant 0.000000e+00 : f32
      %1015 = vector.broadcast %cst_653 : f32 to vector<8x256xf32>
      %1016 = arith.select %1014, %1009, %1015 : vector<8x256xi1>, vector<8x256xf32>
      %c0_654 = arith.constant 0 : index
      %c159_655 = arith.constant 159 : index
      %1017 = vector.load %arg5[%c0_654, %c159_655] : memref<8x512xf32, #tpu.memory_space<vmem>>, vector<8x256xf32>
      %c1_i32_656 = arith.constant 1 : i32
      %1018 = vector.broadcast %c1_i32_656 : i32 to vector<8x256xi32>
      %1019 = arith.cmpi sge, %20, %1018 : vector<8x256xi32>
      %c17_i32_657 = arith.constant 17 : i32
      %1020 = vector.broadcast %c17_i32_657 : i32 to vector<8x256xi32>
      %1021 = arith.cmpi slt, %20, %1020 : vector<8x256xi32>
      %1022 = arith.andi %1019, %1021 : vector<8x256xi1>
      %cst_658 = arith.constant 0.000000e+00 : f32
      %1023 = vector.broadcast %cst_658 : f32 to vector<8x256xf32>
      %1024 = arith.select %1022, %1017, %1023 : vector<8x256xi1>, vector<8x256xf32>
      %c0_659 = arith.constant 0 : index
      %c160_660 = arith.constant 160 : index
      %1025 = vector.load %arg5[%c0_659, %c160_660] : memref<8x512xf32, #tpu.memory_space<vmem>>, vector<8x256xf32>
      %c0_661 = arith.constant 0 : index
      %c161_662 = arith.constant 161 : index
      %1026 = vector.load %arg5[%c0_661, %c161_662] : memref<8x512xf32, #tpu.memory_space<vmem>>, vector<8x256xf32>
      %c-1_i32_663 = arith.constant -1 : i32
      %1027 = vector.broadcast %c-1_i32_663 : i32 to vector<8x256xi32>
      %1028 = arith.cmpi sge, %20, %1027 : vector<8x256xi32>
      %c15_i32_664 = arith.constant 15 : i32
      %1029 = vector.broadcast %c15_i32_664 : i32 to vector<8x256xi32>
      %1030 = arith.cmpi slt, %20, %1029 : vector<8x256xi32>
      %1031 = arith.andi %1028, %1030 : vector<8x256xi1>
      %cst_665 = arith.constant 0.000000e+00 : f32
      %1032 = vector.broadcast %cst_665 : f32 to vector<8x256xf32>
      %1033 = arith.select %1031, %1026, %1032 : vector<8x256xi1>, vector<8x256xf32>
      %c0_666 = arith.constant 0 : index
      %c162_667 = arith.constant 162 : index
      %1034 = vector.load %arg5[%c0_666, %c162_667] : memref<8x512xf32, #tpu.memory_space<vmem>>, vector<8x256xf32>
      %c-2_i32_668 = arith.constant -2 : i32
      %1035 = vector.broadcast %c-2_i32_668 : i32 to vector<8x256xi32>
      %1036 = arith.cmpi sge, %20, %1035 : vector<8x256xi32>
      %c14_i32_669 = arith.constant 14 : i32
      %1037 = vector.broadcast %c14_i32_669 : i32 to vector<8x256xi32>
      %1038 = arith.cmpi slt, %20, %1037 : vector<8x256xi32>
      %1039 = arith.andi %1036, %1038 : vector<8x256xi1>
      %cst_670 = arith.constant 0.000000e+00 : f32
      %1040 = vector.broadcast %cst_670 : f32 to vector<8x256xf32>
      %1041 = arith.select %1039, %1034, %1040 : vector<8x256xi1>, vector<8x256xf32>
      %1042 = tpu.concatenate %1016, %1024, %1025, %1033, %1041 in 0 : vector<8x256xf32>, vector<8x256xf32>, vector<8x256xf32>, vector<8x256xf32>, vector<8x256xf32> -> vector<40x256xf32>
      %1043 = arith.truncf %1042 : vector<40x256xf32> to vector<40x256xbf16>
      %1044 = arith.index_cast %847 : i32 to index
      %c4_671 = arith.constant 4 : index
      %c0_672 = arith.constant 0 : index
      %c0_673 = arith.constant 0 : index
      %1045 = vector.load %arg2[%1044, %c4_671, %c0_672, %c0_673] : memref<7x5x8x40xbf16, #tpu.memory_space<vmem>>, vector<1x1x8x40xbf16>
      %1046 = vector.shape_cast %1045 : vector<1x1x8x40xbf16> to vector<8x40xbf16>
      %cst_674 = arith.constant dense<0.000000e+00> : vector<8x256xf32>
      %1047 = tpu.matmul %1046, %1043, %cst_674 {dimension_numbers = #tpu.dot_dimension_numbers<[1], [0], [0], [1], [0, 0, 1, 1], [], []>} : vector<8x40xbf16>, vector<40x256xbf16>, vector<8x256xf32> -> vector<8x256xf32>
      %1048 = arith.addf %1008, %1047 : vector<8x256xf32>
      %1049 = arith.index_cast %847 : i32 to index
      %c0_675 = arith.constant 0 : index
      %c0_676 = arith.constant 0 : index
      %1050 = vector.load %arg3[%1049, %c0_675, %c0_676] : memref<7x8x1xf32, #tpu.memory_space<vmem>>, vector<1x8x1xf32>
      %1051 = vector.shape_cast %1050 : vector<1x8x1xf32> to vector<8x1xf32>
      %1052 = vector.broadcast %1051 : vector<8x1xf32> to vector<8x256xf32>
      %1053 = arith.addf %1048, %1052 : vector<8x256xf32>
      %cst_677 = arith.constant 5.000000e-01 : f32
      %1054 = vector.broadcast %cst_677 : f32 to vector<8x256xf32>
      %1055 = arith.mulf %1053, %1054 : vector<8x256xf32>
      %1056 = arith.addf %1055, %arg7 : vector<8x256xf32>
      scf.yield %1056 : vector<8x256xf32>
    }
    %c2_i32_118 = arith.constant 2 : i32
    %c0_119 = arith.constant 0 : index
    %c128_120 = arith.constant 128 : index
    %228 = vector.load %arg5[%c0_119, %c128_120] : memref<8x512xf32, #tpu.memory_space<vmem>>, vector<8x256xf32>
    tpu.vector_store %arg5[%c0_119, %c128_120], %227 {strides = array<i32>} : memref<8x512xf32, #tpu.memory_space<vmem>>, vector<8x256xf32>,
    %cst_121 = arith.constant 0.000000e+00 : f32
    %229 = vector.broadcast %cst_121 : f32 to vector<8x256xf32>
    %c0_122 = arith.constant 0 : index
    %c94_123 = arith.constant 94 : index
    %230 = vector.load %arg5[%c0_122, %c94_123] : memref<8x512xf32, #tpu.memory_space<vmem>>, vector<8x256xf32>
    %c2_i32_124 = arith.constant 2 : i32
    %231 = vector.broadcast %c2_i32_124 : i32 to vector<8x256xi32>
    %232 = arith.cmpi sge, %20, %231 : vector<8x256xi32>
    %c18_i32_125 = arith.constant 18 : i32
    %233 = vector.broadcast %c18_i32_125 : i32 to vector<8x256xi32>
    %234 = arith.cmpi slt, %20, %233 : vector<8x256xi32>
    %235 = arith.andi %232, %234 : vector<8x256xi1>
    %cst_126 = arith.constant 0.000000e+00 : f32
    %236 = vector.broadcast %cst_126 : f32 to vector<8x256xf32>
    %237 = arith.select %235, %230, %236 : vector<8x256xi1>, vector<8x256xf32>
    %c0_127 = arith.constant 0 : index
    %c95_128 = arith.constant 95 : index
    %238 = vector.load %arg5[%c0_127, %c95_128] : memref<8x512xf32, #tpu.memory_space<vmem>>, vector<8x256xf32>
    %c1_i32_129 = arith.constant 1 : i32
    %239 = vector.broadcast %c1_i32_129 : i32 to vector<8x256xi32>
    %240 = arith.cmpi sge, %20, %239 : vector<8x256xi32>
    %c17_i32_130 = arith.constant 17 : i32
    %241 = vector.broadcast %c17_i32_130 : i32 to vector<8x256xi32>
    %242 = arith.cmpi slt, %20, %241 : vector<8x256xi32>
    %243 = arith.andi %240, %242 : vector<8x256xi1>
    %cst_131 = arith.constant 0.000000e+00 : f32
    %244 = vector.broadcast %cst_131 : f32 to vector<8x256xf32>
    %245 = arith.select %243, %238, %244 : vector<8x256xi1>, vector<8x256xf32>
    %c0_132 = arith.constant 0 : index
    %c96_133 = arith.constant 96 : index
    %246 = vector.load %arg5[%c0_132, %c96_133] : memref<8x512xf32, #tpu.memory_space<vmem>>, vector<8x256xf32>
    %c0_134 = arith.constant 0 : index
    %c97_135 = arith.constant 97 : index
    %247 = vector.load %arg5[%c0_134, %c97_135] : memref<8x512xf32, #tpu.memory_space<vmem>>, vector<8x256xf32>
    %c-1_i32_136 = arith.constant -1 : i32
    %248 = vector.broadcast %c-1_i32_136 : i32 to vector<8x256xi32>
    %249 = arith.cmpi sge, %20, %248 : vector<8x256xi32>
    %c15_i32_137 = arith.constant 15 : i32
    %250 = vector.broadcast %c15_i32_137 : i32 to vector<8x256xi32>
    %251 = arith.cmpi slt, %20, %250 : vector<8x256xi32>
    %252 = arith.andi %249, %251 : vector<8x256xi1>
    %cst_138 = arith.constant 0.000000e+00 : f32
    %253 = vector.broadcast %cst_138 : f32 to vector<8x256xf32>
    %254 = arith.select %252, %247, %253 : vector<8x256xi1>, vector<8x256xf32>
    %c0_139 = arith.constant 0 : index
    %c98_140 = arith.constant 98 : index
    %255 = vector.load %arg5[%c0_139, %c98_140] : memref<8x512xf32, #tpu.memory_space<vmem>>, vector<8x256xf32>
    %c-2_i32_141 = arith.constant -2 : i32
    %256 = vector.broadcast %c-2_i32_141 : i32 to vector<8x256xi32>
    %257 = arith.cmpi sge, %20, %256 : vector<8x256xi32>
    %c14_i32_142 = arith.constant 14 : i32
    %258 = vector.broadcast %c14_i32_142 : i32 to vector<8x256xi32>
    %259 = arith.cmpi slt, %20, %258 : vector<8x256xi32>
    %260 = arith.andi %257, %259 : vector<8x256xi1>
    %cst_143 = arith.constant 0.000000e+00 : f32
    %261 = vector.broadcast %cst_143 : f32 to vector<8x256xf32>
    %262 = arith.select %260, %255, %261 : vector<8x256xi1>, vector<8x256xf32>
    %263 = tpu.concatenate %237, %245, %246, %254, %262 in 0 : vector<8x256xf32>, vector<8x256xf32>, vector<8x256xf32>, vector<8x256xf32>, vector<8x256xf32> -> vector<40x256xf32>
    %264 = arith.truncf %263 : vector<40x256xf32> to vector<40x256xbf16>
    %c5 = arith.constant 5 : index
    %c0_144 = arith.constant 0 : index
    %c0_145 = arith.constant 0 : index
    %c0_146 = arith.constant 0 : index
    %265 = vector.load %arg2[%c5, %c0_144, %c0_145, %c0_146] : memref<7x5x8x40xbf16, #tpu.memory_space<vmem>>, vector<1x1x8x40xbf16>
    %266 = vector.shape_cast %265 : vector<1x1x8x40xbf16> to vector<8x40xbf16>
    %cst_147 = arith.constant dense<0.000000e+00> : vector<8x256xf32>
    %267 = tpu.matmul %266, %264, %cst_147 {dimension_numbers = #tpu.dot_dimension_numbers<[1], [0], [0], [1], [0, 0, 1, 1], [], []>} : vector<8x40xbf16>, vector<40x256xbf16>, vector<8x256xf32> -> vector<8x256xf32>
    %268 = arith.addf %229, %267 : vector<8x256xf32>
    %c0_148 = arith.constant 0 : index
    %c110_149 = arith.constant 110 : index
    %269 = vector.load %arg5[%c0_148, %c110_149] : memref<8x512xf32, #tpu.memory_space<vmem>>, vector<8x256xf32>
    %c2_i32_150 = arith.constant 2 : i32
    %270 = vector.broadcast %c2_i32_150 : i32 to vector<8x256xi32>
    %271 = arith.cmpi sge, %20, %270 : vector<8x256xi32>
    %c18_i32_151 = arith.constant 18 : i32
    %272 = vector.broadcast %c18_i32_151 : i32 to vector<8x256xi32>
    %273 = arith.cmpi slt, %20, %272 : vector<8x256xi32>
    %274 = arith.andi %271, %273 : vector<8x256xi1>
    %cst_152 = arith.constant 0.000000e+00 : f32
    %275 = vector.broadcast %cst_152 : f32 to vector<8x256xf32>
    %276 = arith.select %274, %269, %275 : vector<8x256xi1>, vector<8x256xf32>
    %c0_153 = arith.constant 0 : index
    %c111_154 = arith.constant 111 : index
    %277 = vector.load %arg5[%c0_153, %c111_154] : memref<8x512xf32, #tpu.memory_space<vmem>>, vector<8x256xf32>
    %c1_i32_155 = arith.constant 1 : i32
    %278 = vector.broadcast %c1_i32_155 : i32 to vector<8x256xi32>
    %279 = arith.cmpi sge, %20, %278 : vector<8x256xi32>
    %c17_i32_156 = arith.constant 17 : i32
    %280 = vector.broadcast %c17_i32_156 : i32 to vector<8x256xi32>
    %281 = arith.cmpi slt, %20, %280 : vector<8x256xi32>
    %282 = arith.andi %279, %281 : vector<8x256xi1>
    %cst_157 = arith.constant 0.000000e+00 : f32
    %283 = vector.broadcast %cst_157 : f32 to vector<8x256xf32>
    %284 = arith.select %282, %277, %283 : vector<8x256xi1>, vector<8x256xf32>
    %c0_158 = arith.constant 0 : index
    %c112_159 = arith.constant 112 : index
    %285 = vector.load %arg5[%c0_158, %c112_159] : memref<8x512xf32, #tpu.memory_space<vmem>>, vector<8x256xf32>
    %c0_160 = arith.constant 0 : index
    %c113_161 = arith.constant 113 : index
    %286 = vector.load %arg5[%c0_160, %c113_161] : memref<8x512xf32, #tpu.memory_space<vmem>>, vector<8x256xf32>
    %c-1_i32_162 = arith.constant -1 : i32
    %287 = vector.broadcast %c-1_i32_162 : i32 to vector<8x256xi32>
    %288 = arith.cmpi sge, %20, %287 : vector<8x256xi32>
    %c15_i32_163 = arith.constant 15 : i32
    %289 = vector.broadcast %c15_i32_163 : i32 to vector<8x256xi32>
    %290 = arith.cmpi slt, %20, %289 : vector<8x256xi32>
    %291 = arith.andi %288, %290 : vector<8x256xi1>
    %cst_164 = arith.constant 0.000000e+00 : f32
    %292 = vector.broadcast %cst_164 : f32 to vector<8x256xf32>
    %293 = arith.select %291, %286, %292 : vector<8x256xi1>, vector<8x256xf32>
    %c0_165 = arith.constant 0 : index
    %c114_166 = arith.constant 114 : index
    %294 = vector.load %arg5[%c0_165, %c114_166] : memref<8x512xf32, #tpu.memory_space<vmem>>, vector<8x256xf32>
    %c-2_i32_167 = arith.constant -2 : i32
    %295 = vector.broadcast %c-2_i32_167 : i32 to vector<8x256xi32>
    %296 = arith.cmpi sge, %20, %295 : vector<8x256xi32>
    %c14_i32_168 = arith.constant 14 : i32
    %297 = vector.broadcast %c14_i32_168 : i32 to vector<8x256xi32>
    %298 = arith.cmpi slt, %20, %297 : vector<8x256xi32>
    %299 = arith.andi %296, %298 : vector<8x256xi1>
    %cst_169 = arith.constant 0.000000e+00 : f32
    %300 = vector.broadcast %cst_169 : f32 to vector<8x256xf32>
    %301 = arith.select %299, %294, %300 : vector<8x256xi1>, vector<8x256xf32>
    %302 = tpu.concatenate %276, %284, %285, %293, %301 in 0 : vector<8x256xf32>, vector<8x256xf32>, vector<8x256xf32>, vector<8x256xf32>, vector<8x256xf32> -> vector<40x256xf32>
    %303 = arith.truncf %302 : vector<40x256xf32> to vector<40x256xbf16>
    %c5_170 = arith.constant 5 : index
    %c1_171 = arith.constant 1 : index
    %c0_172 = arith.constant 0 : index
    %c0_173 = arith.constant 0 : index
    %304 = vector.load %arg2[%c5_170, %c1_171, %c0_172, %c0_173] : memref<7x5x8x40xbf16, #tpu.memory_space<vmem>>, vector<1x1x8x40xbf16>
    %305 = vector.shape_cast %304 : vector<1x1x8x40xbf16> to vector<8x40xbf16>
    %cst_174 = arith.constant dense<0.000000e+00> : vector<8x256xf32>
    %306 = tpu.matmul %305, %303, %cst_174 {dimension_numbers = #tpu.dot_dimension_numbers<[1], [0], [0], [1], [0, 0, 1, 1], [], []>} : vector<8x40xbf16>, vector<40x256xbf16>, vector<8x256xf32> -> vector<8x256xf32>
    %307 = arith.addf %268, %306 : vector<8x256xf32>
    %c0_175 = arith.constant 0 : index
    %c126_176 = arith.constant 126 : index
    %308 = vector.load %arg5[%c0_175, %c126_176] : memref<8x512xf32, #tpu.memory_space<vmem>>, vector<8x256xf32>
    %c2_i32_177 = arith.constant 2 : i32
    %309 = vector.broadcast %c2_i32_177 : i32 to vector<8x256xi32>
    %310 = arith.cmpi sge, %20, %309 : vector<8x256xi32>
    %c18_i32_178 = arith.constant 18 : i32
    %311 = vector.broadcast %c18_i32_178 : i32 to vector<8x256xi32>
    %312 = arith.cmpi slt, %20, %311 : vector<8x256xi32>
    %313 = arith.andi %310, %312 : vector<8x256xi1>
    %cst_179 = arith.constant 0.000000e+00 : f32
    %314 = vector.broadcast %cst_179 : f32 to vector<8x256xf32>
    %315 = arith.select %313, %308, %314 : vector<8x256xi1>, vector<8x256xf32>
    %c0_180 = arith.constant 0 : index
    %c127_181 = arith.constant 127 : index
    %316 = vector.load %arg5[%c0_180, %c127_181] : memref<8x512xf32, #tpu.memory_space<vmem>>, vector<8x256xf32>
    %c1_i32_182 = arith.constant 1 : i32
    %317 = vector.broadcast %c1_i32_182 : i32 to vector<8x256xi32>
    %318 = arith.cmpi sge, %20, %317 : vector<8x256xi32>
    %c17_i32_183 = arith.constant 17 : i32
    %319 = vector.broadcast %c17_i32_183 : i32 to vector<8x256xi32>
    %320 = arith.cmpi slt, %20, %319 : vector<8x256xi32>
    %321 = arith.andi %318, %320 : vector<8x256xi1>
    %cst_184 = arith.constant 0.000000e+00 : f32
    %322 = vector.broadcast %cst_184 : f32 to vector<8x256xf32>
    %323 = arith.select %321, %316, %322 : vector<8x256xi1>, vector<8x256xf32>
    %c0_185 = arith.constant 0 : index
    %c128_186 = arith.constant 128 : index
    %324 = vector.load %arg5[%c0_185, %c128_186] : memref<8x512xf32, #tpu.memory_space<vmem>>, vector<8x256xf32>
    %c0_187 = arith.constant 0 : index
    %c129_188 = arith.constant 129 : index
    %325 = vector.load %arg5[%c0_187, %c129_188] : memref<8x512xf32, #tpu.memory_space<vmem>>, vector<8x256xf32>
    %c-1_i32_189 = arith.constant -1 : i32
    %326 = vector.broadcast %c-1_i32_189 : i32 to vector<8x256xi32>
    %327 = arith.cmpi sge, %20, %326 : vector<8x256xi32>
    %c15_i32_190 = arith.constant 15 : i32
    %328 = vector.broadcast %c15_i32_190 : i32 to vector<8x256xi32>
    %329 = arith.cmpi slt, %20, %328 : vector<8x256xi32>
    %330 = arith.andi %327, %329 : vector<8x256xi1>
    %cst_191 = arith.constant 0.000000e+00 : f32
    %331 = vector.broadcast %cst_191 : f32 to vector<8x256xf32>
    %332 = arith.select %330, %325, %331 : vector<8x256xi1>, vector<8x256xf32>
    %c0_192 = arith.constant 0 : index
    %c130_193 = arith.constant 130 : index
    %333 = vector.load %arg5[%c0_192, %c130_193] : memref<8x512xf32, #tpu.memory_space<vmem>>, vector<8x256xf32>
    %c-2_i32_194 = arith.constant -2 : i32
    %334 = vector.broadcast %c-2_i32_194 : i32 to vector<8x256xi32>
    %335 = arith.cmpi sge, %20, %334 : vector<8x256xi32>
    %c14_i32_195 = arith.constant 14 : i32
    %336 = vector.broadcast %c14_i32_195 : i32 to vector<8x256xi32>
    %337 = arith.cmpi slt, %20, %336 : vector<8x256xi32>
    %338 = arith.andi %335, %337 : vector<8x256xi1>
    %cst_196 = arith.constant 0.000000e+00 : f32
    %339 = vector.broadcast %cst_196 : f32 to vector<8x256xf32>
    %340 = arith.select %338, %333, %339 : vector<8x256xi1>, vector<8x256xf32>
    %341 = tpu.concatenate %315, %323, %324, %332, %340 in 0 : vector<8x256xf32>, vector<8x256xf32>, vector<8x256xf32>, vector<8x256xf32>, vector<8x256xf32> -> vector<40x256xf32>
    %342 = arith.truncf %341 : vector<40x256xf32> to vector<40x256xbf16>
    %c5_197 = arith.constant 5 : index
    %c2_198 = arith.constant 2 : index
    %c0_199 = arith.constant 0 : index
    %c0_200 = arith.constant 0 : index
    %343 = vector.load %arg2[%c5_197, %c2_198, %c0_199, %c0_200] : memref<7x5x8x40xbf16, #tpu.memory_space<vmem>>, vector<1x1x8x40xbf16>
    %344 = vector.shape_cast %343 : vector<1x1x8x40xbf16> to vector<8x40xbf16>
    %cst_201 = arith.constant dense<0.000000e+00> : vector<8x256xf32>
    %345 = tpu.matmul %344, %342, %cst_201 {dimension_numbers = #tpu.dot_dimension_numbers<[1], [0], [0], [1], [0, 0, 1, 1], [], []>} : vector<8x40xbf16>, vector<40x256xbf16>, vector<8x256xf32> -> vector<8x256xf32>
    %346 = arith.addf %307, %345 : vector<8x256xf32>
    %c0_202 = arith.constant 0 : index
    %c142_203 = arith.constant 142 : index
    %347 = vector.load %arg5[%c0_202, %c142_203] : memref<8x512xf32, #tpu.memory_space<vmem>>, vector<8x256xf32>
    %c2_i32_204 = arith.constant 2 : i32
    %348 = vector.broadcast %c2_i32_204 : i32 to vector<8x256xi32>
    %349 = arith.cmpi sge, %20, %348 : vector<8x256xi32>
    %c18_i32_205 = arith.constant 18 : i32
    %350 = vector.broadcast %c18_i32_205 : i32 to vector<8x256xi32>
    %351 = arith.cmpi slt, %20, %350 : vector<8x256xi32>
    %352 = arith.andi %349, %351 : vector<8x256xi1>
    %cst_206 = arith.constant 0.000000e+00 : f32
    %353 = vector.broadcast %cst_206 : f32 to vector<8x256xf32>
    %354 = arith.select %352, %347, %353 : vector<8x256xi1>, vector<8x256xf32>
    %c0_207 = arith.constant 0 : index
    %c143_208 = arith.constant 143 : index
    %355 = vector.load %arg5[%c0_207, %c143_208] : memref<8x512xf32, #tpu.memory_space<vmem>>, vector<8x256xf32>
    %c1_i32_209 = arith.constant 1 : i32
    %356 = vector.broadcast %c1_i32_209 : i32 to vector<8x256xi32>
    %357 = arith.cmpi sge, %20, %356 : vector<8x256xi32>
    %c17_i32_210 = arith.constant 17 : i32
    %358 = vector.broadcast %c17_i32_210 : i32 to vector<8x256xi32>
    %359 = arith.cmpi slt, %20, %358 : vector<8x256xi32>
    %360 = arith.andi %357, %359 : vector<8x256xi1>
    %cst_211 = arith.constant 0.000000e+00 : f32
    %361 = vector.broadcast %cst_211 : f32 to vector<8x256xf32>
    %362 = arith.select %360, %355, %361 : vector<8x256xi1>, vector<8x256xf32>
    %c0_212 = arith.constant 0 : index
    %c144_213 = arith.constant 144 : index
    %363 = vector.load %arg5[%c0_212, %c144_213] : memref<8x512xf32, #tpu.memory_space<vmem>>, vector<8x256xf32>
    %c0_214 = arith.constant 0 : index
    %c145_215 = arith.constant 145 : index
    %364 = vector.load %arg5[%c0_214, %c145_215] : memref<8x512xf32, #tpu.memory_space<vmem>>, vector<8x256xf32>
    %c-1_i32_216 = arith.constant -1 : i32
    %365 = vector.broadcast %c-1_i32_216 : i32 to vector<8x256xi32>
    %366 = arith.cmpi sge, %20, %365 : vector<8x256xi32>
    %c15_i32_217 = arith.constant 15 : i32
    %367 = vector.broadcast %c15_i32_217 : i32 to vector<8x256xi32>
    %368 = arith.cmpi slt, %20, %367 : vector<8x256xi32>
    %369 = arith.andi %366, %368 : vector<8x256xi1>
    %cst_218 = arith.constant 0.000000e+00 : f32
    %370 = vector.broadcast %cst_218 : f32 to vector<8x256xf32>
    %371 = arith.select %369, %364, %370 : vector<8x256xi1>, vector<8x256xf32>
    %c0_219 = arith.constant 0 : index
    %c146_220 = arith.constant 146 : index
    %372 = vector.load %arg5[%c0_219, %c146_220] : memref<8x512xf32, #tpu.memory_space<vmem>>, vector<8x256xf32>
    %c-2_i32_221 = arith.constant -2 : i32
    %373 = vector.broadcast %c-2_i32_221 : i32 to vector<8x256xi32>
    %374 = arith.cmpi sge, %20, %373 : vector<8x256xi32>
    %c14_i32_222 = arith.constant 14 : i32
    %375 = vector.broadcast %c14_i32_222 : i32 to vector<8x256xi32>
    %376 = arith.cmpi slt, %20, %375 : vector<8x256xi32>
    %377 = arith.andi %374, %376 : vector<8x256xi1>
    %cst_223 = arith.constant 0.000000e+00 : f32
    %378 = vector.broadcast %cst_223 : f32 to vector<8x256xf32>
    %379 = arith.select %377, %372, %378 : vector<8x256xi1>, vector<8x256xf32>
    %380 = tpu.concatenate %354, %362, %363, %371, %379 in 0 : vector<8x256xf32>, vector<8x256xf32>, vector<8x256xf32>, vector<8x256xf32>, vector<8x256xf32> -> vector<40x256xf32>
    %381 = arith.truncf %380 : vector<40x256xf32> to vector<40x256xbf16>
    %c5_224 = arith.constant 5 : index
    %c3_225 = arith.constant 3 : index
    %c0_226 = arith.constant 0 : index
    %c0_227 = arith.constant 0 : index
    %382 = vector.load %arg2[%c5_224, %c3_225, %c0_226, %c0_227] : memref<7x5x8x40xbf16, #tpu.memory_space<vmem>>, vector<1x1x8x40xbf16>
    %383 = vector.shape_cast %382 : vector<1x1x8x40xbf16> to vector<8x40xbf16>
    %cst_228 = arith.constant dense<0.000000e+00> : vector<8x256xf32>
    %384 = tpu.matmul %383, %381, %cst_228 {dimension_numbers = #tpu.dot_dimension_numbers<[1], [0], [0], [1], [0, 0, 1, 1], [], []>} : vector<8x40xbf16>, vector<40x256xbf16>, vector<8x256xf32> -> vector<8x256xf32>
    %385 = arith.addf %346, %384 : vector<8x256xf32>
    %c0_229 = arith.constant 0 : index
    %c158_230 = arith.constant 158 : index
    %386 = vector.load %arg5[%c0_229, %c158_230] : memref<8x512xf32, #tpu.memory_space<vmem>>, vector<8x256xf32>
    %c2_i32_231 = arith.constant 2 : i32
    %387 = vector.broadcast %c2_i32_231 : i32 to vector<8x256xi32>
    %388 = arith.cmpi sge, %20, %387 : vector<8x256xi32>
    %c18_i32_232 = arith.constant 18 : i32
    %389 = vector.broadcast %c18_i32_232 : i32 to vector<8x256xi32>
    %390 = arith.cmpi slt, %20, %389 : vector<8x256xi32>
    %391 = arith.andi %388, %390 : vector<8x256xi1>
    %cst_233 = arith.constant 0.000000e+00 : f32
    %392 = vector.broadcast %cst_233 : f32 to vector<8x256xf32>
    %393 = arith.select %391, %386, %392 : vector<8x256xi1>, vector<8x256xf32>
    %c0_234 = arith.constant 0 : index
    %c159_235 = arith.constant 159 : index
    %394 = vector.load %arg5[%c0_234, %c159_235] : memref<8x512xf32, #tpu.memory_space<vmem>>, vector<8x256xf32>
    %c1_i32_236 = arith.constant 1 : i32
    %395 = vector.broadcast %c1_i32_236 : i32 to vector<8x256xi32>
    %396 = arith.cmpi sge, %20, %395 : vector<8x256xi32>
    %c17_i32_237 = arith.constant 17 : i32
    %397 = vector.broadcast %c17_i32_237 : i32 to vector<8x256xi32>
    %398 = arith.cmpi slt, %20, %397 : vector<8x256xi32>
    %399 = arith.andi %396, %398 : vector<8x256xi1>
    %cst_238 = arith.constant 0.000000e+00 : f32
    %400 = vector.broadcast %cst_238 : f32 to vector<8x256xf32>
    %401 = arith.select %399, %394, %400 : vector<8x256xi1>, vector<8x256xf32>
    %c0_239 = arith.constant 0 : index
    %c160_240 = arith.constant 160 : index
    %402 = vector.load %arg5[%c0_239, %c160_240] : memref<8x512xf32, #tpu.memory_space<vmem>>, vector<8x256xf32>
    %c0_241 = arith.constant 0 : index
    %c161_242 = arith.constant 161 : index
    %403 = vector.load %arg5[%c0_241, %c161_242] : memref<8x512xf32, #tpu.memory_space<vmem>>, vector<8x256xf32>
    %c-1_i32_243 = arith.constant -1 : i32
    %404 = vector.broadcast %c-1_i32_243 : i32 to vector<8x256xi32>
    %405 = arith.cmpi sge, %20, %404 : vector<8x256xi32>
    %c15_i32_244 = arith.constant 15 : i32
    %406 = vector.broadcast %c15_i32_244 : i32 to vector<8x256xi32>
    %407 = arith.cmpi slt, %20, %406 : vector<8x256xi32>
    %408 = arith.andi %405, %407 : vector<8x256xi1>
    %cst_245 = arith.constant 0.000000e+00 : f32
    %409 = vector.broadcast %cst_245 : f32 to vector<8x256xf32>
    %410 = arith.select %408, %403, %409 : vector<8x256xi1>, vector<8x256xf32>
    %c0_246 = arith.constant 0 : index
    %c162_247 = arith.constant 162 : index
    %411 = vector.load %arg5[%c0_246, %c162_247] : memref<8x512xf32, #tpu.memory_space<vmem>>, vector<8x256xf32>
    %c-2_i32_248 = arith.constant -2 : i32
    %412 = vector.broadcast %c-2_i32_248 : i32 to vector<8x256xi32>
    %413 = arith.cmpi sge, %20, %412 : vector<8x256xi32>
    %c14_i32_249 = arith.constant 14 : i32
    %414 = vector.broadcast %c14_i32_249 : i32 to vector<8x256xi32>
    %415 = arith.cmpi slt, %20, %414 : vector<8x256xi32>
    %416 = arith.andi %413, %415 : vector<8x256xi1>
    %cst_250 = arith.constant 0.000000e+00 : f32
    %417 = vector.broadcast %cst_250 : f32 to vector<8x256xf32>
    %418 = arith.select %416, %411, %417 : vector<8x256xi1>, vector<8x256xf32>
    %419 = tpu.concatenate %393, %401, %402, %410, %418 in 0 : vector<8x256xf32>, vector<8x256xf32>, vector<8x256xf32>, vector<8x256xf32>, vector<8x256xf32> -> vector<40x256xf32>
    %420 = arith.truncf %419 : vector<40x256xf32> to vector<40x256xbf16>
    %c5_251 = arith.constant 5 : index
    %c4_252 = arith.constant 4 : index
    %c0_253 = arith.constant 0 : index
    %c0_254 = arith.constant 0 : index
    %421 = vector.load %arg2[%c5_251, %c4_252, %c0_253, %c0_254] : memref<7x5x8x40xbf16, #tpu.memory_space<vmem>>, vector<1x1x8x40xbf16>
    %422 = vector.shape_cast %421 : vector<1x1x8x40xbf16> to vector<8x40xbf16>
    %cst_255 = arith.constant dense<0.000000e+00> : vector<8x256xf32>
    %423 = tpu.matmul %422, %420, %cst_255 {dimension_numbers = #tpu.dot_dimension_numbers<[1], [0], [0], [1], [0, 0, 1, 1], [], []>} : vector<8x40xbf16>, vector<40x256xbf16>, vector<8x256xf32> -> vector<8x256xf32>
    %424 = arith.addf %385, %423 : vector<8x256xf32>
    %c5_256 = arith.constant 5 : index
    %c0_257 = arith.constant 0 : index
    %c0_258 = arith.constant 0 : index
    %425 = vector.load %arg3[%c5_256, %c0_257, %c0_258] : memref<7x8x1xf32, #tpu.memory_space<vmem>>, vector<1x8x1xf32>
    %426 = vector.shape_cast %425 : vector<1x8x1xf32> to vector<8x1xf32>
    %427 = vector.broadcast %426 : vector<8x1xf32> to vector<8x256xf32>
    %428 = arith.addf %424, %427 : vector<8x256xf32>
    %429 = arith.addf %428, %225 : vector<8x256xf32>
    %c0_259 = arith.constant 0 : index
    %c128_260 = arith.constant 128 : index
    %430 = vector.load %arg5[%c0_259, %c128_260] : memref<8x512xf32, #tpu.memory_space<vmem>>, vector<8x256xf32>
    tpu.vector_store %arg5[%c0_259, %c128_260], %429 {strides = array<i32>} : memref<8x512xf32, #tpu.memory_space<vmem>>, vector<8x256xf32>,
    %cst_261 = arith.constant 0.000000e+00 : f32
    %431 = vector.broadcast %cst_261 : f32 to vector<8x256xf32>
    %c0_262 = arith.constant 0 : index
    %c94_263 = arith.constant 94 : index
    %432 = vector.load %arg5[%c0_262, %c94_263] : memref<8x512xf32, #tpu.memory_space<vmem>>, vector<8x256xf32>
    %c2_i32_264 = arith.constant 2 : i32
    %433 = vector.broadcast %c2_i32_264 : i32 to vector<8x256xi32>
    %434 = arith.cmpi sge, %20, %433 : vector<8x256xi32>
    %c18_i32_265 = arith.constant 18 : i32
    %435 = vector.broadcast %c18_i32_265 : i32 to vector<8x256xi32>
    %436 = arith.cmpi slt, %20, %435 : vector<8x256xi32>
    %437 = arith.andi %434, %436 : vector<8x256xi1>
    %cst_266 = arith.constant 0.000000e+00 : f32
    %438 = vector.broadcast %cst_266 : f32 to vector<8x256xf32>
    %439 = arith.select %437, %432, %438 : vector<8x256xi1>, vector<8x256xf32>
    %c0_267 = arith.constant 0 : index
    %c95_268 = arith.constant 95 : index
    %440 = vector.load %arg5[%c0_267, %c95_268] : memref<8x512xf32, #tpu.memory_space<vmem>>, vector<8x256xf32>
    %c1_i32_269 = arith.constant 1 : i32
    %441 = vector.broadcast %c1_i32_269 : i32 to vector<8x256xi32>
    %442 = arith.cmpi sge, %20, %441 : vector<8x256xi32>
    %c17_i32_270 = arith.constant 17 : i32
    %443 = vector.broadcast %c17_i32_270 : i32 to vector<8x256xi32>
    %444 = arith.cmpi slt, %20, %443 : vector<8x256xi32>
    %445 = arith.andi %442, %444 : vector<8x256xi1>
    %cst_271 = arith.constant 0.000000e+00 : f32
    %446 = vector.broadcast %cst_271 : f32 to vector<8x256xf32>
    %447 = arith.select %445, %440, %446 : vector<8x256xi1>, vector<8x256xf32>
    %c0_272 = arith.constant 0 : index
    %c96_273 = arith.constant 96 : index
    %448 = vector.load %arg5[%c0_272, %c96_273] : memref<8x512xf32, #tpu.memory_space<vmem>>, vector<8x256xf32>
    %c0_274 = arith.constant 0 : index
    %c97_275 = arith.constant 97 : index
    %449 = vector.load %arg5[%c0_274, %c97_275] : memref<8x512xf32, #tpu.memory_space<vmem>>, vector<8x256xf32>
    %c-1_i32_276 = arith.constant -1 : i32
    %450 = vector.broadcast %c-1_i32_276 : i32 to vector<8x256xi32>
    %451 = arith.cmpi sge, %20, %450 : vector<8x256xi32>
    %c15_i32_277 = arith.constant 15 : i32
    %452 = vector.broadcast %c15_i32_277 : i32 to vector<8x256xi32>
    %453 = arith.cmpi slt, %20, %452 : vector<8x256xi32>
    %454 = arith.andi %451, %453 : vector<8x256xi1>
    %cst_278 = arith.constant 0.000000e+00 : f32
    %455 = vector.broadcast %cst_278 : f32 to vector<8x256xf32>
    %456 = arith.select %454, %449, %455 : vector<8x256xi1>, vector<8x256xf32>
    %c0_279 = arith.constant 0 : index
    %c98_280 = arith.constant 98 : index
    %457 = vector.load %arg5[%c0_279, %c98_280] : memref<8x512xf32, #tpu.memory_space<vmem>>, vector<8x256xf32>
    %c-2_i32_281 = arith.constant -2 : i32
    %458 = vector.broadcast %c-2_i32_281 : i32 to vector<8x256xi32>
    %459 = arith.cmpi sge, %20, %458 : vector<8x256xi32>
    %c14_i32_282 = arith.constant 14 : i32
    %460 = vector.broadcast %c14_i32_282 : i32 to vector<8x256xi32>
    %461 = arith.cmpi slt, %20, %460 : vector<8x256xi32>
    %462 = arith.andi %459, %461 : vector<8x256xi1>
    %cst_283 = arith.constant 0.000000e+00 : f32
    %463 = vector.broadcast %cst_283 : f32 to vector<8x256xf32>
    %464 = arith.select %462, %457, %463 : vector<8x256xi1>, vector<8x256xf32>
    %465 = tpu.concatenate %439, %447, %448, %456, %464 in 0 : vector<8x256xf32>, vector<8x256xf32>, vector<8x256xf32>, vector<8x256xf32>, vector<8x256xf32> -> vector<40x256xf32>
    %466 = arith.truncf %465 : vector<40x256xf32> to vector<40x256xbf16>
    %c6 = arith.constant 6 : index
    %c0_284 = arith.constant 0 : index
    %c0_285 = arith.constant 0 : index
    %c0_286 = arith.constant 0 : index
    %467 = vector.load %arg2[%c6, %c0_284, %c0_285, %c0_286] : memref<7x5x8x40xbf16, #tpu.memory_space<vmem>>, vector<1x1x8x40xbf16>
    %468 = vector.shape_cast %467 : vector<1x1x8x40xbf16> to vector<8x40xbf16>
    %cst_287 = arith.constant dense<0.000000e+00> : vector<8x256xf32>
    %469 = tpu.matmul %468, %466, %cst_287 {dimension_numbers = #tpu.dot_dimension_numbers<[1], [0], [0], [1], [0, 0, 1, 1], [], []>} : vector<8x40xbf16>, vector<40x256xbf16>, vector<8x256xf32> -> vector<8x256xf32>
    %470 = arith.addf %431, %469 : vector<8x256xf32>
    %c0_288 = arith.constant 0 : index
    %c110_289 = arith.constant 110 : index
    %471 = vector.load %arg5[%c0_288, %c110_289] : memref<8x512xf32, #tpu.memory_space<vmem>>, vector<8x256xf32>
    %c2_i32_290 = arith.constant 2 : i32
    %472 = vector.broadcast %c2_i32_290 : i32 to vector<8x256xi32>
    %473 = arith.cmpi sge, %20, %472 : vector<8x256xi32>
    %c18_i32_291 = arith.constant 18 : i32
    %474 = vector.broadcast %c18_i32_291 : i32 to vector<8x256xi32>
    %475 = arith.cmpi slt, %20, %474 : vector<8x256xi32>
    %476 = arith.andi %473, %475 : vector<8x256xi1>
    %cst_292 = arith.constant 0.000000e+00 : f32
    %477 = vector.broadcast %cst_292 : f32 to vector<8x256xf32>
    %478 = arith.select %476, %471, %477 : vector<8x256xi1>, vector<8x256xf32>
    %c0_293 = arith.constant 0 : index
    %c111_294 = arith.constant 111 : index
    %479 = vector.load %arg5[%c0_293, %c111_294] : memref<8x512xf32, #tpu.memory_space<vmem>>, vector<8x256xf32>
    %c1_i32_295 = arith.constant 1 : i32
    %480 = vector.broadcast %c1_i32_295 : i32 to vector<8x256xi32>
    %481 = arith.cmpi sge, %20, %480 : vector<8x256xi32>
    %c17_i32_296 = arith.constant 17 : i32
    %482 = vector.broadcast %c17_i32_296 : i32 to vector<8x256xi32>
    %483 = arith.cmpi slt, %20, %482 : vector<8x256xi32>
    %484 = arith.andi %481, %483 : vector<8x256xi1>
    %cst_297 = arith.constant 0.000000e+00 : f32
    %485 = vector.broadcast %cst_297 : f32 to vector<8x256xf32>
    %486 = arith.select %484, %479, %485 : vector<8x256xi1>, vector<8x256xf32>
    %c0_298 = arith.constant 0 : index
    %c112_299 = arith.constant 112 : index
    %487 = vector.load %arg5[%c0_298, %c112_299] : memref<8x512xf32, #tpu.memory_space<vmem>>, vector<8x256xf32>
    %c0_300 = arith.constant 0 : index
    %c113_301 = arith.constant 113 : index
    %488 = vector.load %arg5[%c0_300, %c113_301] : memref<8x512xf32, #tpu.memory_space<vmem>>, vector<8x256xf32>
    %c-1_i32_302 = arith.constant -1 : i32
    %489 = vector.broadcast %c-1_i32_302 : i32 to vector<8x256xi32>
    %490 = arith.cmpi sge, %20, %489 : vector<8x256xi32>
    %c15_i32_303 = arith.constant 15 : i32
    %491 = vector.broadcast %c15_i32_303 : i32 to vector<8x256xi32>
    %492 = arith.cmpi slt, %20, %491 : vector<8x256xi32>
    %493 = arith.andi %490, %492 : vector<8x256xi1>
    %cst_304 = arith.constant 0.000000e+00 : f32
    %494 = vector.broadcast %cst_304 : f32 to vector<8x256xf32>
    %495 = arith.select %493, %488, %494 : vector<8x256xi1>, vector<8x256xf32>
    %c0_305 = arith.constant 0 : index
    %c114_306 = arith.constant 114 : index
    %496 = vector.load %arg5[%c0_305, %c114_306] : memref<8x512xf32, #tpu.memory_space<vmem>>, vector<8x256xf32>
    %c-2_i32_307 = arith.constant -2 : i32
    %497 = vector.broadcast %c-2_i32_307 : i32 to vector<8x256xi32>
    %498 = arith.cmpi sge, %20, %497 : vector<8x256xi32>
    %c14_i32_308 = arith.constant 14 : i32
    %499 = vector.broadcast %c14_i32_308 : i32 to vector<8x256xi32>
    %500 = arith.cmpi slt, %20, %499 : vector<8x256xi32>
    %501 = arith.andi %498, %500 : vector<8x256xi1>
    %cst_309 = arith.constant 0.000000e+00 : f32
    %502 = vector.broadcast %cst_309 : f32 to vector<8x256xf32>
    %503 = arith.select %501, %496, %502 : vector<8x256xi1>, vector<8x256xf32>
    %504 = tpu.concatenate %478, %486, %487, %495, %503 in 0 : vector<8x256xf32>, vector<8x256xf32>, vector<8x256xf32>, vector<8x256xf32>, vector<8x256xf32> -> vector<40x256xf32>
    %505 = arith.truncf %504 : vector<40x256xf32> to vector<40x256xbf16>
    %c6_310 = arith.constant 6 : index
    %c1_311 = arith.constant 1 : index
    %c0_312 = arith.constant 0 : index
    %c0_313 = arith.constant 0 : index
    %506 = vector.load %arg2[%c6_310, %c1_311, %c0_312, %c0_313] : memref<7x5x8x40xbf16, #tpu.memory_space<vmem>>, vector<1x1x8x40xbf16>
    %507 = vector.shape_cast %506 : vector<1x1x8x40xbf16> to vector<8x40xbf16>
    %cst_314 = arith.constant dense<0.000000e+00> : vector<8x256xf32>
    %508 = tpu.matmul %507, %505, %cst_314 {dimension_numbers = #tpu.dot_dimension_numbers<[1], [0], [0], [1], [0, 0, 1, 1], [], []>} : vector<8x40xbf16>, vector<40x256xbf16>, vector<8x256xf32> -> vector<8x256xf32>
    %509 = arith.addf %470, %508 : vector<8x256xf32>
    %c0_315 = arith.constant 0 : index
    %c126_316 = arith.constant 126 : index
    %510 = vector.load %arg5[%c0_315, %c126_316] : memref<8x512xf32, #tpu.memory_space<vmem>>, vector<8x256xf32>
    %c2_i32_317 = arith.constant 2 : i32
    %511 = vector.broadcast %c2_i32_317 : i32 to vector<8x256xi32>
    %512 = arith.cmpi sge, %20, %511 : vector<8x256xi32>
    %c18_i32_318 = arith.constant 18 : i32
    %513 = vector.broadcast %c18_i32_318 : i32 to vector<8x256xi32>
    %514 = arith.cmpi slt, %20, %513 : vector<8x256xi32>
    %515 = arith.andi %512, %514 : vector<8x256xi1>
    %cst_319 = arith.constant 0.000000e+00 : f32
    %516 = vector.broadcast %cst_319 : f32 to vector<8x256xf32>
    %517 = arith.select %515, %510, %516 : vector<8x256xi1>, vector<8x256xf32>
    %c0_320 = arith.constant 0 : index
    %c127_321 = arith.constant 127 : index
    %518 = vector.load %arg5[%c0_320, %c127_321] : memref<8x512xf32, #tpu.memory_space<vmem>>, vector<8x256xf32>
    %c1_i32_322 = arith.constant 1 : i32
    %519 = vector.broadcast %c1_i32_322 : i32 to vector<8x256xi32>
    %520 = arith.cmpi sge, %20, %519 : vector<8x256xi32>
    %c17_i32_323 = arith.constant 17 : i32
    %521 = vector.broadcast %c17_i32_323 : i32 to vector<8x256xi32>
    %522 = arith.cmpi slt, %20, %521 : vector<8x256xi32>
    %523 = arith.andi %520, %522 : vector<8x256xi1>
    %cst_324 = arith.constant 0.000000e+00 : f32
    %524 = vector.broadcast %cst_324 : f32 to vector<8x256xf32>
    %525 = arith.select %523, %518, %524 : vector<8x256xi1>, vector<8x256xf32>
    %c0_325 = arith.constant 0 : index
    %c128_326 = arith.constant 128 : index
    %526 = vector.load %arg5[%c0_325, %c128_326] : memref<8x512xf32, #tpu.memory_space<vmem>>, vector<8x256xf32>
    %c0_327 = arith.constant 0 : index
    %c129_328 = arith.constant 129 : index
    %527 = vector.load %arg5[%c0_327, %c129_328] : memref<8x512xf32, #tpu.memory_space<vmem>>, vector<8x256xf32>
    %c-1_i32_329 = arith.constant -1 : i32
    %528 = vector.broadcast %c-1_i32_329 : i32 to vector<8x256xi32>
    %529 = arith.cmpi sge, %20, %528 : vector<8x256xi32>
    %c15_i32_330 = arith.constant 15 : i32
    %530 = vector.broadcast %c15_i32_330 : i32 to vector<8x256xi32>
    %531 = arith.cmpi slt, %20, %530 : vector<8x256xi32>
    %532 = arith.andi %529, %531 : vector<8x256xi1>
    %cst_331 = arith.constant 0.000000e+00 : f32
    %533 = vector.broadcast %cst_331 : f32 to vector<8x256xf32>
    %534 = arith.select %532, %527, %533 : vector<8x256xi1>, vector<8x256xf32>
    %c0_332 = arith.constant 0 : index
    %c130_333 = arith.constant 130 : index
    %535 = vector.load %arg5[%c0_332, %c130_333] : memref<8x512xf32, #tpu.memory_space<vmem>>, vector<8x256xf32>
    %c-2_i32_334 = arith.constant -2 : i32
    %536 = vector.broadcast %c-2_i32_334 : i32 to vector<8x256xi32>
    %537 = arith.cmpi sge, %20, %536 : vector<8x256xi32>
    %c14_i32_335 = arith.constant 14 : i32
    %538 = vector.broadcast %c14_i32_335 : i32 to vector<8x256xi32>
    %539 = arith.cmpi slt, %20, %538 : vector<8x256xi32>
    %540 = arith.andi %537, %539 : vector<8x256xi1>
    %cst_336 = arith.constant 0.000000e+00 : f32
    %541 = vector.broadcast %cst_336 : f32 to vector<8x256xf32>
    %542 = arith.select %540, %535, %541 : vector<8x256xi1>, vector<8x256xf32>
    %543 = tpu.concatenate %517, %525, %526, %534, %542 in 0 : vector<8x256xf32>, vector<8x256xf32>, vector<8x256xf32>, vector<8x256xf32>, vector<8x256xf32> -> vector<40x256xf32>
    %544 = arith.truncf %543 : vector<40x256xf32> to vector<40x256xbf16>
    %c6_337 = arith.constant 6 : index
    %c2_338 = arith.constant 2 : index
    %c0_339 = arith.constant 0 : index
    %c0_340 = arith.constant 0 : index
    %545 = vector.load %arg2[%c6_337, %c2_338, %c0_339, %c0_340] : memref<7x5x8x40xbf16, #tpu.memory_space<vmem>>, vector<1x1x8x40xbf16>
    %546 = vector.shape_cast %545 : vector<1x1x8x40xbf16> to vector<8x40xbf16>
    %cst_341 = arith.constant dense<0.000000e+00> : vector<8x256xf32>
    %547 = tpu.matmul %546, %544, %cst_341 {dimension_numbers = #tpu.dot_dimension_numbers<[1], [0], [0], [1], [0, 0, 1, 1], [], []>} : vector<8x40xbf16>, vector<40x256xbf16>, vector<8x256xf32> -> vector<8x256xf32>
    %548 = arith.addf %509, %547 : vector<8x256xf32>
    %c0_342 = arith.constant 0 : index
    %c142_343 = arith.constant 142 : index
    %549 = vector.load %arg5[%c0_342, %c142_343] : memref<8x512xf32, #tpu.memory_space<vmem>>, vector<8x256xf32>
    %c2_i32_344 = arith.constant 2 : i32
    %550 = vector.broadcast %c2_i32_344 : i32 to vector<8x256xi32>
    %551 = arith.cmpi sge, %20, %550 : vector<8x256xi32>
    %c18_i32_345 = arith.constant 18 : i32
    %552 = vector.broadcast %c18_i32_345 : i32 to vector<8x256xi32>
    %553 = arith.cmpi slt, %20, %552 : vector<8x256xi32>
    %554 = arith.andi %551, %553 : vector<8x256xi1>
    %cst_346 = arith.constant 0.000000e+00 : f32
    %555 = vector.broadcast %cst_346 : f32 to vector<8x256xf32>
    %556 = arith.select %554, %549, %555 : vector<8x256xi1>, vector<8x256xf32>
    %c0_347 = arith.constant 0 : index
    %c143_348 = arith.constant 143 : index
    %557 = vector.load %arg5[%c0_347, %c143_348] : memref<8x512xf32, #tpu.memory_space<vmem>>, vector<8x256xf32>
    %c1_i32_349 = arith.constant 1 : i32
    %558 = vector.broadcast %c1_i32_349 : i32 to vector<8x256xi32>
    %559 = arith.cmpi sge, %20, %558 : vector<8x256xi32>
    %c17_i32_350 = arith.constant 17 : i32
    %560 = vector.broadcast %c17_i32_350 : i32 to vector<8x256xi32>
    %561 = arith.cmpi slt, %20, %560 : vector<8x256xi32>
    %562 = arith.andi %559, %561 : vector<8x256xi1>
    %cst_351 = arith.constant 0.000000e+00 : f32
    %563 = vector.broadcast %cst_351 : f32 to vector<8x256xf32>
    %564 = arith.select %562, %557, %563 : vector<8x256xi1>, vector<8x256xf32>
    %c0_352 = arith.constant 0 : index
    %c144_353 = arith.constant 144 : index
    %565 = vector.load %arg5[%c0_352, %c144_353] : memref<8x512xf32, #tpu.memory_space<vmem>>, vector<8x256xf32>
    %c0_354 = arith.constant 0 : index
    %c145_355 = arith.constant 145 : index
    %566 = vector.load %arg5[%c0_354, %c145_355] : memref<8x512xf32, #tpu.memory_space<vmem>>, vector<8x256xf32>
    %c-1_i32_356 = arith.constant -1 : i32
    %567 = vector.broadcast %c-1_i32_356 : i32 to vector<8x256xi32>
    %568 = arith.cmpi sge, %20, %567 : vector<8x256xi32>
    %c15_i32_357 = arith.constant 15 : i32
    %569 = vector.broadcast %c15_i32_357 : i32 to vector<8x256xi32>
    %570 = arith.cmpi slt, %20, %569 : vector<8x256xi32>
    %571 = arith.andi %568, %570 : vector<8x256xi1>
    %cst_358 = arith.constant 0.000000e+00 : f32
    %572 = vector.broadcast %cst_358 : f32 to vector<8x256xf32>
    %573 = arith.select %571, %566, %572 : vector<8x256xi1>, vector<8x256xf32>
    %c0_359 = arith.constant 0 : index
    %c146_360 = arith.constant 146 : index
    %574 = vector.load %arg5[%c0_359, %c146_360] : memref<8x512xf32, #tpu.memory_space<vmem>>, vector<8x256xf32>
    %c-2_i32_361 = arith.constant -2 : i32
    %575 = vector.broadcast %c-2_i32_361 : i32 to vector<8x256xi32>
    %576 = arith.cmpi sge, %20, %575 : vector<8x256xi32>
    %c14_i32_362 = arith.constant 14 : i32
    %577 = vector.broadcast %c14_i32_362 : i32 to vector<8x256xi32>
    %578 = arith.cmpi slt, %20, %577 : vector<8x256xi32>
    %579 = arith.andi %576, %578 : vector<8x256xi1>
    %cst_363 = arith.constant 0.000000e+00 : f32
    %580 = vector.broadcast %cst_363 : f32 to vector<8x256xf32>
    %581 = arith.select %579, %574, %580 : vector<8x256xi1>, vector<8x256xf32>
    %582 = tpu.concatenate %556, %564, %565, %573, %581 in 0 : vector<8x256xf32>, vector<8x256xf32>, vector<8x256xf32>, vector<8x256xf32>, vector<8x256xf32> -> vector<40x256xf32>
    %583 = arith.truncf %582 : vector<40x256xf32> to vector<40x256xbf16>
    %c6_364 = arith.constant 6 : index
    %c3_365 = arith.constant 3 : index
    %c0_366 = arith.constant 0 : index
    %c0_367 = arith.constant 0 : index
    %584 = vector.load %arg2[%c6_364, %c3_365, %c0_366, %c0_367] : memref<7x5x8x40xbf16, #tpu.memory_space<vmem>>, vector<1x1x8x40xbf16>
    %585 = vector.shape_cast %584 : vector<1x1x8x40xbf16> to vector<8x40xbf16>
    %cst_368 = arith.constant dense<0.000000e+00> : vector<8x256xf32>
    %586 = tpu.matmul %585, %583, %cst_368 {dimension_numbers = #tpu.dot_dimension_numbers<[1], [0], [0], [1], [0, 0, 1, 1], [], []>} : vector<8x40xbf16>, vector<40x256xbf16>, vector<8x256xf32> -> vector<8x256xf32>
    %587 = arith.addf %548, %586 : vector<8x256xf32>
    %c0_369 = arith.constant 0 : index
    %c158_370 = arith.constant 158 : index
    %588 = vector.load %arg5[%c0_369, %c158_370] : memref<8x512xf32, #tpu.memory_space<vmem>>, vector<8x256xf32>
    %c2_i32_371 = arith.constant 2 : i32
    %589 = vector.broadcast %c2_i32_371 : i32 to vector<8x256xi32>
    %590 = arith.cmpi sge, %20, %589 : vector<8x256xi32>
    %c18_i32_372 = arith.constant 18 : i32
    %591 = vector.broadcast %c18_i32_372 : i32 to vector<8x256xi32>
    %592 = arith.cmpi slt, %20, %591 : vector<8x256xi32>
    %593 = arith.andi %590, %592 : vector<8x256xi1>
    %cst_373 = arith.constant 0.000000e+00 : f32
    %594 = vector.broadcast %cst_373 : f32 to vector<8x256xf32>
    %595 = arith.select %593, %588, %594 : vector<8x256xi1>, vector<8x256xf32>
    %c0_374 = arith.constant 0 : index
    %c159_375 = arith.constant 159 : index
    %596 = vector.load %arg5[%c0_374, %c159_375] : memref<8x512xf32, #tpu.memory_space<vmem>>, vector<8x256xf32>
    %c1_i32_376 = arith.constant 1 : i32
    %597 = vector.broadcast %c1_i32_376 : i32 to vector<8x256xi32>
    %598 = arith.cmpi sge, %20, %597 : vector<8x256xi32>
    %c17_i32_377 = arith.constant 17 : i32
    %599 = vector.broadcast %c17_i32_377 : i32 to vector<8x256xi32>
    %600 = arith.cmpi slt, %20, %599 : vector<8x256xi32>
    %601 = arith.andi %598, %600 : vector<8x256xi1>
    %cst_378 = arith.constant 0.000000e+00 : f32
    %602 = vector.broadcast %cst_378 : f32 to vector<8x256xf32>
    %603 = arith.select %601, %596, %602 : vector<8x256xi1>, vector<8x256xf32>
    %c0_379 = arith.constant 0 : index
    %c160_380 = arith.constant 160 : index
    %604 = vector.load %arg5[%c0_379, %c160_380] : memref<8x512xf32, #tpu.memory_space<vmem>>, vector<8x256xf32>
    %c0_381 = arith.constant 0 : index
    %c161_382 = arith.constant 161 : index
    %605 = vector.load %arg5[%c0_381, %c161_382] : memref<8x512xf32, #tpu.memory_space<vmem>>, vector<8x256xf32>
    %c-1_i32_383 = arith.constant -1 : i32
    %606 = vector.broadcast %c-1_i32_383 : i32 to vector<8x256xi32>
    %607 = arith.cmpi sge, %20, %606 : vector<8x256xi32>
    %c15_i32_384 = arith.constant 15 : i32
    %608 = vector.broadcast %c15_i32_384 : i32 to vector<8x256xi32>
    %609 = arith.cmpi slt, %20, %608 : vector<8x256xi32>
    %610 = arith.andi %607, %609 : vector<8x256xi1>
    %cst_385 = arith.constant 0.000000e+00 : f32
    %611 = vector.broadcast %cst_385 : f32 to vector<8x256xf32>
    %612 = arith.select %610, %605, %611 : vector<8x256xi1>, vector<8x256xf32>
    %c0_386 = arith.constant 0 : index
    %c162_387 = arith.constant 162 : index
    %613 = vector.load %arg5[%c0_386, %c162_387] : memref<8x512xf32, #tpu.memory_space<vmem>>, vector<8x256xf32>
    %c-2_i32_388 = arith.constant -2 : i32
    %614 = vector.broadcast %c-2_i32_388 : i32 to vector<8x256xi32>
    %615 = arith.cmpi sge, %20, %614 : vector<8x256xi32>
    %c14_i32_389 = arith.constant 14 : i32
    %616 = vector.broadcast %c14_i32_389 : i32 to vector<8x256xi32>
    %617 = arith.cmpi slt, %20, %616 : vector<8x256xi32>
    %618 = arith.andi %615, %617 : vector<8x256xi1>
    %cst_390 = arith.constant 0.000000e+00 : f32
    %619 = vector.broadcast %cst_390 : f32 to vector<8x256xf32>
    %620 = arith.select %618, %613, %619 : vector<8x256xi1>, vector<8x256xf32>
    %621 = tpu.concatenate %595, %603, %604, %612, %620 in 0 : vector<8x256xf32>, vector<8x256xf32>, vector<8x256xf32>, vector<8x256xf32>, vector<8x256xf32> -> vector<40x256xf32>
    %622 = arith.truncf %621 : vector<40x256xf32> to vector<40x256xbf16>
    %c6_391 = arith.constant 6 : index
    %c4_392 = arith.constant 4 : index
    %c0_393 = arith.constant 0 : index
    %c0_394 = arith.constant 0 : index
    %623 = vector.load %arg2[%c6_391, %c4_392, %c0_393, %c0_394] : memref<7x5x8x40xbf16, #tpu.memory_space<vmem>>, vector<1x1x8x40xbf16>
    %624 = vector.shape_cast %623 : vector<1x1x8x40xbf16> to vector<8x40xbf16>
    %cst_395 = arith.constant dense<0.000000e+00> : vector<8x256xf32>
    %625 = tpu.matmul %624, %622, %cst_395 {dimension_numbers = #tpu.dot_dimension_numbers<[1], [0], [0], [1], [0, 0, 1, 1], [], []>} : vector<8x40xbf16>, vector<40x256xbf16>, vector<8x256xf32> -> vector<8x256xf32>
    %626 = arith.addf %587, %625 : vector<8x256xf32>
    %c6_396 = arith.constant 6 : index
    %c0_397 = arith.constant 0 : index
    %c0_398 = arith.constant 0 : index
    %627 = vector.load %arg3[%c6_396, %c0_397, %c0_398] : memref<7x8x1xf32, #tpu.memory_space<vmem>>, vector<1x8x1xf32>
    %628 = vector.shape_cast %627 : vector<1x8x1xf32> to vector<8x1xf32>
    %629 = vector.broadcast %628 : vector<8x1xf32> to vector<8x256xf32>
    %630 = arith.addf %626, %629 : vector<8x256xf32>
    %c0_399 = arith.constant 0 : index
    %c0_400 = arith.constant 0 : index
    %c0_401 = arith.constant 0 : index
    %631 = vector.load %arg4[%c0_399, %c0_400, %c0_401] : memref<1x8x256xf32, #tpu.memory_space<vmem>>, vector<1x8x256xf32>
    %632 = vector.shape_cast %631 : vector<1x8x256xf32> to vector<8x256xf32>
    %633 = vector.shape_cast %630 : vector<8x256xf32> to vector<1x8x256xf32>
    tpu.vector_store %arg4[%c0_399, %c0_400, %c0_401], %633 {strides = array<i32>} : memref<1x8x256xf32, #tpu.memory_space<vmem>>, vector<1x8x256xf32>,
    return
  }
  func.func @transform_0(%arg0: i32) -> (i32, i32, i32) {
    %c0_i32 = arith.constant 0 : i32
    %c0_i32_0 = arith.constant 0 : i32
    %c0_i32_1 = arith.constant 0 : i32
    return %arg0, %c0_i32, %c0_i32_0 : i32, i32, i32
  }
  func.func @transform_1(%arg0: i32) -> (i32, i32, i32, i32) {
    %c0_i32 = arith.constant 0 : i32
    %c0_i32_0 = arith.constant 0 : i32
    %c0_i32_1 = arith.constant 0 : i32
    %c0_i32_2 = arith.constant 0 : i32
    %c0_i32_3 = arith.constant 0 : i32
    return %c0_i32, %c0_i32_0, %c0_i32_1, %c0_i32_2 : i32, i32, i32, i32
  }
  func.func @transform_2(%arg0: i32) -> (i32, i32, i32) {
    %c0_i32 = arith.constant 0 : i32
    %c0_i32_0 = arith.constant 0 : i32
    %c0_i32_1 = arith.constant 0 : i32
    %c0_i32_2 = arith.constant 0 : i32
    return %c0_i32, %c0_i32_0, %c0_i32_1 : i32, i32, i32
  }
  func.func @transform_3(%arg0: i32) -> (i32, i32, i32) {
    %c0_i32 = arith.constant 0 : i32
    %c0_i32_0 = arith.constant 0 : i32
    %c0_i32_1 = arith.constant 0 : i32
    return %arg0, %c0_i32, %c0_i32_0 : i32, i32, i32
  }
}

</mosaic_0001>

<bundles_post_ra>
// kernel: transfer_forward.1
= control target key start
LH: loop header
LB: loop body
LE: loop exit
PB: predicated region body
PF: predicated region fallthrough
CT: control target
= control target key end

     0   :  { %s4629_s12 = smov 0   ;;  %s6049_s0 = inlined_call_operand.vmem [shape: f32[2,8,256], index: 0, kind: input, shape index: {}]   ;;  %s6050_s1 = inlined_call_operand.vmem [shape: bf16[7,5,8,40], index: 1, kind: input, shape index: {}]   ;;  %s6051_s2 = inlined_call_operand.vmem [shape: f32[7,8,1], index: 2, kind: input, shape index: {}]   ;;  %s6052_s3 = inlined_call_operand.vmem [shape: f32[2,8,256], index: 3, kind: output, shape index: {}]  }
   0x1   :  { %6134 = sst [smem:[#allocation3_spill]] %s6049_s0 }
   0x2 LB: > { %s3413_s13 = sadd.s32 4294967295, %s4543_s12   ;;  %p3417_p0 = scmp.ge.s32.totalorder %s4543_s12, 1  ;;  %s4543_s12 = sphi %s4629_s12, %s13_s12  }
   0x3   : > { %p137_p1 = scmp.lt.s32.totalorder %s4543_s12, 3 }
   0x5   : > { %p138_p2 = pnand %p3417_p0, %p137_p1 }
   0x6   : > { %v4557_v0 = vmov (!%p138_p2), 0.0   ;;  %s6115_s14 = smov (!%p138_p2), 18   ;;  %s6109_s15 = smov (!%p138_p2), 15   ;;  %v4565_v5 = vmov (!%p138_p2), 0   ;;  %v842_v7 = vld [vmem:[%s6051_s2] sm:$0xff] (!%p138_p2)  ;;  %v174_v8 = vlaneseq (!%p138_p2)  ;;  %vm6130_vm0 = vcmask (!%p138_p2), 146432  }
   0x7   : > { %141 = sbr.rel (%p138_p2) target bundleno = 2157 (0x86d), region = 32  ;;  %172 = vst [vmem:[#allocation2] sm:$0xff] (!%p138_p2), %v4557_v0  ;;  %173 = vst [vmem:[#allocation2 + $0x18] sm:$0xff] (!%p138_p2), %v4557_v0  ;;  %305 = vrot.lane.b32.xlu1 (!%p138_p2), %v4557_v0, %s6115_s14  ;;  %331 = vrot.lane.b32.xlu0 (!%p138_p2), %v4557_v0, %s6109_s15  ;;  %p161_p3 = scmp.lt.s32.totalorder (!%p138_p2), %s3413_s13, 1  ;;  %vm6126_vm3 = vcmask (!%p138_p2), 138240   ;;  %vm6125_vm6 = vcmask (!%p138_p2), 130048  }
   0x8   : > { %s6113_s16 = smov (!%p138_p2), 17   ;;  %s6135_s0 = sld [smem:[#allocation3_spill]] (!%p138_p2)  ;;  %419 = vmatprep.mubr.bf16.mxu0 (!%p138_p2), %v4565_v5  ;;  %469 = vmatprep.mubr.bf16.mxu1 (!%p138_p2), %v4565_v5  ;;  %v175_v10 = vand.u32 (!%p138_p2), 127, %v174_v8  ;;  %vm6127_vm7 = vcmask (!%p138_p2), 121856   ;;  %vm6057_vm13 = vcmask (!%p138_p2), 113664   ;;  %vm4583_vm14 = vmmov (!%p138_p2), 1  }
   0x9   : > { %s6111_s24 = smov (!%p138_p2), 16   ;;  %s6107_s25 = smov (!%p138_p2), 14   ;;  %4042 = vset.pattern.permute.xlu0 (!%p138_p2), %v4565_v5  ;;  %v3422_v8 = vld [vmem:[%s6050_s1 + $0x4] sm:$0xf] (!%p138_p2) }
   0xa   : > { %s6105_s26 = smov (!%p138_p2), 33   ;;  %s6103_s27 = smov (!%p138_p2), 34   ;;  %v176_v13 = vadd.s32 (!%p138_p2), 128, %v175_v10  ;;  %v4752_v17 = vand.u32 (!%p138_p2), 15, %v175_v10 }
   0xb   : > { %318 = vrot.lane.b32.xlu1 (!%p138_p2), %v4557_v0, %s6113_s16  ;;  %s6101_s28 = smov (!%p138_p2), 1   ;;  %s6099_s29 = smov (!%p138_p2), 2  }
   0xc   : > { %s6097_s30 = smov (!%p138_p2), 32   ;;  %s6095_s4 = smov (!%p138_p2), 31   ;;  %v4750_v16 = vand.u32 (!%p138_p2), 15, %v176_v13  ;;  %vm208_vm4 = vcmp.ge.s32.totalorder (!%p138_p2), %v4752_v17, 2  ;;  %vm230_vm5 = vcmp.ge.s32.totalorder (!%p138_p2), %v4752_v17, 1  ;;  %vm251_vm11 = vcmp.lt.s32.totalorder (!%p138_p2), %v4752_v17, 15 }
   0xd   : > { %s6093_s5 = smov (!%p138_p2), 30   ;;  %s6091_s6 = smov (!%p138_p2), 127   ;;  %vm4768_vm9 = vmpackc.low (!%p138_p2), %vm230_vm5, %vm208_vm4  ;;  %vm270_vm4 = vcmp.lt.s32.totalorder (!%p138_p2), %v4752_v17, 14  ;;  %vm380_vm5 = vcmask (!%p138_p2), 1043456  }
   0xe   : > { %s6349_s13 = smov (!%p161_p3, %s3413_s13), 1  ;;  %s6089_s7 = smov 126   ;;  %vm209_vm1 = vcmp.ge.s32.totalorder %v4750_v16, 2  ;;  %vm231_vm2 = vcmp.ge.s32.totalorder %v4750_v16, 1  ;;  %vm252_vm10 = vcmp.lt.s32.totalorder %v4750_v16, 15  ;;  %vm271_vm12 = vcmp.lt.s32.totalorder %v4750_v16, 14 }
   0xf   : > { %s3834_s17 = sshll.u32 %s6349_s13, 4  ;;  %357 = vrot.lane.b32.xlu1 %v4557_v0, %s6111_s24  ;;  %s6087_s8 = smov 113   ;;  %vm4760_vm8 = vmpackc.low %vm231_vm2, %vm209_vm1  ;;  %vm6055_vm2 = vcmask 269312  }
  0x10   : > { %s165_s20 = scalar_lea.vmem %s6135_s0, %s3834_s17  ;;  %s4651_s23 = scalar_lea.vmem %s6052_s3, %s3834_s17  ;;  %vm4783_vm15 = vmpackc.low %vm252_vm10, %vm4583_vm14  ;;  %vm6056_vm10 = vcmask 277504  }
  0x11   : > { %v4653_v1 = vld [vmem:[%s165_s20] sm:$0xff]  ;;  %v4655_v2 = vld [vmem:[%s165_s20 + $0x8] sm:$0xff]  ;;  %s6085_s9 = smov 114   ;;  %s6083_s10 = smov 97   ;;  %vm4789_vm1 = vmpackc.low %vm251_vm11, %vm4583_vm14  ;;  %vm376_vm11 = vcmask 326656   ;;  %vm6058_vm14 = vcmask 7168  }
  0x12   : > { %v4661_v3 = vpack.i.bf16 %v4655_v2, %v4653_v1  ;;  %v3942_v4 = vpack.i.bf16 %v4653_v1, %v4557_v0  ;;  %v3977_v6 = vpack.i.bf16 %v4557_v0, %v4655_v2  ;;  %s6081_s11 = smov 98   ;;  %s6079_s13 = smov 112  }
  0x13   : > { %s6053_s17 = smov 111   ;;  %s6077_s18 = smov 96  }
  0x14   : > { %3923 = vrot.lane.b32.xlu0 %v4661_v3, %s6115_s14  ;;  %3938 = vrot.lane.b32.xlu1 %v4661_v3, %s6111_s24  ;;  %s6073_s19 = smov 110   ;;  %s6075_s20 = smov 95  }
  0x15   : > { %s6071_s21 = smov 94  }
  0x18   : > { %3928 = vrot.lane.b32.xlu0 %v4661_v3, %s6113_s16  ;;  %348 = vrot.lane.b32.xlu1 %v4655_v2, %s6107_s25 }
  0x1c   : > { %3933 = vrot.lane.b32.xlu0 %v4661_v3, %s6109_s15  ;;  %3953 = vrot.lane.b32.xlu1 %v4661_v3, %s6105_s26 }
  0x20   : > { %3943 = vrot.lane.b32.xlu0 %v3942_v4, %s6107_s25  ;;  %236 = vrot.lane.b32.xlu1 %v4557_v0, %s6105_s26 }
  0x24   : > { %3948 = vrot.lane.b32.xlu0 %v4661_v3, %s6103_s27  ;;  %3963 = vrot.lane.b32.xlu1 %v4661_v3, %s6101_s28 }
  0x28   : > { %217 = vrot.lane.b32.xlu0 %v4557_v0, %s6103_s27  ;;  %491 = vrot.lane.b32.xlu1 %v4557_v0, %s6101_s28 }
  0x2c   : > { %3958 = vrot.lane.b32.xlu0 %v4661_v3, %s6099_s29  ;;  %3973 = vrot.lane.b32.xlu1 %v4661_v3, %s6097_s30 }
  0x30   : > { %478 = vrot.lane.b32.xlu0 %v4557_v0, %s6099_s29  ;;  %287 = vrot.lane.b32.xlu1 %v4557_v0, %s6097_s30 }
  0x34   : > { %3968 = vrot.lane.b32.xlu0 %v4661_v3, %s6095_s4  ;;  %3983 = vrot.lane.b32.xlu1 %v3942_v4, %s6093_s5 }
  0x38   : > { %255 = vrot.lane.b32.xlu0 %v4557_v0, %s6095_s4  ;;  %510 = vrot.lane.b32.xlu1 %v4653_v1, %s6091_s6 }
  0x3c   : > { %3978 = vrot.lane.b32.xlu0 %v3977_v6, %s6091_s6  ;;  %527 = vrot.lane.b32.xlu1 %v4557_v0, %s6089_s7 }
  0x40   : > { %278 = vrot.lane.b32.xlu0 %v4655_v2, %s6093_s5  ;;  %3998 = vrot.lane.b32.xlu1 %v3977_v6, %s6087_s8 }
  0x44   : > { %3988 = vrot.lane.b32.xlu0 %v4661_v3, %s6089_s7  ;;  %609 = vrot.lane.b32.xlu1 %v4653_v1, %s6087_s8 }
  0x48   : > { %3993 = vrot.lane.b32.xlu0 %v3977_v6, %s6085_s9  ;;  %4008 = vrot.lane.b32.xlu1 %v3977_v6, %s6083_s10 }
  0x4c   : > { %596 = vrot.lane.b32.xlu0 %v4653_v1, %s6085_s9  ;;  %732 = vrot.lane.b32.xlu1 %v4653_v1, %s6083_s10 }
  0x50   : > { %4003 = vrot.lane.b32.xlu0 %v3977_v6, %s6081_s11  ;;  %4018 = vrot.lane.b32.xlu1 %v3977_v6, %s6079_s13 }
  0x54   : > { %719 = vrot.lane.b32.xlu0 %v4653_v1, %s6081_s11  ;;  %648 = vrot.lane.b32.xlu1 %v4653_v1, %s6079_s13 }
  0x58   : > { %4013 = vrot.lane.b32.xlu0 %v3977_v6, %s6053_s17  ;;  %4028 = vrot.lane.b32.xlu1 %v3977_v6, %s6077_s18 }
  0x5c   : > { %622 = vrot.lane.b32.xlu0 %v4653_v1, %s6053_s17  ;;  %639 = vrot.lane.b32.xlu1 %v4557_v0, %s6073_s19  ;;  %s4939_s17 = smov 0  }
  0x60   : > { %4023 = vrot.lane.b32.xlu0 %v3977_v6, %s6075_s20  ;;  %771 = vrot.lane.b32.xlu1 %v4653_v1, %s6077_s18 }
  0x64   : > { %4033 = vrot.lane.b32.xlu0 %v4661_v3, %s6073_s19  ;;  %762 = vrot.lane.b32.xlu1 %v4557_v0, %s6071_s21 }
  0x68   : > { %745 = vrot.lane.b32.xlu0 %v4653_v1, %s6075_s20 }
  0x6c   : > { %4038 = vrot.lane.b32.xlu0 %v4661_v3, %s6071_s21 }
  0x70   : > { %845 = vperm.xlu0 %4042, %v842_v7  }
  0x79   : > { %v306_v9 = vpop.permute.xlu1 %305  ;;  %v332_v11 = vpop.permute.xlu0 %331 }
  0x7d   : > { %v319_v12 = vpop.permute.xlu1 %318 }
  0x81   : > { %v358_v14 = vpop.permute.xlu1 %357 }
  0x86   : > { %v3924_v15 = vpop.permute.xlu0 %3923  ;;  %v3939_v18 = vpop.permute.xlu1 %3938 }
  0x87   : > { %v3926_v19 = vunpack.i.h.bf16 %v3924_v15  ;;  %v3925_v20 = vunpack.i.l.bf16 %v3924_v15  ;;  %v3941_v22 = vunpack.i.h.bf16 %v3939_v18  ;;  %v3940_v25 = vunpack.i.l.bf16 %v3939_v18 }
  0x89   : > { %v313_v27 = vsel %vm6130_vm0, %v3925_v20, %v3926_v19  ;;  %v312_v30 = vsel %vm6130_vm0, %v306_v9, %v3925_v20  ;;  %v365_v36 = vsel %vm6125_vm6, %v3940_v25, %v3941_v22  ;;  %v364_v40 = vsel %vm6125_vm6, %v358_v14, %v3940_v25 }
  0x8a   : > { %v3929_v21 = vpop.permute.xlu0 %3928  ;;  %v349_v26 = vpop.permute.xlu1 %348 }
  0x8b   : > { %v3931_v23 = vunpack.i.h.bf16 %v3929_v21  ;;  %v3930_v24 = vunpack.i.l.bf16 %v3929_v21 }
  0x8d   : > { %v326_v28 = vsel %vm6126_vm3, %v3930_v24, %v3931_v23  ;;  %v325_v31 = vsel %vm6126_vm3, %v319_v12, %v3930_v24 }
  0x8e   : > { %v3934_v32 = vpop.permute.xlu0 %3933  ;;  %v3424_v33 = vpack.c.bf16 %v326_v28, %v313_v27  ;;  %v3427_v35 = vpack.c.bf16 %v325_v31, %v312_v30  ;;  %v3954_v39 = vpop.permute.xlu1 %3953 }
  0x8f   : > { %v3936_v37 = vunpack.i.h.bf16 %v3934_v32  ;;  %v3935_v38 = vunpack.i.l.bf16 %v3934_v32  ;;  %v3956_v46 = vunpack.i.h.bf16 %v3954_v39  ;;  %v3955_v47 = vunpack.i.l.bf16 %v3954_v39 }
  0x90   : > { %3425 = vmatprep.subr.msk.bf16.mxu0 %vm4760_vm8, %v3424_v33 }
  0x91   : > { %v338_v41 = vsel %vm6127_vm7, %v332_v11, %v3935_v38  ;;  %v339_v42 = vsel %vm6127_vm7, %v3935_v38, %v3936_v37  ;;  %3428 = vmatpush1.bf16.msk.msra.mxu0 %vm4768_vm9, %v3427_v35  ;;  %v244_v58 = vsel %vm6055_vm2, %v3955_v47, %v3956_v46 }
  0x92   : > { %v3430_v44 = vpack.c.bf16 %v339_v42, %v365_v36  ;;  %v3433_v45 = vpack.c.bf16 %v338_v41, %v364_v40  ;;  %v3944_v48 = vpop.permute.xlu0 %3943  ;;  %v237_v52 = vpop.permute.xlu1 %236 }
  0x93   : > { %v3946_v50 = vunpack.i.h.bf16 %v3944_v48  ;;  %v3945_v51 = vunpack.i.l.bf16 %v3944_v48  ;;  %v243_v0 = vsel %vm6055_vm2, %v237_v52, %v3955_v47  ;;  %vm6059_vm2 = vcmask 15360  }
  0x94   : > { %3431 = vmatprep.subr.msk.bf16.mxu0 %vm4783_vm15, %v3430_v44 }
  0x95   : > { %v352_v53 = vsel %vm6057_vm13, %v3946_v50, %v349_v26  ;;  %3434 = vmatpush1.bf16.msk.msra.mxu0 %vm4789_vm1, %v3433_v45  ;;  %v351_v54 = vsel %vm6057_vm13, %v3945_v51, %v3946_v50  ;;  %vm6062_vm13 = vcmask 252928  }
  0x96   : > { %v356_v55 = vsel %vm271_vm12, %v352_v53, 0.0  ;;  %v3949_v56 = vpop.permute.xlu0 %3948  ;;  %v355_v57 = vsel %vm270_vm4, %v351_v54, 0.0  ;;  %v3964_v63 = vpop.permute.xlu1 %3963 }
  0x97   : > { %v3951_v59 = vunpack.i.h.bf16 %v3949_v56  ;;  %v3950_v60 = vunpack.i.l.bf16 %v3949_v56  ;;  %v373_v61 = vpack.c.bf16 %v356_v55, %v356_v55  ;;  %v372_v62 = vpack.c.bf16 %v355_v57, %v355_v57 }
  0x98   : > { %v3966_v9 = vunpack.i.h.bf16 %v3964_v63  ;;  %v3965_v10 = vunpack.i.l.bf16 %v3964_v63 }
  0x99   : > { %3435 = vmatprep.subr.msk.bf16.mxu0 %vm380_vm5, %v373_v61  ;;  %v382_v3 = vsel %vm380_vm5, %v372_v62, 0  ;;  %v225_v4 = vsel %vm6056_vm10, %v3950_v60, %v3951_v59 }
  0x9a   : > { %v218_v6 = vpop.permute.xlu0 %217  ;;  %392 = vmatpush1.bf16.msra.mxu0 %v382_v3  ;;  %v3438_v7 = vpack.c.bf16 %v244_v58, %v225_v4  ;;  %v492_v13 = vpop.permute.xlu1 %491  ;;  %v499_v15 = vsel %vm6058_vm14, %v3965_v10, %v3966_v9 }
  0x9b   : > { %v224_v11 = vsel %vm6056_vm10, %v218_v6, %v3950_v60  ;;  %v498_v21 = vsel %vm6058_vm14, %v492_v13, %v3965_v10  ;;  %vm6066_vm10 = vcmask 261120   ;;  %vm6061_vm14 = vcmask 244736  }
  0x9c   : > { %v3441_v12 = vpack.c.bf16 %v243_v0, %v224_v11  ;;  %3439 = vmatprep.subr.msk.bf16.mxu1 %vm4760_vm8, %v3438_v7 }
  0x9d   : > { %3436 = vmatmul.mubr.msk.bf16.vlgmr.msra.gmra.mrb[0].mxu0 %vm376_vm11, %v3422_v8  ;;  %v304_v8 = vld [vmem:[%s6050_s1] sm:$0xf] }
  0x9e   : > { %v3959_v14 = vpop.permute.xlu0 %3958  ;;  %3442 = vmatpush1.bf16.msk.msra.mxu1 %vm4768_vm9, %v3441_v12  ;;  %585 = vmatprep.mubr.bf16.mxu0 %v4565_v5  ;;  %v3974_v20 = vpop.permute.xlu1 %3973 }
  0x9f   : > { %v3961_v18 = vunpack.i.h.bf16 %v3959_v14  ;;  %v3960_v19 = vunpack.i.l.bf16 %v3959_v14  ;;  %v3976_v25 = vunpack.i.h.bf16 %v3974_v20  ;;  %v3975_v26 = vunpack.i.l.bf16 %v3974_v20 }
  0xa1   : > { %v486_v22 = vsel %vm6059_vm2, %v3960_v19, %v3961_v18  ;;  %v295_v32 = vsel %vm6066_vm10, %v3975_v26, %v3976_v25 }
  0xa2   : > { %v479_v23 = vpop.permute.xlu0 %478  ;;  %v3453_v24 = vpack.c.bf16 %v499_v15, %v486_v22  ;;  %v288_v30 = vpop.permute.xlu1 %287 }
  0xa3   : > { %v485_v27 = vsel %vm6059_vm2, %v479_v23, %v3960_v19  ;;  %v294_v37 = vsel %vm6066_vm10, %v288_v30, %v3975_v26  ;;  %vm6060_vm2 = vcmask 1039360   ;;  %vm628_vm10 = vcmask 908288  }
  0xa4   : > { %v3456_v28 = vpack.c.bf16 %v498_v21, %v485_v27  ;;  %3454 = vmatprep.subr.msk.bf16.mxu0 %vm4760_vm8, %v3453_v24  ;;  %v3451_v27 = vld [vmem:[%s6050_s1 + $0x8] sm:$0xf] }
  0xa6   : > { %v3969_v31 = vpop.permute.xlu0 %3968  ;;  %3457 = vmatpush1.bf16.msk.msra.mxu0 %vm4768_vm9, %v3456_v28  ;;  %v3984_v36 = vpop.permute.xlu1 %3983 }
  0xa7   : > { %v3971_v33 = vunpack.i.h.bf16 %v3969_v31  ;;  %v3970_v35 = vunpack.i.l.bf16 %v3969_v31  ;;  %v3986_v38 = vunpack.i.h.bf16 %v3984_v36  ;;  %v3985_v39 = vunpack.i.l.bf16 %v3984_v36 }
  0xa9   : > { %v263_v40 = vsel %vm6062_vm13, %v3970_v35, %v3971_v33  ;;  %v281_v45 = vsel %vm6061_vm14, %v3985_v39, %v3986_v38 }
  0xaa   : > { %v256_v41 = vpop.permute.xlu0 %255  ;;  %v3444_v42 = vpack.c.bf16 %v263_v40, %v295_v32  ;;  %v511_v47 = vpop.permute.xlu1 %510  ;;  %v285_v50 = vsel %vm270_vm4, %v281_v45, 0.0 }
  0xab   : > { %v262_v44 = vsel %vm6062_vm13, %v256_v41, %v3970_v35  ;;  %v302_v56 = vpack.c.bf16 %v285_v50, %v285_v50  ;;  %vm6065_vm13 = vcmask 932864  }
  0xac   : > { %v3447_v46 = vpack.c.bf16 %v262_v44, %v294_v37  ;;  %3445 = vmatprep.subr.msk.bf16.mxu1 %vm4783_vm15, %v3444_v42 }
  0xad   : > { %v432_v0 = vsel %vm380_vm5, %v302_v56, 0 }
  0xae   : > { %v3979_v48 = vpop.permute.xlu0 %3978  ;;  %3448 = vmatpush1.bf16.msk.msra.mxu1 %vm4789_vm1, %v3447_v46  ;;  %v528_v53 = vpop.permute.xlu1 %527 }
  0xaf   : > { %v3981_v51 = vunpack.i.h.bf16 %v3979_v48  ;;  %v3980_v52 = vunpack.i.l.bf16 %v3979_v48 }
  0xb1   : > { %v517_v54 = vsel %vm6060_vm2, %v511_v47, %v3980_v52  ;;  %v518_v55 = vsel %vm6060_vm2, %v3980_v52, %v3981_v51  ;;  %vm6064_vm2 = vcmask 1031168  }
  0xb2   : > { %v3459_v57 = vpack.c.bf16 %v518_v55, %v4655_v2  ;;  %v3462_v58 = vpack.c.bf16 %v517_v54, %v4653_v1  ;;  %v279_v59 = vpop.permute.xlu0 %278  ;;  %v3999_v62 = vpop.permute.xlu1 %3998 }
  0xb3   : > { %v282_v60 = vsel %vm6061_vm14, %v3986_v38, %v279_v59  ;;  %v4001_v3 = vunpack.i.h.bf16 %v3999_v62  ;;  %v4000_v2 = vunpack.i.l.bf16 %v3999_v62  ;;  %vm6063_vm14 = vcmask 924672  }
  0xb4   : > { %v286_v61 = vsel %vm271_vm12, %v282_v60, 0.0  ;;  %3460 = vmatprep.subr.msk.bf16.mxu0 %vm4783_vm15, %v3459_v57 }
  0xb5   : > { %v303_v63 = vpack.c.bf16 %v286_v61, %v286_v61  ;;  %3463 = vmatpush1.bf16.msk.msra.mxu0 %vm4789_vm1, %v3462_v58  ;;  %v617_v12 = vsel %vm6063_vm14, %v4000_v2, %v4001_v3 }
  0xb6   : > { %v3989_v1 = vpop.permute.xlu0 %3988  ;;  %v610_v7 = vpop.permute.xlu1 %609 }
  0xb7   : > { %v3991_v4 = vunpack.i.h.bf16 %v3989_v1  ;;  %v3990_v6 = vunpack.i.l.bf16 %v3989_v1  ;;  %3449 = vmatprep.subr.msk.bf16.mxu1 %vm380_vm5, %v303_v63  ;;  %v616_v22 = vsel %vm6063_vm14, %v610_v7, %v4000_v2  ;;  %vm6068_vm14 = vcmask 793600  }
  0xb8   : > { %442 = vmatpush1.bf16.msra.mxu1 %v432_v0 }
  0xb9   : > { %v531_v9 = vsel %vm6064_vm2, %v3991_v4, %v528_v53  ;;  %v530_v10 = vsel %vm6064_vm2, %v3990_v6, %v3991_v4  ;;  %vm6067_vm2 = vcmask 801792  }
  0xba   : > { %v535_v11 = vsel %vm271_vm12, %v531_v9, 0.0  ;;  %v3994_v13 = vpop.permute.xlu0 %3993  ;;  %v534_v14 = vsel %vm270_vm4, %v530_v10, 0.0  ;;  %v4009_v21 = vpop.permute.xlu1 %4008 }
  0xbb   : > { %v3996_v15 = vunpack.i.h.bf16 %v3994_v13  ;;  %v3995_v18 = vunpack.i.l.bf16 %v3994_v13  ;;  %v541_v19 = vpack.c.bf16 %v535_v11, %v535_v11  ;;  %v540_v20 = vpack.c.bf16 %v534_v14, %v534_v14  ;;  %3450 = vmatmul.mubr.msk.bf16.vlgmr.msra.gmra.mrb[0].mxu1 %vm376_vm11, %v304_v8 }
  0xbc   : > { %708 = vmatprep.mubr.bf16.mxu1 %v4565_v5  ;;  %v4011_v28 = vunpack.i.h.bf16 %v4009_v21  ;;  %v4010_v30 = vunpack.i.l.bf16 %v4009_v21 }
  0xbd   : > { %3464 = vmatprep.subr.msk.bf16.mxu0 %vm380_vm5, %v541_v19  ;;  %v604_v23 = vsel %vm6065_vm13, %v3995_v18, %v3996_v15  ;;  %v548_v24 = vsel %vm380_vm5, %v540_v20, 0 }
  0xbe   : > { %v597_v25 = vpop.permute.xlu0 %596  ;;  %v3468_v26 = vpack.c.bf16 %v617_v12, %v604_v23  ;;  %558 = vmatpush1.bf16.msra.mxu0 %v548_v24  ;;  %v733_v33 = vpop.permute.xlu1 %732  ;;  %v740_v36 = vsel %vm6068_vm14, %v4010_v30, %v4011_v28 }
  0xbf   : > { %v603_v31 = vsel %vm6065_vm13, %v597_v25, %v3995_v18  ;;  %v739_v40 = vsel %vm6068_vm14, %v733_v33, %v4010_v30  ;;  %vm6069_vm13 = vcmask 916480   ;;  %vm751_vm14 = vcmask 777216  }
  0xc0   : > { %v3471_v32 = vpack.c.bf16 %v616_v22, %v603_v31  ;;  %3469 = vmatprep.subr.msk.bf16.mxu1 %vm4760_vm8, %v3468_v26 }
  0xc1   : > { %3465 = vmatmul.mubr.msk.bf16.vlgmr.msra.gmra.mrb[4].mxu0 %vm376_vm11, %v3451_v27  ;;  %v3466_v27 = vld [vmem:[%s6050_s1 + $0xc] sm:$0xf] }
  0xc2   : > { %v4004_v35 = vpop.permute.xlu0 %4003  ;;  %3472 = vmatpush1.bf16.msk.msra.mxu1 %vm4768_vm9, %v3471_v32  ;;  %831 = vmatprep.mubr.bf16.mxu0 %v4565_v5  ;;  %v4019_v39 = vpop.permute.xlu1 %4018 }
  0xc3   : > { %v4006_v37 = vunpack.i.h.bf16 %v4004_v35  ;;  %v4005_v38 = vunpack.i.l.bf16 %v4004_v35  ;;  %v4021_v45 = vunpack.i.h.bf16 %v4019_v39  ;;  %v4020_v46 = vunpack.i.l.bf16 %v4019_v39  ;;  %v3481_v39 = vld [vmem:[%s6050_s1 + $0x10] sm:$0xf] }
  0xc5   : > { %v727_v41 = vsel %vm6067_vm2, %v4005_v38, %v4006_v37  ;;  %v656_v52 = vsel %vm6069_vm13, %v4020_v46, %v4021_v45 }
  0xc6   : > { %v720_v42 = vpop.permute.xlu0 %719  ;;  %v3483_v44 = vpack.c.bf16 %v740_v36, %v727_v41  ;;  %v649_v50 = vpop.permute.xlu1 %648 }
  0xc7   : > { %v726_v47 = vsel %vm6067_vm2, %v720_v42, %v4005_v38  ;;  %v655_v56 = vsel %vm6069_vm13, %v649_v50, %v4020_v46  ;;  %vm6133_vm2 = vcmask 785408   ;;  %vm6070_vm13 = vcmask 900096  }
  0xc8   : > { %v3486_v48 = vpack.c.bf16 %v739_v40, %v726_v47  ;;  %3484 = vmatprep.subr.msk.bf16.mxu0 %vm4760_vm8, %v3483_v44 }
  0xca   : > { %v4014_v51 = vpop.permute.xlu0 %4013  ;;  %3487 = vmatpush1.bf16.msk.msra.mxu0 %vm4768_vm9, %v3486_v48  ;;  %v4029_v55 = vpop.permute.xlu1 %4028 }
  0xcb   : > { %v4016_v53 = vunpack.i.h.bf16 %v4014_v51  ;;  %v4015_v54 = vunpack.i.l.bf16 %v4014_v51  ;;  %v4031_v60 = vunpack.i.h.bf16 %v4029_v55  ;;  %v4030_v61 = vunpack.i.l.bf16 %v4029_v55 }
  0xcd   : > { %v630_v57 = vsel %vm628_vm10, %v4015_v54, %v4016_v53  ;;  %v779_v4 = vsel %vm6133_vm2, %v4030_v61, %v4031_v60 }
  0xce   : > { %v623_v58 = vpop.permute.xlu0 %622  ;;  %v3474_v59 = vpack.c.bf16 %v630_v57, %v656_v52  ;;  %v640_v0 = vpop.permute.xlu1 %639 }
  0xcf   : > { %v629_v62 = vsel %vm628_vm10, %v623_v58, %v4015_v54 }
  0xd0   : > { %v3477_v63 = vpack.c.bf16 %v629_v62, %v655_v56  ;;  %3475 = vmatprep.subr.msk.bf16.mxu1 %vm4783_vm15, %v3474_v59 }
  0xd2   : > { %v4024_v3 = vpop.permute.xlu0 %4023  ;;  %3478 = vmatpush1.bf16.msk.msra.mxu1 %vm4789_vm1, %v3477_v63  ;;  %v772_v11 = vpop.permute.xlu1 %771 }
  0xd3   : > { %v4026_v2 = vunpack.i.h.bf16 %v4024_v3  ;;  %v4025_v1 = vunpack.i.l.bf16 %v4024_v3  ;;  %v778_v19 = vsel %vm6133_vm2, %v772_v11, %v4030_v61 }
  0xd5   : > { %v753_v6 = vsel %vm751_vm14, %v4025_v1, %v4026_v2 }
  0xd6   : > { %v3489_v7 = vpack.c.bf16 %v753_v6, %v779_v4  ;;  %v4034_v8 = vpop.permute.xlu0 %4033  ;;  %v763_v26 = vpop.permute.xlu1 %762 }
  0xd7   : > { %v4036_v9 = vunpack.i.h.bf16 %v4034_v8  ;;  %v4035_v10 = vunpack.i.l.bf16 %v4034_v8 }
  0xd8   : > { %3490 = vmatprep.subr.msk.bf16.mxu0 %vm4783_vm15, %v3489_v7 }
  0xd9   : > { %v643_v12 = vsel %vm6070_vm13, %v4036_v9, %v640_v0  ;;  %v642_v13 = vsel %vm6070_vm13, %v4035_v10, %v4036_v9  ;;  %vm6132_vm13 = vcmask 769024  }
  0xda   : > { %v647_v14 = vsel %vm271_vm12, %v643_v12, 0.0  ;;  %v746_v15 = vpop.permute.xlu0 %745  ;;  %v646_v18 = vsel %vm270_vm4, %v642_v13, 0.0 }
  0xdb   : > { %v752_v20 = vsel %vm751_vm14, %v746_v15, %v4025_v1  ;;  %v664_v21 = vpack.c.bf16 %v647_v14, %v647_v14  ;;  %v663_v22 = vpack.c.bf16 %v646_v18, %v646_v18 }
  0xdc   : > { %v3492_v23 = vpack.c.bf16 %v752_v20, %v778_v19 }
  0xdd   : > { %3479 = vmatprep.subr.msk.bf16.mxu1 %vm380_vm5, %v664_v21  ;;  %v671_v24 = vsel %vm380_vm5, %v663_v22, 0 }
  0xde   : > { %v4039_v25 = vpop.permute.xlu0 %4038  ;;  %681 = vmatpush1.bf16.msra.mxu1 %v671_v24  ;;  %3493 = vmatpush1.bf16.msk.msra.mxu0 %vm4789_vm1, %v3492_v23 }
  0xdf   : > { %v4041_v28 = vunpack.i.h.bf16 %v4039_v25  ;;  %v4040_v30 = vunpack.i.l.bf16 %v4039_v25 }
  0xe1   : > { %v765_v31 = vsel %vm6132_vm13, %v4040_v30, %v4041_v28  ;;  %v766_v32 = vsel %vm6132_vm13, %v4041_v28, %v763_v26  ;;  %3480 = vmatmul.mubr.msk.bf16.vlgmr.msra.gmra.mrb[4].mxu1 %vm376_vm11, %v3466_v27 }
  0xe2   : > { %v770_v33 = vsel %vm271_vm12, %v766_v32, 0.0  ;;  %v769_v35 = vsel %vm270_vm4, %v765_v31, 0.0 }
  0xe3   : > { %v787_v36 = vpack.c.bf16 %v770_v33, %v770_v33  ;;  %v786_v37 = vpack.c.bf16 %v769_v35, %v769_v35 }
  0xe5   : > { %3494 = vmatprep.subr.msk.bf16.mxu0 %vm380_vm5, %v787_v36  ;;  %v794_v38 = vsel %vm380_vm5, %v786_v37, 0 }
  0xe6   : > { %804 = vmatpush1.bf16.msra.mxu0 %v794_v38 }
  0xe9   : > { %3495 = vmatmul.mubr.msk.bf16.vlgmr.msra.gmra.mrb[8].mxu0 %vm376_vm11, %v3481_v39 }
  0xef   : > { %v846_v3 = vpop.permute.xlu0 %845 }
 0x170   : > { %v421_v40 = vpop.f32.mrb[0].mxu0 }
 0x171   : > { %v423_v41 = vpop.f32.mrb[1].mxu0 }
 0x172   : > { %v425_v42 = vpop.f32.mrb[2].mxu0 }
 0x173   : > { %v426_v44 = vpop.f32.mrb[3].mxu0 }
 0x18e   : > { %v471_v45 = vpop.f32.mrb[0].mxu1 }
 0x18f   : > { %v472_v46 = vadd.f32 %v471_v45, %v421_v40  ;;  %v473_v47 = vpop.f32.mrb[1].mxu1 }
 0x190   : > { %v474_v48 = vadd.f32 %v473_v47, %v423_v41  ;;  %v475_v50 = vpop.f32.mrb[2].mxu1 }
 0x191   : > { %v476_v51 = vpop.f32.mrb[3].mxu1 }
 0x194   : > { %v587_v52 = vpop.f32.mrb[4].mxu0 }
 0x195   : > { %v594_v53 = vadd.f32 %v587_v52, %v472_v46  ;;  %v589_v54 = vpop.f32.mrb[5].mxu0 }
 0x196   : > { %v595_v55 = vadd.f32 %v589_v54, %v474_v48  ;;  %v591_v56 = vpop.f32.mrb[6].mxu0 }
 0x197   : > { %v592_v57 = vpop.f32.mrb[7].mxu0 }
 0x1b4   : > { %v710_v58 = vpop.f32.mrb[4].mxu1 }
 0x1b5   : > { %v717_v59 = vadd.f32 %v710_v58, %v594_v53  ;;  %v712_v60 = vpop.f32.mrb[5].mxu1 }
 0x1b6   : > { %v718_v61 = vadd.f32 %v712_v60, %v595_v55  ;;  %v714_v62 = vpop.f32.mrb[6].mxu1 }
 0x1b7   : > { %v715_v63 = vpop.f32.mrb[7].mxu1 }
 0x1bc   : > { %v833_v0 = vpop.f32.mrb[8].mxu0 }
 0x1bd   : > { %v840_v2 = vadd.f32 %v833_v0, %v717_v59  ;;  %v835_v1 = vpop.f32.mrb[9].mxu0 }
 0x1be   : > { %v841_v4 = vadd.f32 %v835_v1, %v718_v61  ;;  %v837_v6 = vpop.f32.mrb[10].mxu0 }
 0x1bf   : > { %v4925_v7 = vadd.f32 %v846_v3, %v840_v2  ;;  %v838_v8 = vpop.f32.mrb[11].mxu0 }
 0x1c0   : > { %v4927_v9 = vadd.f32 %v846_v3, %v841_v4 }
 0x1c1   : > { %v850_v10 = vmax.f32 %v4925_v7, 0.0  }
 0x1c2   : > { %v851_v11 = vmax.f32 %v4927_v9, 0.0  }
 0x1c3   : > { %v6145_v13 = vmov %v850_v10 }
 0x1c4   : > { %v6144_v12 = vmov %v851_v11 }
 0x1c5 LB: >> { %v4950_v14 = vld [vmem:[#allocation2] sm:$0xff]  ;;  %s4584_s22 = smov 18   ;;  %v4956_v15 = vpack.i.bf16 %v4547_v12, %v4551_v13  ;;  %s4585_s21 = smov 17   ;;  %v4591_v19 = vmov 0   ;;  %v5002_v20 = vld [vmem:[#allocation2 + $0x18] sm:$0xff]  ;;  %vm6146_vm0 = vcmask 146432   ;;  %s4555_s17 = sphi %s4939_s17, %s857_s17   ;;  %v4551_v13 = vphi %v6145_v13, %v6236_v13   ;;  %v4547_v12 = vphi %v6144_v12, %v6235_v12  }
 0x1c6   : >> { %938 = vrot.lane.b32.xlu1 %v4950_v14, %s4584_s22  ;;  %s4586_s19 = smov 16   ;;  %s4587_s20 = smov 15   ;;  %v4063_v18 = vpack.i.bf16 %v4551_v13, %v4950_v14  ;;  %1047 = vmatprep.mubr.bf16.mxu0 %v4591_v19  ;;  %v4098_v21 = vpack.i.bf16 %v5002_v20, %v4547_v12  ;;  %vm6147_vm3 = vcmask 138240   ;;  %vm6148_vm6 = vcmask 130048  }
 0x1c7   : >> { %4044 = vrot.lane.b32.xlu0 %v4956_v15, %s4584_s22  ;;  %s4588_s18 = smov 14   ;;  %s4589_s13 = smov 33   ;;  %1097 = vmatprep.mubr.bf16.mxu1 %v4591_v19  ;;  %vm6149_vm7 = vcmask 121856   ;;  %vm6180_vm2 = vcmask 785408   ;;  %vm6183_vm13 = vcmask 769024  }
 0x1c8   : >> { %s4590_s11 = smov 34   ;;  %4163 = vset.pattern.permute.xlu0 %v4591_v19  ;;  %s4592_s10 = smov 1  }
 0x1c9   : >> { %s4593_s9 = smov 2   ;;  %s4594_s8 = smov 32  }
 0x1ca   : >> { %950 = vrot.lane.b32.xlu1 %v4950_v14, %s4585_s21  ;;  %s4595_s7 = smov 31   ;;  %s4596_s6 = smov 30  }
 0x1cb   : >> { %4049 = vrot.lane.b32.xlu0 %v4956_v15, %s4585_s21  ;;  %s4597_s5 = smov 127   ;;  %s4598_s4 = smov 126  }
 0x1cc   : >> { %s4599_s30 = smov 113   ;;  %s4600_s29 = smov 114  }
 0x1cd   : >> { %s6121_s28 = smov 97   ;;  %s6123_s27 = smov 98  }
 0x1ce   : >> { %4059 = vrot.lane.b32.xlu1 %v4956_v15, %s4586_s19  ;;  %s6117_s26 = smov 112   ;;  %s6119_s25 = smov 111  }
 0x1cf   : >> { %4054 = vrot.lane.b32.xlu0 %v4956_v15, %s4587_s20  ;;  %s4605_s15 = smov 96   ;;  %s4606_s24 = smov 95  }
 0x1d0   : >> { %s6131_s16 = smov 110   ;;  %s6128_s14 = smov 94  }
 0x1d2   : >> { %986 = vrot.lane.b32.xlu1 %v4950_v14, %s4586_s19 }
 0x1d3   : >> { %962 = vrot.lane.b32.xlu0 %v4950_v14, %s4587_s20 }
 0x1d6   : >> { %978 = vrot.lane.b32.xlu1 %v4547_v12, %s4588_s18 }
 0x1d7   : >> { %4064 = vrot.lane.b32.xlu0 %v4063_v18, %s4588_s18 }
 0x1da   : >> { %4074 = vrot.lane.b32.xlu1 %v4956_v15, %s4589_s13 }
 0x1db   : >> { %4069 = vrot.lane.b32.xlu0 %v4956_v15, %s4590_s11 }
 0x1de   : >> { %882 = vrot.lane.b32.xlu1 %v4950_v14, %s4589_s13 }
 0x1df   : >> { %870 = vrot.lane.b32.xlu0 %v4950_v14, %s4590_s11 }
 0x1e2   : >> { %4084 = vrot.lane.b32.xlu1 %v4956_v15, %s4592_s10 }
 0x1e3   : >> { %4079 = vrot.lane.b32.xlu0 %v4956_v15, %s4593_s9 }
 0x1e6   : >> { %1118 = vrot.lane.b32.xlu1 %v4950_v14, %s4592_s10 }
 0x1e7   : >> { %1106 = vrot.lane.b32.xlu0 %v4950_v14, %s4593_s9 }
 0x1ea   : >> { %4094 = vrot.lane.b32.xlu1 %v4956_v15, %s4594_s8 }
 0x1eb   : >> { %4089 = vrot.lane.b32.xlu0 %v4956_v15, %s4595_s7 }
 0x1ee   : >> { %918 = vrot.lane.b32.xlu1 %v4950_v14, %s4594_s8 }
 0x1ef   : >> { %894 = vrot.lane.b32.xlu0 %v4950_v14, %s4595_s7 }
 0x1f2   : >> { %4104 = vrot.lane.b32.xlu1 %v4063_v18, %s4596_s6 }
 0x1f3   : >> { %4099 = vrot.lane.b32.xlu0 %v4098_v21, %s4597_s5 }
 0x1f6   : >> { %1136 = vrot.lane.b32.xlu1 %v4551_v13, %s4597_s5 }
 0x1f7   : >> { %910 = vrot.lane.b32.xlu0 %v4547_v12, %s4596_s6 }
 0x1fa   : >> { %1152 = vrot.lane.b32.xlu1 %v5002_v20, %s4598_s4 }
 0x1fb   : >> { %4109 = vrot.lane.b32.xlu0 %v4956_v15, %s4598_s4 }
 0x1fe   : >> { %4119 = vrot.lane.b32.xlu1 %v4098_v21, %s4599_s30 }
 0x1ff   : >> { %4114 = vrot.lane.b32.xlu0 %v4098_v21, %s4600_s29 }
 0x202   : >> { %1234 = vrot.lane.b32.xlu1 %v4551_v13, %s4599_s30 }
 0x203   : >> { %1222 = vrot.lane.b32.xlu0 %v4551_v13, %s4600_s29 }
 0x206   : >> { %4129 = vrot.lane.b32.xlu1 %v4098_v21, %s6121_s28 }
 0x207   : >> { %4124 = vrot.lane.b32.xlu0 %v4098_v21, %s6123_s27 }
 0x20a   : >> { %1354 = vrot.lane.b32.xlu1 %v4551_v13, %s6121_s28  ;;  %s6186_s28 = smov 111  }
 0x20b   : >> { %1342 = vrot.lane.b32.xlu0 %v4551_v13, %s6123_s27 }
 0x20e   : >> { %4139 = vrot.lane.b32.xlu1 %v4098_v21, %s6117_s26 }
 0x20f   : >> { %4134 = vrot.lane.b32.xlu0 %v4098_v21, %s6119_s25 }
 0x212   : >> { %1270 = vrot.lane.b32.xlu1 %v4551_v13, %s6117_s26  ;;  %s3836_s26 = sshll.u32 %s4555_s17, 4 }
 0x213   : >> { %1246 = vrot.lane.b32.xlu0 %v4551_v13, %s6119_s25  ;;  %s5052_s27 = scalar_lea.vmem %s6051_s2, %s3836_s26  ;;  %s3497_s25 = smul.u32 40, %s4555_s17 }
 0x214   : >> { %v3587_v22 = vld [vmem:[%s5052_s27 + $0x8] sm:$0xff]  ;;  %s6185_s26 = smov 97   ;;  %s857_s17 = sadd.s32 1, %s4555_s17  }
 0x215   : >> { %p854_p4 = scmp.ge.s32.totalorder %s857_s17, 2  }
 0x216   : >> { %4149 = vrot.lane.b32.xlu1 %v4098_v21, %s4605_s15  ;;  %s6255_s17 = smov (%p854_p4), 112   ;;  %v3801_v43 = vld [vmem:[%s6050_s1 + $0x84] sm:$0xf] (%p854_p4)  ;;  %v3816_v17 = vld [vmem:[%s6050_s1 + $0x88] sm:$0xf] (%p854_p4) }
 0x217   : >> { %4144 = vrot.lane.b32.xlu0 %v4098_v21, %s4606_s24 }
 0x21a   : >> { %1262 = vrot.lane.b32.xlu1 %v5002_v20, %s6131_s16 }
 0x21b   : >> { %4154 = vrot.lane.b32.xlu0 %v4956_v15, %s6131_s16 }
 0x21e   : >> { %1390 = vrot.lane.b32.xlu1 %v4551_v13, %s4605_s15 }
 0x21f   : >> { %1366 = vrot.lane.b32.xlu0 %v4551_v13, %s4606_s24 }
 0x222   : >> { %1382 = vrot.lane.b32.xlu1 %v5002_v20, %s6128_s14 }
 0x223   : >> { %4159 = vrot.lane.b32.xlu0 %v4956_v15, %s6128_s14  ;;  %s5108_s14 = scalar_lea.vmem %s6050_s1, %s3497_s25  ;;  %s6184_s25 = smov 98  }
 0x226   : >> { %1563 = vrot.lane.b32.xlu1 %v4950_v14, %s4585_s21 }
 0x227   : >> { %1467 = vperm.xlu0 %4163, %v3587_v22  }
 0x22a   : >> { %1599 = vrot.lane.b32.xlu1 %v4950_v14, %s4586_s19 }
 0x22b   : >> { %1551 = vrot.lane.b32.xlu0 %v4950_v14, %s4584_s22 }
 0x22e   : >> { %1495 = vrot.lane.b32.xlu1 %v4950_v14, %s4589_s13 }
 0x22f   : >> { %1575 = vrot.lane.b32.xlu0 %v4950_v14, %s4587_s20 }
 0x232   : >> { %1731 = vrot.lane.b32.xlu1 %v4950_v14, %s4592_s10 }
 0x233   : >> { %1483 = vrot.lane.b32.xlu0 %v4950_v14, %s4590_s11 }
 0x236   : >> { %1531 = vrot.lane.b32.xlu1 %v4950_v14, %s4594_s8 }
 0x237   : >> { %1719 = vrot.lane.b32.xlu0 %v4950_v14, %s4593_s9 }
 0x238   : >> { %v939_v23 = vpop.permute.xlu1 %938 }
 0x239   : >> { %v4045_v24 = vpop.permute.xlu0 %4044 }
 0x23a   : >> { %1765 = vrot.lane.b32.xlu1 %v5002_v20, %s4598_s4  ;;  %v4047_v26 = vunpack.i.h.bf16 %v4045_v24  ;;  %v4046_v27 = vunpack.i.l.bf16 %v4045_v24 }
 0x23b   : >> { %1507 = vrot.lane.b32.xlu0 %v4950_v14, %s4595_s7 }
 0x23c   : >> { %v951_v25 = vpop.permute.xlu1 %950  ;;  %v945_v36 = vsel %vm6146_vm0, %v4046_v27, %v4047_v26  ;;  %v944_v38 = vsel %vm6146_vm0, %v939_v23, %v4046_v27  ;;  %v3502_v26 = vld [vmem:[%s5108_s14 + $0x18] sm:$0xf] }
 0x23d   : >> { %v4050_v28 = vpop.permute.xlu0 %4049 }
 0x23e   : >> { %1875 = vrot.lane.b32.xlu1 %v5002_v20, %s6131_s16  ;;  %v4052_v31 = vunpack.i.h.bf16 %v4050_v28  ;;  %v4051_v32 = vunpack.i.l.bf16 %v4050_v28  ;;  %s6187_s16 = smov 112  }
 0x240   : >> { %v4060_v30 = vpop.permute.xlu1 %4059  ;;  %v957_v37 = vsel %vm6147_vm3, %v4051_v32, %v4052_v31  ;;  %v956_v39 = vsel %vm6147_vm3, %v951_v25, %v4051_v32 }
 0x241   : >> { %v4062_v33 = vunpack.i.h.bf16 %v4060_v30  ;;  %v4061_v35 = vunpack.i.l.bf16 %v4060_v30  ;;  %v4055_v40 = vpop.permute.xlu0 %4054  ;;  %v3504_v41 = vpack.c.bf16 %v957_v37, %v945_v36  ;;  %v3507_v42 = vpack.c.bf16 %v956_v39, %v944_v38 }
 0x242   : >> { %v4057_v46 = vunpack.i.h.bf16 %v4055_v40  ;;  %v4056_v47 = vunpack.i.l.bf16 %v4055_v40 }
 0x243   : >> { %v993_v44 = vsel %vm6148_vm6, %v4061_v35, %v4062_v33  ;;  %3505 = vmatprep.subr.msk.bf16.mxu0 %vm4760_vm8, %v3504_v41 }
 0x244   : >> { %v987_v45 = vpop.permute.xlu1 %986  ;;  %v969_v50 = vsel %vm6149_vm7, %v4056_v47, %v4057_v46  ;;  %3508 = vmatpush1.bf16.msk.msra.mxu0 %vm4768_vm9, %v3507_v42 }
 0x245   : >> { %v992_v48 = vsel %vm6148_vm6, %v987_v45, %v4061_v35  ;;  %v963_v51 = vpop.permute.xlu0 %962  ;;  %v3510_v52 = vpack.c.bf16 %v969_v50, %v993_v44  ;;  %vm6150_vm6 = vcmask 113664  }
 0x246   : >> { %v968_v54 = vsel %vm6149_vm7, %v963_v51, %v4056_v47  ;;  %vm6151_vm3 = vmmov %vm6150_vm6  ;;  %vm6152_vm7 = vcmask 269312  }
 0x247   : >> { %v3513_v55 = vpack.c.bf16 %v968_v54, %v992_v48  ;;  %3511 = vmatprep.subr.msk.bf16.mxu0 %vm4783_vm15, %v3510_v52 }
 0x248   : >> { %v979_v53 = vpop.permute.xlu1 %978 }
 0x249   : >> { %v4065_v56 = vpop.permute.xlu0 %4064  ;;  %3514 = vmatpush1.bf16.msk.msra.mxu0 %vm4789_vm1, %v3513_v55 }
 0x24a   : >> { %v4067_v58 = vunpack.i.h.bf16 %v4065_v56  ;;  %v4066_v59 = vunpack.i.l.bf16 %v4065_v56 }
 0x24c   : >> { %v4075_v57 = vpop.permute.xlu1 %4074  ;;  %v981_v62 = vsel %vm6150_vm6, %v4067_v58, %v979_v53  ;;  %v980_v63 = vsel %vm6151_vm3, %v4066_v59, %v4067_v58  ;;  %vm6153_vm3 = vmmov %vm6152_vm7  ;;  %vm6154_vm6 = vcmask 277504  }
 0x24d   : >> { %v4077_v60 = vunpack.i.h.bf16 %v4075_v57  ;;  %v4076_v61 = vunpack.i.l.bf16 %v4075_v57  ;;  %v985_v0 = vsel %vm271_vm12, %v981_v62, 0.0  ;;  %v4070_v3 = vpop.permute.xlu0 %4069  ;;  %v984_v2 = vsel %vm270_vm4, %v980_v63, 0.0 }
 0x24e   : >> { %v4072_v6 = vunpack.i.h.bf16 %v4070_v3  ;;  %v4071_v8 = vunpack.i.l.bf16 %v4070_v3  ;;  %v1001_v15 = vpack.c.bf16 %v985_v0, %v985_v0  ;;  %v1000_v18 = vpack.c.bf16 %v984_v2, %v984_v2 }
 0x24f   : >> { %v889_v1 = vsel %vm6152_vm7, %v4076_v61, %v4077_v60  ;;  %vm6155_vm7 = vmmov %vm6154_vm6 }
 0x250   : >> { %v883_v4 = vpop.permute.xlu1 %882  ;;  %3515 = vmatprep.subr.msk.bf16.mxu0 %vm380_vm5, %v1001_v15  ;;  %v1010_v22 = vsel %vm380_vm5, %v1000_v18, 0  ;;  %v877_v23 = vsel %vm6154_vm6, %v4071_v8, %v4072_v6 }
 0x251   : >> { %v888_v21 = vsel %vm6153_vm3, %v883_v4, %v4076_v61  ;;  %v871_v24 = vpop.permute.xlu0 %870  ;;  %1020 = vmatpush1.bf16.msra.mxu0 %v1010_v22  ;;  %v3518_v25 = vpack.c.bf16 %v889_v1, %v877_v23  ;;  %vm6156_vm3 = vcmask 7168  }
 0x252   : >> { %v876_v28 = vsel %vm6155_vm7, %v871_v24, %v4071_v8  ;;  %vm6157_vm6 = vmmov %vm6156_vm3  ;;  %vm6158_vm7 = vcmask 15360  }
 0x253   : >> { %3519 = vmatprep.subr.msk.bf16.mxu1 %vm4760_vm8, %v3518_v25  ;;  %v3521_v32 = vpack.c.bf16 %v888_v21, %v876_v28  ;;  %vm6159_vm0 = vmmov %vm6158_vm7 }
 0x254   : >> { %v4085_v27 = vpop.permute.xlu1 %4084  ;;  %3516 = vmatmul.mubr.msk.bf16.vlgmr.msra.gmra.mrb[0].mxu0 %vm376_vm11, %v3502_v26 }
 0x255   : >> { %v4087_v30 = vunpack.i.h.bf16 %v4085_v27  ;;  %v4086_v31 = vunpack.i.l.bf16 %v4085_v27  ;;  %v4080_v33 = vpop.permute.xlu0 %4079  ;;  %3522 = vmatpush1.bf16.msk.msra.mxu1 %vm4768_vm9, %v3521_v32  ;;  %1211 = vmatprep.mubr.bf16.mxu0 %v4591_v19 }
 0x256   : >> { %v4082_v37 = vunpack.i.h.bf16 %v4080_v33  ;;  %v4081_v38 = vunpack.i.l.bf16 %v4080_v33 }
 0x257   : >> { %v1125_v35 = vsel %vm6156_vm3, %v4086_v31, %v4087_v30  ;;  %vm6160_vm3 = vcmask 261120  }
 0x258   : >> { %v1119_v36 = vpop.permute.xlu1 %1118  ;;  %v1113_v40 = vsel %vm6158_vm7, %v4081_v38, %v4082_v37  ;;  %vm6162_vm7 = vcmask 252928   ;;  %v3498_v37 = vld [vmem:[%s5108_s14 + $0x14] sm:$0xf] }
 0x259   : >> { %v1124_v39 = vsel %vm6157_vm6, %v1119_v36, %v4086_v31  ;;  %v1107_v41 = vpop.permute.xlu0 %1106  ;;  %v3536_v42 = vpack.c.bf16 %v1125_v35, %v1113_v40  ;;  %vm6161_vm6 = vmmov %vm6160_vm3 }
 0x25a   : >> { %v1112_v45 = vsel %vm6159_vm0, %v1107_v41, %v4081_v38  ;;  %vm6163_vm0 = vmmov %vm6162_vm7 }
 0x25b   : >> { %v3539_v48 = vpack.c.bf16 %v1124_v39, %v1112_v45  ;;  %3537 = vmatprep.subr.msk.bf16.mxu0 %vm4760_vm8, %v3536_v42 }
 0x25c   : >> { %v4095_v44 = vpop.permute.xlu1 %4094 }
 0x25d   : >> { %v4097_v46 = vunpack.i.h.bf16 %v4095_v44  ;;  %v4096_v47 = vunpack.i.l.bf16 %v4095_v44  ;;  %v4090_v50 = vpop.permute.xlu0 %4089  ;;  %3540 = vmatpush1.bf16.msk.msra.mxu0 %vm4768_vm9, %v3539_v48 }
 0x25e   : >> { %v4092_v53 = vunpack.i.h.bf16 %v4090_v50  ;;  %v4091_v54 = vunpack.i.l.bf16 %v4090_v50 }
 0x25f   : >> { %v925_v51 = vsel %vm6160_vm3, %v4096_v47, %v4097_v46  ;;  %vm6164_vm3 = vcmask 244736  }
 0x260   : >> { %v919_v52 = vpop.permute.xlu1 %918  ;;  %v901_v56 = vsel %vm6162_vm7, %v4091_v54, %v4092_v53 }
 0x261   : >> { %v924_v55 = vsel %vm6161_vm6, %v919_v52, %v4096_v47  ;;  %v895_v57 = vpop.permute.xlu0 %894  ;;  %v3524_v58 = vpack.c.bf16 %v901_v56, %v925_v51  ;;  %vm6165_vm6 = vcmask 1039360   ;;  %v3534_v56 = vld [vmem:[%s5108_s14 + $0x1c] sm:$0xf] }
 0x262   : >> { %v900_v60 = vsel %vm6163_vm0, %v895_v57, %v4091_v54  ;;  %vm6166_vm7 = vmmov %vm6165_vm6 }
 0x263   : >> { %v3527_v63 = vpack.c.bf16 %v900_v60, %v924_v55  ;;  %3525 = vmatprep.subr.msk.bf16.mxu1 %vm4783_vm15, %v3524_v58  ;;  %vm6167_vm0 = vmmov %vm6164_vm3 }
 0x264   : >> { %v4105_v59 = vpop.permute.xlu1 %4104 }
 0x265   : >> { %v4107_v61 = vunpack.i.h.bf16 %v4105_v59  ;;  %v4106_v62 = vunpack.i.l.bf16 %v4105_v59  ;;  %v4100_v0 = vpop.permute.xlu0 %4099  ;;  %3528 = vmatpush1.bf16.msk.msra.mxu1 %vm4789_vm1, %v3527_v63 }
 0x266   : >> { %v4102_v1 = vunpack.i.h.bf16 %v4100_v0  ;;  %v4101_v4 = vunpack.i.l.bf16 %v4100_v0 }
 0x267   : >> { %v912_v3 = vsel %vm6164_vm3, %v4106_v62, %v4107_v61  ;;  %vm6168_vm3 = vcmask 1031168  }
 0x268   : >> { %v1137_v2 = vpop.permute.xlu1 %1136  ;;  %v916_v6 = vsel %vm270_vm4, %v912_v3, 0.0  ;;  %v1143_v15 = vsel %vm6166_vm7, %v4101_v4, %v4102_v1  ;;  %vm6170_vm7 = vcmask 924672  }
 0x269   : >> { %v1142_v8 = vsel %vm6165_vm6, %v1137_v2, %v4101_v4  ;;  %v932_v18 = vpack.c.bf16 %v916_v6, %v916_v6  ;;  %v911_v22 = vpop.permute.xlu0 %910  ;;  %v3542_v23 = vpack.c.bf16 %v1143_v15, %v4547_v12  ;;  %vm6169_vm6 = vmmov %vm6168_vm3 }
 0x26a   : >> { %v3545_v21 = vpack.c.bf16 %v1142_v8, %v4551_v13  ;;  %v913_v25 = vsel %vm6167_vm0, %v4107_v61, %v911_v22  ;;  %vm6171_vm0 = vmmov %vm6170_vm7 }
 0x26b   : >> { %v917_v26 = vsel %vm271_vm12, %v913_v25, 0.0  ;;  %3543 = vmatprep.subr.msk.bf16.mxu0 %vm4783_vm15, %v3542_v23  ;;  %v1060_v28 = vsel %vm380_vm5, %v932_v18, 0 }
 0x26c   : >> { %v1153_v24 = vpop.permute.xlu1 %1152  ;;  %v933_v27 = vpack.c.bf16 %v917_v26, %v917_v26  ;;  %3546 = vmatpush1.bf16.msk.msra.mxu0 %vm4789_vm1, %v3545_v21 }
 0x26d   : >> { %v4110_v30 = vpop.permute.xlu0 %4109 }
 0x26e   : >> { %v4112_v32 = vunpack.i.h.bf16 %v4110_v30  ;;  %v4111_v33 = vunpack.i.l.bf16 %v4110_v30  ;;  %3529 = vmatprep.subr.msk.bf16.mxu1 %vm380_vm5, %v933_v27 }
 0x26f   : >> { %1070 = vmatpush1.bf16.msra.mxu1 %v1060_v28 }
 0x270   : >> { %v4120_v31 = vpop.permute.xlu1 %4119  ;;  %v1155_v38 = vsel %vm6168_vm3, %v4112_v32, %v1153_v24  ;;  %v1154_v39 = vsel %vm6169_vm6, %v4111_v33, %v4112_v32  ;;  %vm6172_vm3 = vcmask 932864  }
 0x271   : >> { %v4122_v35 = vunpack.i.h.bf16 %v4120_v31  ;;  %v4121_v36 = vunpack.i.l.bf16 %v4120_v31  ;;  %v1159_v41 = vsel %vm271_vm12, %v1155_v38, 0.0  ;;  %v1158_v42 = vsel %vm270_vm4, %v1154_v39, 0.0  ;;  %v4115_v44 = vpop.permute.xlu0 %4114  ;;  %vm6173_vm6 = vmmov %vm6172_vm3 }
 0x272   : >> { %v4117_v46 = vunpack.i.h.bf16 %v4115_v44  ;;  %v4116_v47 = vunpack.i.l.bf16 %v4115_v44  ;;  %v1165_v48 = vpack.c.bf16 %v1159_v41, %v1159_v41  ;;  %v1164_v50 = vpack.c.bf16 %v1158_v42, %v1158_v42  ;;  %3530 = vmatmul.mubr.msk.bf16.vlgmr.msra.gmra.mrb[0].mxu1 %vm376_vm11, %v3498_v37 }
 0x273   : >> { %v1241_v40 = vsel %vm6170_vm7, %v4121_v36, %v4122_v35  ;;  %1331 = vmatprep.mubr.bf16.mxu1 %v4591_v19  ;;  %vm6174_vm7 = vcmask 793600  }
 0x274   : >> { %v1235_v45 = vpop.permute.xlu1 %1234  ;;  %v1229_v52 = vsel %vm6172_vm3, %v4116_v47, %v4117_v46  ;;  %3547 = vmatprep.subr.msk.bf16.mxu0 %vm380_vm5, %v1165_v48  ;;  %v1174_v53 = vsel %vm380_vm5, %v1164_v50, 0  ;;  %vm6176_vm3 = vcmask 801792  }
 0x275   : >> { %v1240_v51 = vsel %vm6171_vm0, %v1235_v45, %v4121_v36  ;;  %v1223_v54 = vpop.permute.xlu0 %1222  ;;  %1184 = vmatpush1.bf16.msra.mxu0 %v1174_v53  ;;  %v3554_v55 = vpack.c.bf16 %v1241_v40, %v1229_v52  ;;  %vm6175_vm0 = vmmov %vm6174_vm7 }
 0x276   : >> { %v1228_v58 = vsel %vm6173_vm6, %v1223_v54, %v4116_v47  ;;  %vm6177_vm6 = vmmov %vm6176_vm3 }
 0x277   : >> { %v3557_v61 = vpack.c.bf16 %v1240_v51, %v1228_v58  ;;  %3555 = vmatprep.subr.msk.bf16.mxu1 %vm4760_vm8, %v3554_v55 }
 0x278   : >> { %v4130_v57 = vpop.permute.xlu1 %4129  ;;  %3548 = vmatmul.mubr.msk.bf16.vlgmr.msra.gmra.mrb[4].mxu0 %vm376_vm11, %v3534_v56 }
 0x279   : >> { %v4132_v59 = vunpack.i.h.bf16 %v4130_v57  ;;  %v4131_v60 = vunpack.i.l.bf16 %v4130_v57  ;;  %v4125_v62 = vpop.permute.xlu0 %4124  ;;  %3558 = vmatpush1.bf16.msk.msra.mxu1 %vm4768_vm9, %v3557_v61  ;;  %1451 = vmatprep.mubr.bf16.mxu0 %v4591_v19 }
 0x27a   : >> { %v4127_v3 = vunpack.i.h.bf16 %v4125_v62  ;;  %v4126_v2 = vunpack.i.l.bf16 %v4125_v62 }
 0x27b   : >> { %v1361_v63 = vsel %vm6174_vm7, %v4131_v60, %v4132_v59  ;;  %vm6178_vm7 = vcmask 916480  }
 0x27c   : >> { %v1355_v0 = vpop.permute.xlu1 %1354  ;;  %v1349_v4 = vsel %vm6176_vm3, %v4126_v2, %v4127_v3  ;;  %vm6181_vm3 = vcmask 900096  }
 0x27d   : >> { %v1360_v1 = vsel %vm6175_vm0, %v1355_v0, %v4131_v60  ;;  %v1343_v6 = vpop.permute.xlu0 %1342  ;;  %v3572_v8 = vpack.c.bf16 %v1361_v63, %v1349_v4  ;;  %vm6179_vm0 = vmmov %vm6178_vm7 }
 0x27e   : >> { %v1348_v18 = vsel %vm6177_vm6, %v1343_v6, %v4126_v2  ;;  %vm6182_vm6 = vmmov %vm6181_vm3  ;;  %v3552_v2 = vld [vmem:[%s5108_s14 + $0x20] sm:$0xf] }
 0x27f   : >> { %v3575_v23 = vpack.c.bf16 %v1360_v1, %v1348_v18  ;;  %3573 = vmatprep.subr.msk.bf16.mxu0 %vm4760_vm8, %v3572_v8 }
 0x280   : >> { %v4140_v15 = vpop.permute.xlu1 %4139 }
 0x281   : >> { %v4142_v21 = vunpack.i.h.bf16 %v4140_v15  ;;  %v4141_v22 = vunpack.i.l.bf16 %v4140_v15  ;;  %v4135_v24 = vpop.permute.xlu0 %4134  ;;  %3576 = vmatpush1.bf16.msk.msra.mxu0 %vm4768_vm9, %v3575_v23 }
 0x282   : >> { %v4137_v27 = vunpack.i.h.bf16 %v4135_v24  ;;  %v4136_v28 = vunpack.i.l.bf16 %v4135_v24  ;;  %v3570_v24 = vld [vmem:[%s5108_s14 + $0x24] sm:$0xf] }
 0x283   : >> { %v1277_v25 = vsel %vm6178_vm7, %v4141_v22, %v4142_v21  ;;  %vm6190_vm7 = vcmask 113664  }
 0x284   : >> { %v1271_v26 = vpop.permute.xlu1 %1270  ;;  %v1253_v31 = vsel %vm628_vm10, %v4136_v28, %v4137_v27 }
 0x285   : >> { %v1276_v30 = vsel %vm6179_vm0, %v1271_v26, %v4141_v22  ;;  %v1247_v32 = vpop.permute.xlu0 %1246  ;;  %v3560_v33 = vpack.c.bf16 %v1253_v31, %v1277_v25  ;;  %vm6191_vm0 = vcmask 146432  }
 0x286   : >> { %v1252_v36 = vsel %vm628_vm10, %v1247_v32, %v4136_v28 }
 0x287   : >> { %v3563_v39 = vpack.c.bf16 %v1252_v36, %v1276_v30  ;;  %3561 = vmatprep.subr.msk.bf16.mxu1 %vm4783_vm15, %v3560_v33 }
 0x288   : >> { %v4150_v35 = vpop.permute.xlu1 %4149 }
 0x289   : >> { %v4152_v37 = vunpack.i.h.bf16 %v4150_v35  ;;  %v4151_v38 = vunpack.i.l.bf16 %v4150_v35  ;;  %v4145_v40 = vpop.permute.xlu0 %4144  ;;  %3564 = vmatpush1.bf16.msk.msra.mxu1 %vm4789_vm1, %v3563_v39 }
 0x28a   : >> { %v4147_v44 = vunpack.i.h.bf16 %v4145_v40  ;;  %v4146_v45 = vunpack.i.l.bf16 %v4145_v40 }
 0x28b   : >> { %v1397_v41 = vsel %vm6180_vm2, %v4151_v38, %v4152_v37 }
 0x28c   : >> { %v1263_v42 = vpop.permute.xlu1 %1262  ;;  %v1373_v46 = vsel %vm751_vm14, %v4146_v45, %v4147_v44 }
 0x28d   : >> { %v4155_v47 = vpop.permute.xlu0 %4154  ;;  %v3578_v48 = vpack.c.bf16 %v1373_v46, %v1397_v41 }
 0x28e   : >> { %v4157_v50 = vunpack.i.h.bf16 %v4155_v47  ;;  %v4156_v51 = vunpack.i.l.bf16 %v4155_v47 }
 0x28f   : >> { %3579 = vmatprep.subr.msk.bf16.mxu0 %vm4783_vm15, %v3578_v48 }
 0x290   : >> { %v1391_v52 = vpop.permute.xlu1 %1390  ;;  %v1265_v53 = vsel %vm6181_vm3, %v4157_v50, %v1263_v42  ;;  %v1264_v54 = vsel %vm6182_vm6, %v4156_v51, %v4157_v50  ;;  %vm6192_vm3 = vmmov %vm6191_vm0  ;;  %vm6193_vm6 = vcmask 138240  }
 0x291   : >> { %v1269_v55 = vsel %vm271_vm12, %v1265_v53, 0.0  ;;  %v1268_v56 = vsel %vm270_vm4, %v1264_v54, 0.0  ;;  %v1367_v57 = vpop.permute.xlu0 %1366  ;;  %v1396_v58 = vsel %vm6180_vm2, %v1391_v52, %v4151_v38 }
 0x292   : >> { %v1372_v59 = vsel %vm751_vm14, %v1367_v57, %v4146_v45  ;;  %v1285_v60 = vpack.c.bf16 %v1269_v55, %v1269_v55  ;;  %v1284_v61 = vpack.c.bf16 %v1268_v56, %v1268_v56 }
 0x293   : >> { %v3581_v62 = vpack.c.bf16 %v1372_v59, %v1396_v58 }
 0x294   : >> { %3565 = vmatprep.subr.msk.bf16.mxu1 %vm380_vm5, %v1285_v60  ;;  %v1294_v63 = vsel %vm380_vm5, %v1284_v61, 0  ;;  %v1383_v3 = vpop.permute.xlu1 %1382 }
 0x295   : >> { %v4160_v0 = vpop.permute.xlu0 %4159  ;;  %1304 = vmatpush1.bf16.msra.mxu1 %v1294_v63  ;;  %3582 = vmatpush1.bf16.msk.msra.mxu0 %vm4789_vm1, %v3581_v62 }
 0x296   : >> { %v4162_v1 = vunpack.i.h.bf16 %v4160_v0  ;;  %v4161_v4 = vunpack.i.l.bf16 %v4160_v0  ;;  %v3679_v0 = vld [vmem:[%s5052_s27 + $0x10] sm:$0xff]  ;;  %s6241_s27 = smov (%p854_p4), 14  }
 0x298   : >> { %v1384_v6 = vsel %vm6183_vm13, %v4161_v4, %v4162_v1  ;;  %v1385_v8 = vsel %vm6183_vm13, %v4162_v1, %v1383_v3  ;;  %3566 = vmatmul.mubr.msk.bf16.vlgmr.msra.gmra.mrb[4].mxu1 %vm376_vm11, %v3552_v2  ;;  %v1564_v3 = vpop.permute.xlu1 %1563  ;;  %vm6194_vm13 = vmmov %vm6193_vm6 }
 0x299   : >> { %v1388_v15 = vsel %vm270_vm4, %v1384_v6, 0.0  ;;  %v1389_v18 = vsel %vm271_vm12, %v1385_v8, 0.0  ;;  %1660 = vmatprep.mubr.bf16.mxu1 %v4591_v19 }
 0x29a   : >> { %v1405_v21 = vpack.c.bf16 %v1389_v18, %v1389_v18  ;;  %v1404_v22 = vpack.c.bf16 %v1388_v15, %v1388_v15 }
 0x29c   : >> { %3583 = vmatprep.subr.msk.bf16.mxu0 %vm380_vm5, %v1405_v21  ;;  %v1414_v23 = vsel %vm380_vm5, %v1404_v22, 0  ;;  %v1600_v2 = vpop.permute.xlu1 %1599 }
 0x29d   : >> { %1424 = vmatpush1.bf16.msra.mxu0 %v1414_v23 }
 0x2a0   : >> { %3584 = vmatmul.mubr.msk.bf16.vlgmr.msra.gmra.mrb[8].mxu0 %vm376_vm11, %v3570_v24  ;;  %v5281_v1 = vpop.permute.xlu1 %1495 }
 0x2a1   : >> { %1710 = vmatprep.mubr.bf16.mxu0 %v4591_v19 }
 0x2a4   : >> { %v5283_v6 = vpop.permute.xlu1 %1731 }
 0x2a6   : >> { %v1468_v52 = vpop.permute.xlu0 %1467 }
 0x2a8   : >> { %v5285_v15 = vpop.permute.xlu1 %1531 }
 0x2aa   : >> { %v1552_v4 = vpop.permute.xlu0 %1551 }
 0x2ac   : >> { %v5289_v21 = vpop.permute.xlu1 %1765 }
 0x2ae   : >> { %v1576_v8 = vpop.permute.xlu0 %1575 }
 0x2b0   : >> { %v5293_v23 = vpop.permute.xlu1 %1875 }
 0x2b2   : >> { %v5287_v18 = vpop.permute.xlu0 %1483 }
 0x2b6   : >> { %v5291_v22 = vpop.permute.xlu0 %1719 }
 0x327   : >> { %v1049_v25 = vpop.f32.mrb[0].mxu0 }
 0x328   : >> { %v1051_v26 = vpop.f32.mrb[1].mxu0 }
 0x329   : >> { %v1053_v27 = vpop.f32.mrb[2].mxu0 }
 0x32a   : >> { %v1054_v28 = vpop.f32.mrb[3].mxu0 }
 0x345   : >> { %v1099_v30 = vpop.f32.mrb[0].mxu1 }
 0x346   : >> { %v1100_v31 = vadd.f32 %v1099_v30, %v1049_v25  ;;  %v1101_v32 = vpop.f32.mrb[1].mxu1 }
 0x347   : >> { %v1102_v33 = vadd.f32 %v1101_v32, %v1051_v26  ;;  %v1103_v35 = vpop.f32.mrb[2].mxu1 }
 0x348   : >> { %v1104_v36 = vpop.f32.mrb[3].mxu1 }
 0x34b   : >> { %v1213_v37 = vpop.f32.mrb[4].mxu0 }
 0x34c   : >> { %v1220_v38 = vadd.f32 %v1213_v37, %v1100_v31  ;;  %v1215_v39 = vpop.f32.mrb[5].mxu0 }
 0x34d   : >> { %v1221_v40 = vadd.f32 %v1215_v39, %v1102_v33  ;;  %v1217_v41 = vpop.f32.mrb[6].mxu0 }
 0x34e   : >> { %v1218_v42 = vpop.f32.mrb[7].mxu0 }
 0x36b   : >> { %v1333_v44 = vpop.f32.mrb[4].mxu1 }
 0x36c   : >> { %v1340_v45 = vadd.f32 %v1333_v44, %v1220_v38  ;;  %v1335_v46 = vpop.f32.mrb[5].mxu1 }
 0x36d   : >> { %v1341_v47 = vadd.f32 %v1335_v46, %v1221_v40  ;;  %v1337_v48 = vpop.f32.mrb[6].mxu1 }
 0x36e   : >> { %v1338_v50 = vpop.f32.mrb[7].mxu1 }
 0x373   : >> { %v1453_v51 = vpop.f32.mrb[8].mxu0 }
 0x374   : >> { %v1460_v53 = vadd.f32 %v1453_v51, %v1340_v45  ;;  %v1455_v54 = vpop.f32.mrb[9].mxu0 }
 0x375   : >> { %v1461_v55 = vadd.f32 %v1455_v54, %v1341_v47  ;;  %v1457_v56 = vpop.f32.mrb[10].mxu0 }
 0x376   : >> { %v1470_v57 = vadd.f32 %v1468_v52, %v1460_v53  ;;  %v1458_v58 = vpop.f32.mrb[11].mxu0 }
 0x377   : >> { %v1471_v59 = vadd.f32 %v1468_v52, %v1461_v55 }
 0x378   : >> { %v5222_v60 = vmax.f32 %v1470_v57, 0.0 }
 0x379   : >> { %v5224_v61 = vmax.f32 %v1471_v59, 0.0 }
 0x37a   : >> { %v4169_v62 = vpack.i.bf16 %v5222_v60, %v4950_v14 }
 0x37b   : >> { %v4184_v14 = vpack.i.bf16 %v5224_v61, %v5222_v60  ;;  %v4224_v63 = vpack.i.bf16 %v5002_v20, %v5224_v61 }
 0x37c   : >> { %4170 = vrot.lane.b32.xlu1 %v4169_v62, %s4596_s6  ;;  %4165 = vrot.lane.b32.xlu0 %v4169_v62, %s4588_s18 }
 0x380   : >> { %1749 = vrot.lane.b32.xlu1 %v5222_v60, %s4597_s5  ;;  %1835 = vrot.lane.b32.xlu0 %v5222_v60, %s4600_s29 }
 0x384   : >> { %1847 = vrot.lane.b32.xlu1 %v5222_v60, %s4599_s30  ;;  %1955 = vrot.lane.b32.xlu0 %v5222_v60, %s6184_s25 }
 0x388   : >> { %1967 = vrot.lane.b32.xlu1 %v5222_v60, %s6185_s26  ;;  %1859 = vrot.lane.b32.xlu0 %v5222_v60, %s6186_s28 }
 0x38c   : >> { %1883 = vrot.lane.b32.xlu1 %v5222_v60, %s6187_s16  ;;  %1979 = vrot.lane.b32.xlu0 %v5222_v60, %s4606_s24 }
 0x390   : >> { %2003 = vrot.lane.b32.xlu1 %v5222_v60, %s4605_s15  ;;  %4185 = vrot.lane.b32.xlu0 %v4184_v14, %s4587_s20  ;;  %s6253_s20 = smov (%p854_p4), 97  }
 0x394   : >> { %4195 = vrot.lane.b32.xlu0 %v4184_v14, %s4590_s11  ;;  %4175 = vrot.lane.b32.xlu1 %v4184_v14, %s4584_s22  ;;  %s6249_s11 = smov (%p854_p4), 127   ;;  %s6256_s22 = smov (%p854_p4), 111  }
 0x398   : >> { %4205 = vrot.lane.b32.xlu0 %v4184_v14, %s4593_s9  ;;  %4180 = vrot.lane.b32.xlu1 %v4184_v14, %s4585_s21  ;;  %s6247_s9 = smov (%p854_p4), 31   ;;  %s6254_s21 = smov (%p854_p4), 98  }
 0x39c   : >> { %4215 = vrot.lane.b32.xlu0 %v4184_v14, %s4595_s7  ;;  %4190 = vrot.lane.b32.xlu1 %v4184_v14, %s4586_s19  ;;  %s6245_s7 = smov (%p854_p4), 2   ;;  %s6252_s19 = smov (%p854_p4), 114  }
 0x3a0   : >> { %4225 = vrot.lane.b32.xlu0 %v4224_v63, %s4597_s5  ;;  %1591 = vrot.lane.b32.xlu1 %v5224_v61, %s4588_s18  ;;  %s6188_s5 = smov 110   ;;  %s6251_s18 = smov (%p854_p4), 113  }
 0x3a4   : >> { %1523 = vrot.lane.b32.xlu0 %v5224_v61, %s4596_s6  ;;  %4200 = vrot.lane.b32.xlu1 %v4184_v14, %s4589_s13  ;;  %s6244_s6 = smov (%p854_p4), 1   ;;  %s6250_s13 = smov (%p854_p4), 126  }
 0x3a8   : >> { %4230 = vrot.lane.b32.xlu0 %v4184_v14, %s4598_s4  ;;  %4210 = vrot.lane.b32.xlu1 %v4184_v14, %s4592_s10  ;;  %s6189_s4 = smov 94   ;;  %s6248_s10 = smov (%p854_p4), 30  }
 0x3ac   : >> { %4235 = vrot.lane.b32.xlu0 %v4224_v63, %s4600_s29  ;;  %4220 = vrot.lane.b32.xlu1 %v4184_v14, %s4594_s8  ;;  %s6242_s29 = smov (%p854_p4), 33   ;;  %s6246_s8 = smov (%p854_p4), 32  }
 0x3b0   : >> { %4245 = vrot.lane.b32.xlu0 %v4224_v63, %s6184_s25  ;;  %4240 = vrot.lane.b32.xlu1 %v4224_v63, %s4599_s30  ;;  %s6243_s30 = smov (%p854_p4), 34   ;;  %s6257_s25 = smov (%p854_p4), 96  }
 0x3b4   : >> { %4255 = vrot.lane.b32.xlu0 %v4224_v63, %s6186_s28  ;;  %4250 = vrot.lane.b32.xlu1 %v4224_v63, %s6185_s26  ;;  %s6258_s26 = smov (%p854_p4), 95   ;;  %s6259_s28 = smov (%p854_p4), 110  }
 0x3b8   : >> { %4265 = vrot.lane.b32.xlu0 %v4224_v63, %s4606_s24  ;;  %4260 = vrot.lane.b32.xlu1 %v4224_v63, %s6187_s16  ;;  %s6239_s16 = smov (%p854_p4), 16   ;;  %s6240_s24 = smov (%p854_p4), 15  }
 0x3bc   : >> { %4275 = vrot.lane.b32.xlu0 %v4184_v14, %s6188_s5  ;;  %4270 = vrot.lane.b32.xlu1 %v4224_v63, %s4605_s15  ;;  %s6238_s15 = smov (%p854_p4), 17   ;;  %s6260_s5 = smov (%p854_p4), 94  }
 0x3c0   : >> { %4280 = vrot.lane.b32.xlu0 %v4184_v14, %s6189_s4  ;;  %1995 = vrot.lane.b32.xlu1 %v5002_v20, %s6189_s4  ;;  %v5295_v20 = vpop.permute.xlu0 %1507 }
 0x3c4   : >> { %2080 = vperm.xlu0 %4163, %v3679_v0  }
 0x3c8   : > { %4404 = vset.pattern.permute.xlu0 (%p854_p4), %v4565_v5 }
 0x3ee   : >> { %v5297_v24 = vpop.permute.xlu1 %4170  ;;  %v4166_v25 = vpop.permute.xlu0 %4165 }
 0x3ef   : >> { %v4168_v40 = vunpack.i.h.bf16 %v4166_v25  ;;  %v4167_v41 = vunpack.i.l.bf16 %v4166_v25 }
 0x3f1   : >> { %v1593_v50 = vsel %vm6190_vm7, %v4167_v41, %v4168_v40  ;;  %vm6195_vm7 = vcmask 121856  }
 0x3f2   : >> { %v5299_v26 = vpop.permute.xlu1 %1749  ;;  %v5301_v27 = vpop.permute.xlu0 %1835  ;;  %v1597_v0 = vsel %vm270_vm4, %v1593_v50, 0.0 }
 0x3f6   : >> { %v5303_v28 = vpop.permute.xlu1 %1847  ;;  %v5305_v30 = vpop.permute.xlu0 %1955 }
 0x3fa   : >> { %v5307_v31 = vpop.permute.xlu1 %1967  ;;  %v5309_v32 = vpop.permute.xlu0 %1859 }
 0x3fe   : >> { %v5311_v33 = vpop.permute.xlu1 %1883  ;;  %v5313_v35 = vpop.permute.xlu0 %1979 }
 0x402   : >> { %v5315_v36 = vpop.permute.xlu1 %2003  ;;  %v4186_v37 = vpop.permute.xlu0 %4185 }
 0x403   : >> { %v4188_v51 = vunpack.i.h.bf16 %v4186_v37  ;;  %v4187_v52 = vunpack.i.l.bf16 %v4186_v37 }
 0x406   : >> { %v4196_v38 = vpop.permute.xlu0 %4195  ;;  %v4176_v39 = vpop.permute.xlu1 %4175 }
 0x407   : >> { %v4178_v42 = vunpack.i.h.bf16 %v4176_v39  ;;  %v4177_v44 = vunpack.i.l.bf16 %v4176_v39  ;;  %v4198_v50 = vunpack.i.h.bf16 %v4196_v38 }
 0x409   : >> { %v1557_v53 = vsel %vm6191_vm0, %v1552_v4, %v4177_v44  ;;  %v1558_v54 = vsel %vm6192_vm3, %v4177_v44, %v4178_v42  ;;  %v1581_v4 = vsel %vm6195_vm7, %v1576_v8, %v4187_v52  ;;  %vm6196_vm0 = vmmov %vm6195_vm7  ;;  %vm6197_vm3 = vcmask 130048  }
 0x40a   : >> { %v5317_v45 = vpop.permute.xlu0 %4205  ;;  %v4181_v46 = vpop.permute.xlu1 %4180  ;;  %v1582_v25 = vsel %vm6196_vm0, %v4187_v52, %v4188_v51  ;;  %v4197_v51 = vunpack.i.l.bf16 %v4196_v38  ;;  %vm6200_vm7 = vcmask 244736   ;;  %vm6201_vm0 = vcmask 277504  }
 0x40b   : >> { %v4183_v47 = vunpack.i.h.bf16 %v4181_v46  ;;  %v4182_v48 = vunpack.i.l.bf16 %v4181_v46  ;;  %v4173_v46 = vunpack.i.h.bf16 %v5297_v24 }
 0x40d   : >> { %v1569_v55 = vsel %vm6193_vm6, %v1564_v3, %v4182_v48  ;;  %v1570_v56 = vsel %vm6194_vm13, %v4182_v48, %v4183_v47  ;;  %vm6198_vm13 = vmmov %vm6197_vm3  ;;  %v4172_v47 = vunpack.i.l.bf16 %v5297_v24  ;;  %vm6199_vm6 = vcmask 113664  }
 0x40e   : >> { %v3599_v57 = vpack.c.bf16 %v1569_v55, %v1557_v53  ;;  %v5324_v58 = vpop.permute.xlu0 %4215  ;;  %v4191_v59 = vpop.permute.xlu1 %4190  ;;  %v3596_v62 = vpack.c.bf16 %v1570_v56, %v1558_v54  ;;  %v1613_v48 = vpack.c.bf16 %v1597_v0, %v1597_v0  ;;  %v1489_v56 = vsel %vm6201_vm0, %v5287_v18, %v4197_v51 }
 0x40f   : >> { %v4193_v14 = vunpack.i.h.bf16 %v4191_v59  ;;  %v4192_v63 = vunpack.i.l.bf16 %v4191_v59  ;;  %v1525_v24 = vsel %vm6200_vm7, %v4172_v47, %v4173_v46  ;;  %v4208_v59 = vunpack.i.h.bf16 %v5317_v45 }
 0x410   : >> { %3597 = vmatprep.subr.msk.bf16.mxu1 %vm4760_vm8, %v3596_v62  ;;  %v1623_v38 = vsel %vm380_vm5, %v1613_v48, 0  ;;  %v4207_v62 = vunpack.i.l.bf16 %v5317_v45  ;;  %v5363_v18 = vsel %vm270_vm4, %v1525_v24, 0.0  ;;  %vm6205_vm7 = vcmask 15360  }
 0x411   : >> { %v1605_v3 = vsel %vm6197_vm3, %v1600_v2, %v4192_v63  ;;  %v1606_v37 = vsel %vm6198_vm13, %v4192_v63, %v4193_v14  ;;  %3600 = vmatpush1.bf16.msk.msra.mxu1 %vm4768_vm9, %v3599_v57  ;;  %vm6202_vm3 = vmmov %vm6201_vm0  ;;  %vm6203_vm13 = vcmask 269312   ;;  %v4218_v48 = vunpack.i.h.bf16 %v5324_v58 }
 0x412   : >> { %v3605_v39 = vpack.c.bf16 %v1581_v4, %v1605_v3  ;;  %v5336_v41 = vpop.permute.xlu0 %4225  ;;  %v1592_v42 = vpop.permute.xlu1 %1591  ;;  %v3602_v44 = vpack.c.bf16 %v1582_v25, %v1606_v37  ;;  %v1490_v57 = vsel %vm6202_vm3, %v4197_v51, %v4198_v50  ;;  %v3594_v25 = vld [vmem:[%s5108_s14 + $0x2c] sm:$0xf]  ;;  %vm6206_vm0 = vmmov %vm6205_vm7  ;;  %v4217_v50 = vunpack.i.l.bf16 %v5324_v58 }
 0x413   : >> { %v1594_v8 = vsel %vm6199_vm6, %v4168_v40, %v1592_v42  ;;  %v4228_v14 = vunpack.i.h.bf16 %v5336_v41  ;;  %v4227_v63 = vunpack.i.l.bf16 %v5336_v41  ;;  %vm6204_vm6 = vmmov %vm6203_vm13  ;;  %v1725_v41 = vsel %vm6205_vm7, %v5291_v22, %v4207_v62 }
 0x414   : >> { %v1598_v2 = vsel %vm271_vm12, %v1594_v8, 0.0  ;;  %3603 = vmatprep.subr.msk.bf16.mxu1 %vm4783_vm15, %v3602_v44  ;;  %vm6207_vm3 = vcmask 1039360   ;;  %vm6211_vm7 = vcmask 244736  }
 0x415   : >> { %v1614_v52 = vpack.c.bf16 %v1598_v2, %v1598_v2  ;;  %3606 = vmatpush1.bf16.msk.msra.mxu1 %vm4789_vm1, %v3605_v39  ;;  %v1756_v51 = vsel %vm6207_vm3, %v4227_v63, %v4228_v14 }
 0x416   : >> { %v1524_v53 = vpop.permute.xlu0 %1523  ;;  %v4201_v54 = vpop.permute.xlu1 %4200 }
 0x417   : >> { %v4203_v55 = vunpack.i.h.bf16 %v4201_v54  ;;  %v4202_v40 = vunpack.i.l.bf16 %v4201_v54  ;;  %3607 = vmatprep.subr.msk.bf16.mxu1 %vm380_vm5, %v1614_v52  ;;  %v1526_v54 = vsel %vm6211_vm7, %v4173_v46, %v1524_v53 }
 0x418   : >> { %v1530_v14 = vsel %vm271_vm12, %v1526_v54, 0.0 }
 0x419   : >> { %v1501_v0 = vsel %vm6203_vm13, %v5281_v1, %v4202_v40  ;;  %v1502_v4 = vsel %vm6204_vm6, %v4202_v40, %v4203_v55  ;;  %1633 = vmatpush1.bf16.msra.mxu1 %v1623_v38  ;;  %v1726_v1 = vsel %vm6206_vm0, %v4207_v62, %v4208_v59  ;;  %vm6208_vm13 = vcmask 1031168  }
 0x41a   : >> { %v3613_v3 = vpack.c.bf16 %v1501_v0, %v1489_v56  ;;  %v4231_v37 = vpop.permute.xlu0 %4230  ;;  %v4211_v39 = vpop.permute.xlu1 %4210  ;;  %v3610_v42 = vpack.c.bf16 %v1502_v4, %v1490_v57  ;;  %vm6209_vm6 = vcmask 7168   ;;  %vm6212_vm0 = vmmov %vm6208_vm13  ;;  %v3634_v62 = vpack.c.bf16 %v1756_v51, %v5224_v61 }
 0x41b   : >> { %v4233_v45 = vunpack.i.h.bf16 %v4231_v37  ;;  %v4232_v44 = vunpack.i.l.bf16 %v4231_v37  ;;  %v4213_v47 = vunpack.i.h.bf16 %v4211_v39  ;;  %v4212_v8 = vunpack.i.l.bf16 %v4211_v39  ;;  %vm6210_vm2 = vmmov %vm6209_vm6 }
 0x41c   : >> { %3611 = vmatprep.subr.msk.bf16.mxu0 %vm4760_vm8, %v3610_v42  ;;  %3608 = vmatmul.mubr.msk.bf16.vlgmr.msra.gmra.mrb[8].mxu1 %vm376_vm11, %v3594_v25 }
 0x41d   : >> { %v1767_v2 = vsel %vm6208_vm13, %v4232_v44, %v4233_v45  ;;  %v1737_v52 = vsel %vm6209_vm6, %v5283_v6, %v4212_v8  ;;  %v1738_v22 = vsel %vm6210_vm2, %v4212_v8, %v4213_v47  ;;  %3614 = vmatpush1.bf16.msk.msra.mxu0 %vm4768_vm9, %v3613_v3  ;;  %1824 = vmatprep.mubr.bf16.mxu1 %v4591_v19  ;;  %vm6213_vm2 = vcmask 252928  }
 0x41e   : >> { %v3631_v58 = vpack.c.bf16 %v1737_v52, %v1725_v41  ;;  %v5381_v24 = vpop.permute.xlu0 %4235  ;;  %v4221_v55 = vpop.permute.xlu1 %4220  ;;  %v3628_v40 = vpack.c.bf16 %v1738_v22, %v1726_v1  ;;  %v1768_v38 = vsel %vm6212_vm0, %v4233_v45, %v5289_v21  ;;  %v1545_v6 = vpack.c.bf16 %v5363_v18, %v5363_v18  ;;  %vm6214_vm3 = vmmov %vm6213_vm2 }
 0x41f   : >> { %v4223_v56 = vunpack.i.h.bf16 %v4221_v55  ;;  %v4222_v57 = vunpack.i.l.bf16 %v4221_v55  ;;  %v1513_v59 = vsel %vm6213_vm2, %v5295_v20, %v4217_v50  ;;  %v1514_v46 = vsel %vm6214_vm3, %v4217_v50, %v4218_v48 }
 0x420   : >> { %v1771_v53 = vsel %vm270_vm4, %v1767_v2, 0.0  ;;  %3629 = vmatprep.subr.msk.bf16.mxu1 %vm4760_vm8, %v3628_v40  ;;  %vm6215_vm13 = vcmask 1039360   ;;  %vm6216_vm6 = vcmask 261120   ;;  %v1772_v4 = vsel %vm271_vm12, %v1768_v38, 0.0 }
 0x421   : >> { %v1755_v21 = vsel %vm6215_vm13, %v5299_v26, %v4227_v63  ;;  %v1537_v0 = vsel %vm6216_vm6, %v5285_v15, %v4222_v57  ;;  %vm6217_vm7 = vmmov %vm6216_vm6  ;;  %3632 = vmatpush1.bf16.msk.msra.mxu1 %vm4768_vm9, %v3631_v58  ;;  %v4238_v25 = vunpack.i.h.bf16 %v5381_v24  ;;  %v4237_v63 = vunpack.i.l.bf16 %v5381_v24 }
 0x422   : >> { %v1538_v20 = vsel %vm6217_vm7, %v4222_v57, %v4223_v56  ;;  %v3619_v61 = vpack.c.bf16 %v1513_v59, %v1537_v0  ;;  %v4246_v18 = vpop.permute.xlu0 %4245  ;;  %v4241_v3 = vpop.permute.xlu1 %4240  ;;  %3635 = vmatprep.subr.msk.bf16.mxu1 %vm4783_vm15, %v3634_v62  ;;  %v1777_v39 = vpack.c.bf16 %v1771_v53, %v1771_v53  ;;  %v3637_v42 = vpack.c.bf16 %v1755_v21, %v5222_v60  ;;  %v3590_v57 = vld [vmem:[%s5108_s14 + $0x28] sm:$0xf]  ;;  %v3626_v53 = vld [vmem:[%s5108_s14 + $0x30] sm:$0xf] }
 0x423   : >> { %v3616_v26 = vpack.c.bf16 %v1514_v46, %v1538_v20  ;;  %v4243_v15 = vunpack.i.h.bf16 %v4241_v3  ;;  %v4242_v37 = vunpack.i.l.bf16 %v4241_v3  ;;  %v1546_v45 = vpack.c.bf16 %v1530_v14, %v1530_v14 }
 0x424   : >> { %v4248_v44 = vunpack.i.h.bf16 %v4246_v18  ;;  %v4247_v47 = vunpack.i.l.bf16 %v4246_v18  ;;  %vm6218_vm0 = vcmask 924672   ;;  %v1778_v41 = vpack.c.bf16 %v1772_v4, %v1772_v4 }
 0x425   : >> { %3617 = vmatprep.subr.msk.bf16.mxu0 %vm4783_vm15, %v3616_v26  ;;  %v1854_v8 = vsel %vm6218_vm0, %v4242_v37, %v4243_v15  ;;  %3638 = vmatpush1.bf16.msk.msra.mxu1 %vm4789_vm1, %v3637_v42  ;;  %v1673_v60 = vsel %vm380_vm5, %v1545_v6, 0  ;;  %vm6219_vm2 = vcmask 932864   ;;  %v1787_v52 = vsel %vm380_vm5, %v1777_v39, 0  ;;  %vm6222_vm6 = vmmov %vm6218_vm0 }
 0x426   : >> { %3620 = vmatpush1.bf16.msk.msra.mxu0 %vm4789_vm1, %v3619_v61  ;;  %v4256_v1 = vpop.permute.xlu0 %4255  ;;  %v4251_v48 = vpop.permute.xlu1 %4250  ;;  %v1842_v50 = vsel %vm6219_vm2, %v4237_v63, %v4238_v25  ;;  %3639 = vmatprep.subr.msk.bf16.mxu1 %vm380_vm5, %v1778_v41  ;;  %vm6220_vm3 = vcmask 801792   ;;  %v1853_v58 = vsel %vm6222_vm6, %v5303_v28, %v4242_v37  ;;  %vm6223_vm7 = vcmask 793600  }
 0x427   : >> { %3621 = vmatprep.subr.msk.bf16.mxu0 %vm380_vm5, %v1546_v45  ;;  %v4253_v51 = vunpack.i.h.bf16 %v4251_v48  ;;  %v4252_v2 = vunpack.i.l.bf16 %v4251_v48  ;;  %v1961_v22 = vsel %vm6220_vm3, %v5305_v30, %v4247_v47  ;;  %vm6221_vm13 = vmmov %vm6220_vm3  ;;  %v3646_v24 = vpack.c.bf16 %v1854_v8, %v1842_v50 }
 0x428   : >> { %v1962_v54 = vsel %vm6221_vm13, %v4247_v47, %v4248_v44  ;;  %v4258_v55 = vunpack.i.h.bf16 %v4256_v1  ;;  %v4257_v40 = vunpack.i.l.bf16 %v4256_v1  ;;  %vm6224_vm0 = vmmov %vm6223_vm7  ;;  %v1841_v28 = vsel %vm6219_vm2, %v5301_v27, %v4237_v63 }
 0x429   : >> { %v1973_v38 = vsel %vm6223_vm7, %v5307_v31, %v4252_v2  ;;  %v1974_v56 = vsel %vm6224_vm0, %v4252_v2, %v4253_v51  ;;  %1797 = vmatpush1.bf16.msra.mxu1 %v1787_v52  ;;  %v3649_v14 = vpack.c.bf16 %v1853_v58, %v1841_v28  ;;  %vm6225_vm3 = vcmask 916480   ;;  %v3644_v58 = vld [vmem:[%s5108_s14 + $0x34] sm:$0xf] }
 0x42a   : >> { %1683 = vmatpush1.bf16.msra.mxu0 %v1673_v60  ;;  %v3667_v6 = vpack.c.bf16 %v1973_v38, %v1961_v22  ;;  %v4266_v59 = vpop.permute.xlu0 %4265  ;;  %v4261_v30 = vpop.permute.xlu1 %4260  ;;  %v3664_v46 = vpack.c.bf16 %v1974_v56, %v1962_v54  ;;  %v1865_v20 = vsel %vm628_vm10, %v5309_v32, %v4257_v40  ;;  %v1866_v4 = vsel %vm628_vm10, %v4257_v40, %v4258_v55  ;;  %vm6226_vm13 = vmmov %vm6225_vm3  ;;  %v3662_v38 = vld [vmem:[%s5108_s14 + $0x38] sm:$0xf]  ;;  %s6237_s14 = smov (%p854_p4), 18  }
 0x42b   : >> { %3647 = vmatprep.subr.msk.bf16.mxu0 %vm4760_vm8, %v3646_v24  ;;  %v4263_v62 = vunpack.i.h.bf16 %v4261_v30  ;;  %v4262_v21 = vunpack.i.l.bf16 %v4261_v30  ;;  %v4268_v31 = vunpack.i.h.bf16 %v4266_v59  ;;  %v4267_v0 = vunpack.i.l.bf16 %v4266_v59 }
 0x42c   : >> { %3665 = vmatprep.subr.msk.bf16.mxu1 %vm4760_vm8, %v3664_v46  ;;  %3640 = vmatmul.mubr.msk.bf16.vlgmr.msra.gmra.mrb[12].mxu1 %vm376_vm11, %v3626_v53  ;;  %vm6227_vm6 = vcmask 900096   ;;  %vm6229_vm0 = vcmask 785408  }
 0x42d   : >> { %3622 = vmatmul.mubr.msk.bf16.vlgmr.msra.gmra.mrb[12].mxu0 %vm376_vm11, %v3590_v57  ;;  %v1889_v25 = vsel %vm6225_vm3, %v5311_v33, %v4262_v21  ;;  %v1890_v27 = vsel %vm6226_vm13, %v4262_v21, %v4263_v62  ;;  %3668 = vmatpush1.bf16.msk.msra.mxu1 %vm4768_vm9, %v3667_v6  ;;  %v1985_v33 = vsel %vm751_vm14, %v5313_v35, %v4267_v0  ;;  %vm6228_vm7 = vmmov %vm6227_vm6  ;;  %vm6231_vm3 = vcmask 769024  }
 0x42e   : >> { %v3655_v61 = vpack.c.bf16 %v1865_v20, %v1889_v25  ;;  %3650 = vmatpush1.bf16.msk.msra.mxu0 %vm4768_vm9, %v3649_v14  ;;  %v4276_v18 = vpop.permute.xlu0 %4275  ;;  %v4271_v3 = vpop.permute.xlu1 %4270  ;;  %v3652_v26 = vpack.c.bf16 %v1866_v4, %v1890_v27  ;;  %1944 = vmatprep.mubr.bf16.mxu0 %v4591_v19  ;;  %v1986_v39 = vsel %vm751_vm14, %v4267_v0, %v4268_v31  ;;  %vm6230_vm2 = vmmov %vm6229_vm0 }
 0x42f   : >> { %v4278_v32 = vunpack.i.h.bf16 %v4276_v18  ;;  %v4277_v63 = vunpack.i.l.bf16 %v4276_v18  ;;  %v4273_v15 = vunpack.i.h.bf16 %v4271_v3  ;;  %v4272_v37 = vunpack.i.l.bf16 %v4271_v3  ;;  %2064 = vmatprep.mubr.bf16.mxu1 %v4591_v19  ;;  %vm6232_vm13 = vmmov %vm6231_vm3 }
 0x430   : >> { %3653 = vmatprep.subr.msk.bf16.mxu0 %vm4783_vm15, %v3652_v26 }
 0x431   : >> { %v1878_v42 = vsel %vm6227_vm6, %v4278_v32, %v5293_v23  ;;  %v1877_v45 = vsel %vm6228_vm7, %v4277_v63, %v4278_v32  ;;  %v2009_v44 = vsel %vm6229_vm0, %v5315_v36, %v4272_v37  ;;  %v2010_v47 = vsel %vm6230_vm2, %v4272_v37, %v4273_v15 }
 0x432   : >> { %v1882_v19 = vsel %vm271_vm12, %v1878_v42, 0.0  ;;  %v1881_v35 = vsel %vm270_vm4, %v1877_v45, 0.0  ;;  %v3673_v8 = vpack.c.bf16 %v1985_v33, %v2009_v44  ;;  %3656 = vmatpush1.bf16.msk.msra.mxu0 %vm4789_vm1, %v3655_v61  ;;  %v4281_v41 = vpop.permute.xlu0 %4280  ;;  %v1996_v23 = vpop.permute.xlu1 %1995  ;;  %v3670_v1 = vpack.c.bf16 %v1986_v39, %v2010_v47 }
 0x433   : >> { %v4283_v48 = vunpack.i.h.bf16 %v4281_v41  ;;  %v4282_v60 = vunpack.i.l.bf16 %v4281_v41  ;;  %v1898_v50 = vpack.c.bf16 %v1882_v19, %v1882_v19  ;;  %v1897_v36 = vpack.c.bf16 %v1881_v35, %v1881_v35 }
 0x434   : >> { %3671 = vmatprep.subr.msk.bf16.mxu1 %vm4783_vm15, %v3670_v1  ;;  %v5542_v1 = vld [vmem:[#allocation2 + $0x18] sm:$0xff] (%p854_p4)  ;;  %vm6261_vm6 = vcmask (%p854_p4), 146432   ;;  %vm6262_vm7 = vcmask (%p854_p4), 138240  }
 0x435   : >> { %v1997_v51 = vsel %vm6231_vm3, %v4282_v60, %v4283_v48  ;;  %v1998_v2 = vsel %vm6232_vm13, %v4283_v48, %v1996_v23  ;;  %3657 = vmatprep.subr.msk.bf16.mxu0 %vm380_vm5, %v1898_v50  ;;  %3674 = vmatpush1.bf16.msk.msra.mxu1 %vm4789_vm1, %v3673_v8  ;;  %v1907_v52 = vsel %vm380_vm5, %v1897_v36, 0  ;;  %v5504_v23 = vld [vmem:[#allocation2] sm:$0xff] (%p854_p4)  ;;  %v3755_v60 = vld [vmem:[%s6051_s2 + $0x28] sm:$0xff] (%p854_p4)  ;;  %vm6263_vm0 = vmmov (%p854_p4), %vm6261_vm6  ;;  %vm6265_vm3 = vcmask (%p854_p4), 130048  }
 0x436   : >> { %v2001_v22 = vsel %vm270_vm4, %v1997_v51, 0.0  ;;  %v2002_v54 = vsel %vm271_vm12, %v1998_v2, 0.0  ;;  %1917 = vmatpush1.bf16.msra.mxu0 %v1907_v52  ;;  %2163 = vrot.lane.b32.xlu1 (%p854_p4), %v5504_v23, %s6237_s14  ;;  %vm6264_vm2 = vmmov (%p854_p4), %vm6262_vm7  ;;  %vm6266_vm13 = vcmask (%p854_p4), 121856  }
 0x437   : >> { %v2018_v24 = vpack.c.bf16 %v2002_v54, %v2002_v54  ;;  %v2017_v55 = vpack.c.bf16 %v2001_v22, %v2001_v22 }
 0x439   : >> { %3658 = vmatmul.mubr.msk.bf16.vlgmr.msra.gmra.mrb[16].mxu0 %vm376_vm11, %v3644_v58  ;;  %3675 = vmatprep.subr.msk.bf16.mxu1 %vm380_vm5, %v2018_v24  ;;  %v2027_v40 = vsel %vm380_vm5, %v2017_v55, 0 }
 0x43a   : >> { %2037 = vmatpush1.bf16.msra.mxu1 %v2027_v40  ;;  %2270 = vmatprep.mubr.bf16.mxu0 (%p854_p4), %v4565_v5 }
 0x43b   : > { %2175 = vrot.lane.b32.xlu1 (%p854_p4), %v5504_v23, %s6238_s15 }
 0x43d   : >> { %3676 = vmatmul.mubr.msk.bf16.vlgmr.msra.gmra.mrb[16].mxu1 %vm376_vm11, %v3662_v38 }
 0x43e   : > { %2320 = vmatprep.mubr.bf16.mxu1 (%p854_p4), %v4565_v5 }
 0x443   : >> { %v2081_v33 = vpop.permute.xlu0 %2080 }
 0x4a8   : > { %v2164_v50 = vpop.permute.xlu1 (%p854_p4), %2163 }
 0x4ad   : > { %v2176_v51 = vpop.permute.xlu1 (%p854_p4), %2175 }
 0x4ef   : >> { %v1662_v56 = vpop.f32.mrb[8].mxu1 }
 0x4f0   : >> { %v1664_v57 = vpop.f32.mrb[9].mxu1 }
 0x4f1   : >> { %v1666_v6 = vpop.f32.mrb[10].mxu1 }
 0x4f2   : >> { %v1667_v59 = vpop.f32.mrb[11].mxu1 }
 0x4ff   : >> { %v1826_v28 = vpop.f32.mrb[12].mxu1 }
 0x500   : >> { %v1712_v30 = vpop.f32.mrb[12].mxu0  ;;  %v1828_v14 = vpop.f32.mrb[13].mxu1 }
 0x501   : >> { %v1713_v46 = vadd.f32 %v1712_v30, %v1662_v56  ;;  %v1714_v53 = vpop.f32.mrb[13].mxu0  ;;  %v1830_v20 = vpop.f32.mrb[14].mxu1 }
 0x502   : >> { %v1715_v62 = vadd.f32 %v1714_v53, %v1664_v57  ;;  %v1716_v21 = vpop.f32.mrb[14].mxu0  ;;  %v1831_v25 = vpop.f32.mrb[15].mxu1 }
 0x503   : >> { %v1833_v31 = vadd.f32 %v1826_v28, %v1713_v46  ;;  %v1717_v0 = vpop.f32.mrb[15].mxu0 }
 0x504   : >> { %v1834_v4 = vadd.f32 %v1828_v14, %v1715_v62 }
 0x50c   : >> { %v1946_v27 = vpop.f32.mrb[16].mxu0 }
 0x50d   : >> { %v1953_v61 = vadd.f32 %v1946_v27, %v1833_v31  ;;  %v1948_v18 = vpop.f32.mrb[17].mxu0 }
 0x50e   : >> { %v1954_v3 = vadd.f32 %v1948_v18, %v1834_v4  ;;  %v1950_v26 = vpop.f32.mrb[18].mxu0 }
 0x50f   : >> { %v1951_v32 = vpop.f32.mrb[19].mxu0 }
 0x510   : >> { %v2066_v63 = vpop.f32.mrb[16].mxu1 }
 0x511   : >> { %v2073_v15 = vadd.f32 %v2066_v63, %v1953_v61  ;;  %v2068_v37 = vpop.f32.mrb[17].mxu1 }
 0x512   : >> { %v2074_v39 = vadd.f32 %v2068_v37, %v1954_v3  ;;  %v2070_v42 = vpop.f32.mrb[18].mxu1 }
 0x513   : >> { %v2083_v45 = vadd.f32 %v2081_v33, %v2073_v15  ;;  %v2071_v44 = vpop.f32.mrb[19].mxu1 }
 0x514   : >> { %v2084_v47 = vadd.f32 %v2081_v33, %v2074_v39 }
 0x515   : >> { %v2085_v19 = vmul.f32 0.5, %v2083_v45  ;;  %856 = sbr.rel (!%p854_p4) target bundleno = 453 (0x1c5), region = 97 }
 0x516   : >> { %v2086_v35 = vmul.f32 0.5, %v2084_v47 }
 0x517   : >> { %v5490_v13 = vadd.f32 %v4551_v13, %v2085_v19  }
 0x518   : >> { %v5493_v12 = vadd.f32 %v4547_v12, %v2086_v35  }
 0x519   : >> { %v6233_v8 = vmov %v5490_v13 }
 0x51a   : >> { %v6234_v41 = vmov %v5493_v12  ;;  %v6236_v13 = vmov %v6233_v8 }
 0x51b   : >> { %v6235_v12 = vmov %v6234_v41  ;;  %v4284_v13 = vpack.i.bf16 (%p854_p4), %v6234_v41, %v6233_v8  ;;  %v4339_v48 = vpack.i.bf16 (%p854_p4), %v5542_v1, %v6234_v41 }
 0x51c   : > { %v4304_v12 = vpack.i.bf16 %v6233_v8, %v5504_v23 }
 0x51d   : > { %4285 = vrot.lane.b32.xlu0 %v4284_v13, %s6237_s14  ;;  %4300 = vrot.lane.b32.xlu1 %v4284_v13, %s6239_s16 }
 0x521   : > { %4290 = vrot.lane.b32.xlu0 %v4284_v13, %s6238_s15  ;;  %2211 = vrot.lane.b32.xlu1 %v5504_v23, %s6239_s16 }
 0x525   : > { %4295 = vrot.lane.b32.xlu0 %v4284_v13, %s6240_s24  ;;  %2203 = vrot.lane.b32.xlu1 %v6234_v41, %s6241_s27 }
 0x529   : > { %2187 = vrot.lane.b32.xlu0 %v5504_v23, %s6240_s24  ;;  %4315 = vrot.lane.b32.xlu1 %v4284_v13, %s6242_s29 }
 0x52d   : > { %4305 = vrot.lane.b32.xlu0 %v4304_v12, %s6241_s27  ;;  %2109 = vrot.lane.b32.xlu1 %v5504_v23, %s6242_s29 }
 0x531   : > { %4310 = vrot.lane.b32.xlu0 %v4284_v13, %s6243_s30  ;;  %4325 = vrot.lane.b32.xlu1 %v4284_v13, %s6244_s6 }
 0x535   : > { %2097 = vrot.lane.b32.xlu0 %v5504_v23, %s6243_s30  ;;  %2341 = vrot.lane.b32.xlu1 %v5504_v23, %s6244_s6 }
 0x539   : > { %4320 = vrot.lane.b32.xlu0 %v4284_v13, %s6245_s7  ;;  %4335 = vrot.lane.b32.xlu1 %v4284_v13, %s6246_s8 }
 0x53d   : > { %2329 = vrot.lane.b32.xlu0 %v5504_v23, %s6245_s7  ;;  %2145 = vrot.lane.b32.xlu1 %v5504_v23, %s6246_s8 }
 0x541   : > { %4330 = vrot.lane.b32.xlu0 %v4284_v13, %s6247_s9  ;;  %4345 = vrot.lane.b32.xlu1 %v4304_v12, %s6248_s10 }
 0x545   : > { %2121 = vrot.lane.b32.xlu0 %v5504_v23, %s6247_s9  ;;  %2359 = vrot.lane.b32.xlu1 %v6233_v8, %s6249_s11 }
 0x549   : > { %4340 = vrot.lane.b32.xlu0 %v4339_v48, %s6249_s11  ;;  %2375 = vrot.lane.b32.xlu1 %v5542_v1, %s6250_s13 }
 0x54d   : > { %2137 = vrot.lane.b32.xlu0 %v6234_v41, %s6248_s10  ;;  %4360 = vrot.lane.b32.xlu1 %v4339_v48, %s6251_s18 }
 0x551   : > { %4350 = vrot.lane.b32.xlu0 %v4284_v13, %s6250_s13  ;;  %2455 = vrot.lane.b32.xlu1 %v6233_v8, %s6251_s18 }
 0x555   : > { %4355 = vrot.lane.b32.xlu0 %v4339_v48, %s6252_s19  ;;  %4370 = vrot.lane.b32.xlu1 %v4339_v48, %s6253_s20 }
 0x559   : > { %2443 = vrot.lane.b32.xlu0 %v6233_v8, %s6252_s19  ;;  %2573 = vrot.lane.b32.xlu1 %v6233_v8, %s6253_s20 }
 0x55d   : > { %4365 = vrot.lane.b32.xlu0 %v4339_v48, %s6254_s21  ;;  %4380 = vrot.lane.b32.xlu1 %v4339_v48, %s6255_s17 }
 0x561   : > { %2561 = vrot.lane.b32.xlu0 %v6233_v8, %s6254_s21  ;;  %2491 = vrot.lane.b32.xlu1 %v6233_v8, %s6255_s17 }
 0x565   : > { %4375 = vrot.lane.b32.xlu0 %v4339_v48, %s6256_s22  ;;  %4390 = vrot.lane.b32.xlu1 %v4339_v48, %s6257_s25 }
 0x569   : > { %2467 = vrot.lane.b32.xlu0 %v6233_v8, %s6256_s22  ;;  %2483 = vrot.lane.b32.xlu1 %v5542_v1, %s6259_s28 }
 0x56d   : > { %4385 = vrot.lane.b32.xlu0 %v4339_v48, %s6258_s26  ;;  %2609 = vrot.lane.b32.xlu1 %v6233_v8, %s6257_s25 }
 0x571   : > { %4395 = vrot.lane.b32.xlu0 %v4284_v13, %s6259_s28  ;;  %2601 = vrot.lane.b32.xlu1 %v5542_v1, %s6260_s5 }
 0x575   : > { %2585 = vrot.lane.b32.xlu0 %v6233_v8, %s6258_s26  ;;  %2776 = vrot.lane.b32.xlu1 %v5504_v23, %s6238_s15 }
 0x579   : > { %4400 = vrot.lane.b32.xlu0 %v4284_v13, %s6260_s5  ;;  %2812 = vrot.lane.b32.xlu1 %v5504_v23, %s6239_s16 }
 0x57d   : > { %2683 = vperm.xlu0 %4404, %v3755_v60   ;;  %2710 = vrot.lane.b32.xlu1 %v5504_v23, %s6242_s29 }
 0x581   : > { %2764 = vrot.lane.b32.xlu0 %v5504_v23, %s6237_s14  ;;  %2942 = vrot.lane.b32.xlu1 %v5504_v23, %s6244_s6 }
 0x585   : > { %2788 = vrot.lane.b32.xlu0 %v5504_v23, %s6240_s24  ;;  %2746 = vrot.lane.b32.xlu1 %v5504_v23, %s6246_s8 }
 0x589   : > { %2698 = vrot.lane.b32.xlu0 %v5504_v23, %s6243_s30  ;;  %2976 = vrot.lane.b32.xlu1 %v5542_v1, %s6250_s13 }
 0x58d   : > { %2930 = vrot.lane.b32.xlu0 %v5504_v23, %s6245_s7  ;;  %3084 = vrot.lane.b32.xlu1 %v5542_v1, %s6259_s28 }
 0x58f   : > { %v4286_v36 = vpop.permute.xlu0 %4285  ;;  %v4301_v24 = vpop.permute.xlu1 %4300 }
 0x590   : > { %v4288_v2 = vunpack.i.h.bf16 %v4286_v36  ;;  %v4287_v52 = vunpack.i.l.bf16 %v4286_v36  ;;  %v4303_v57 = vunpack.i.h.bf16 %v4301_v24  ;;  %v4302_v6 = vunpack.i.l.bf16 %v4301_v24 }
 0x591   : > { %2722 = vrot.lane.b32.xlu0 %v5504_v23, %s6247_s9 }
 0x592   : > { %v2170_v55 = vsel %vm6261_vm6, %v4287_v52, %v4288_v2  ;;  %v2169_v38 = vsel %vm6263_vm0, %v2164_v50, %v4287_v52  ;;  %v2218_v62 = vsel %vm6265_vm3, %v4302_v6, %v4303_v57  ;;  %vm6267_vm6 = vmmov %vm6265_vm3  ;;  %vm6269_vm0 = vcmask 113664  }
 0x593   : > { %v4291_v22 = vpop.permute.xlu0 %4290  ;;  %v2212_v21 = vpop.permute.xlu1 %2211  ;;  %vm6271_vm3 = vcmask 269312  }
 0x594   : > { %v4293_v54 = vunpack.i.h.bf16 %v4291_v22  ;;  %v4292_v58 = vunpack.i.l.bf16 %v4291_v22  ;;  %v2217_v31 = vsel %vm6267_vm6, %v2212_v21, %v4302_v6  ;;  %vm6273_vm6 = vmmov %vm6271_vm3 }
 0x596   : > { %v2182_v40 = vsel %vm6262_vm7, %v4292_v58, %v4293_v54  ;;  %v2181_v56 = vsel %vm6264_vm2, %v2176_v51, %v4292_v58  ;;  %vm6268_vm7 = vmmov %vm6266_vm13  ;;  %v3681_v51 = vld [vmem:[%s6050_s1 + $0x68] sm:$0xf] }
 0x597   : > { %v4296_v59 = vpop.permute.xlu0 %4295  ;;  %v3683_v30 = vpack.c.bf16 %v2182_v40, %v2170_v55  ;;  %v3686_v46 = vpack.c.bf16 %v2181_v56, %v2169_v38  ;;  %v2204_v27 = vpop.permute.xlu1 %2203  ;;  %vm6270_vm2 = vmmov %vm6269_vm0 }
 0x598   : > { %v4298_v53 = vunpack.i.h.bf16 %v4296_v59  ;;  %v4297_v28 = vunpack.i.l.bf16 %v4296_v59 }
 0x599   : > { %3684 = vmatprep.subr.msk.bf16.mxu0 %vm4760_vm8, %v3683_v30 }
 0x59a   : > { %v2194_v14 = vsel %vm6266_vm13, %v4297_v28, %v4298_v53  ;;  %3687 = vmatpush1.bf16.msk.msra.mxu0 %vm4768_vm9, %v3686_v46  ;;  %vm6272_vm13 = vcmask 277504  }
 0x59b   : > { %v2188_v0 = vpop.permute.xlu0 %2187  ;;  %v3689_v20 = vpack.c.bf16 %v2194_v14, %v2218_v62  ;;  %v4316_v26 = vpop.permute.xlu1 %4315 }
 0x59c   : > { %v2193_v4 = vsel %vm6268_vm7, %v2188_v0, %v4297_v28  ;;  %v4318_v15 = vunpack.i.h.bf16 %v4316_v26  ;;  %v4317_v37 = vunpack.i.l.bf16 %v4316_v26  ;;  %vm6274_vm7 = vmmov %vm6272_vm13 }
 0x59d   : > { %v3692_v25 = vpack.c.bf16 %v2193_v4, %v2217_v31  ;;  %3690 = vmatprep.subr.msk.bf16.mxu0 %vm4783_vm15, %v3689_v20 }
 0x59e   : > { %v2116_v35 = vsel %vm6271_vm3, %v4317_v37, %v4318_v15 }
 0x59f   : > { %v4306_v61 = vpop.permute.xlu0 %4305  ;;  %3693 = vmatpush1.bf16.msk.msra.mxu0 %vm4789_vm1, %v3692_v25  ;;  %v2110_v13 = vpop.permute.xlu1 %2109 }
 0x5a0   : > { %v4308_v18 = vunpack.i.h.bf16 %v4306_v61  ;;  %v4307_v3 = vunpack.i.l.bf16 %v4306_v61  ;;  %v2115_v60 = vsel %vm6273_vm6, %v2110_v13, %v4317_v37  ;;  %vm6279_vm6 = vcmask 261120  }
 0x5a2   : > { %v2206_v32 = vsel %vm6269_vm0, %v4308_v18, %v2204_v27  ;;  %v2205_v63 = vsel %vm6270_vm2, %v4307_v3, %v4308_v18  ;;  %vm6275_vm0 = vcmask 7168   ;;  %vm6276_vm2 = vcmask 15360  }
 0x5a3   : > { %v2210_v33 = vsel %vm271_vm12, %v2206_v32, 0.0  ;;  %v4311_v39 = vpop.permute.xlu0 %4310  ;;  %v2209_v42 = vsel %vm270_vm4, %v2205_v63, 0.0  ;;  %v4326_v22 = vpop.permute.xlu1 %4325  ;;  %vm6277_vm3 = vmmov %vm6275_vm0 }
 0x5a4   : > { %v4313_v45 = vunpack.i.h.bf16 %v4311_v39  ;;  %v4312_v44 = vunpack.i.l.bf16 %v4311_v39  ;;  %v2226_v47 = vpack.c.bf16 %v2210_v33, %v2210_v33  ;;  %v2225_v19 = vpack.c.bf16 %v2209_v42, %v2209_v42 }
 0x5a5   : > { %v4328_v54 = vunpack.i.h.bf16 %v4326_v22  ;;  %v4327_v58 = vunpack.i.l.bf16 %v4326_v22 }
 0x5a6   : > { %3694 = vmatprep.subr.msk.bf16.mxu0 %vm380_vm5, %v2226_v47  ;;  %v2233_v12 = vsel %vm380_vm5, %v2225_v19, 0  ;;  %v2104_v48 = vsel %vm6272_vm13, %v4312_v44, %v4313_v45  ;;  %vm6278_vm13 = vmmov %vm6276_vm2 }
 0x5a7   : > { %v2098_v50 = vpop.permute.xlu0 %2097  ;;  %2243 = vmatpush1.bf16.msra.mxu0 %v2233_v12  ;;  %v3697_v36 = vpack.c.bf16 %v2116_v35, %v2104_v48  ;;  %v2348_v38 = vsel %vm6275_vm0, %v4327_v58, %v4328_v54  ;;  %v2342_v56 = vpop.permute.xlu1 %2341  ;;  %vm6281_vm0 = vmmov %vm6279_vm6 }
 0x5a8   : > { %v2103_v2 = vsel %vm6274_vm7, %v2098_v50, %v4312_v44  ;;  %v2347_v6 = vsel %vm6277_vm3, %v2342_v56, %v4327_v58  ;;  %vm6280_vm7 = vcmask 252928   ;;  %vm6283_vm3 = vcmask 244736  }
 0x5a9   : > { %3698 = vmatprep.subr.msk.bf16.mxu1 %vm4760_vm8, %v3697_v36  ;;  %v3700_v52 = vpack.c.bf16 %v2115_v60, %v2103_v2 }
 0x5aa   : > { %3695 = vmatmul.mubr.msk.bf16.vlgmr.msra.gmra.mrb[0].mxu0 %vm376_vm11, %v3681_v51 }
 0x5ab   : > { %v4321_v24 = vpop.permute.xlu0 %4320  ;;  %3701 = vmatpush1.bf16.msk.msra.mxu1 %vm4768_vm9, %v3700_v52  ;;  %2432 = vmatprep.mubr.bf16.mxu0 %v4565_v5  ;;  %v4336_v28 = vpop.permute.xlu1 %4335 }
 0x5ac   : > { %v4323_v55 = vunpack.i.h.bf16 %v4321_v24  ;;  %v4322_v40 = vunpack.i.l.bf16 %v4321_v24  ;;  %v4338_v62 = vunpack.i.h.bf16 %v4336_v28  ;;  %v4337_v21 = vunpack.i.l.bf16 %v4336_v28 }
 0x5ae   : > { %v2336_v57 = vsel %vm6276_vm2, %v4322_v40, %v4323_v55  ;;  %v2152_v20 = vsel %vm6279_vm6, %v4337_v21, %v4338_v62  ;;  %vm6282_vm2 = vmmov %vm6280_vm7 }
 0x5af   : > { %v2330_v59 = vpop.permute.xlu0 %2329  ;;  %v3712_v30 = vpack.c.bf16 %v2348_v38, %v2336_v57  ;;  %v2146_v4 = vpop.permute.xlu1 %2145 }
 0x5b0   : > { %v2335_v46 = vsel %vm6278_vm13, %v2330_v59, %v4322_v40  ;;  %v2151_v27 = vsel %vm6281_vm0, %v2146_v4, %v4337_v21  ;;  %vm6284_vm13 = vcmask 1039360   ;;  %vm6287_vm0 = vcmask 1031168  }
 0x5b1   : > { %v3715_v53 = vpack.c.bf16 %v2347_v6, %v2335_v46  ;;  %3713 = vmatprep.subr.msk.bf16.mxu0 %vm4760_vm8, %v3712_v30  ;;  %vm6285_vm6 = vmmov %vm6284_vm13 }
 0x5b3   : > { %v4331_v14 = vpop.permute.xlu0 %4330  ;;  %3716 = vmatpush1.bf16.msk.msra.mxu0 %vm4768_vm9, %v3715_v53  ;;  %v4346_v32 = vpop.permute.xlu1 %4345 }
 0x5b4   : > { %v4333_v31 = vunpack.i.h.bf16 %v4331_v14  ;;  %v4332_v0 = vunpack.i.l.bf16 %v4331_v14  ;;  %v4348_v63 = vunpack.i.h.bf16 %v4346_v32  ;;  %v4347_v15 = vunpack.i.l.bf16 %v4346_v32 }
 0x5b6   : > { %v2128_v25 = vsel %vm6280_vm7, %v4332_v0, %v4333_v31  ;;  %v2139_v42 = vsel %vm6283_vm3, %v4347_v15, %v4348_v63  ;;  %vm6286_vm7 = vmmov %vm6283_vm3  ;;  %vm6289_vm3 = vcmask 924672  }
 0x5b7   : > { %v2122_v61 = vpop.permute.xlu0 %2121  ;;  %v3703_v18 = vpack.c.bf16 %v2128_v25, %v2152_v20  ;;  %v2360_v45 = vpop.permute.xlu1 %2359  ;;  %v2143_v47 = vsel %vm270_vm4, %v2139_v42, 0.0  ;;  %v3710_v20 = vld [vmem:[%s6050_s1 + $0x6c] sm:$0xf] }
 0x5b8   : > { %v2127_v3 = vsel %vm6282_vm2, %v2122_v61, %v4332_v0  ;;  %v2159_v12 = vpack.c.bf16 %v2143_v47, %v2143_v47  ;;  %vm6288_vm2 = vmmov %vm6287_vm0 }
 0x5b9   : > { %v3706_v26 = vpack.c.bf16 %v2127_v3, %v2151_v27  ;;  %3704 = vmatprep.subr.msk.bf16.mxu1 %vm4783_vm15, %v3703_v18 }
 0x5ba   : > { %v2283_v2 = vsel %vm380_vm5, %v2159_v12, 0 }
 0x5bb   : > { %v4341_v37 = vpop.permute.xlu0 %4340  ;;  %3707 = vmatpush1.bf16.msk.msra.mxu1 %vm4789_vm1, %v3706_v26  ;;  %v2376_v36 = vpop.permute.xlu1 %2375 }
 0x5bc   : > { %v4343_v33 = vunpack.i.h.bf16 %v4341_v37  ;;  %v4342_v39 = vunpack.i.l.bf16 %v4341_v37 }
 0x5be   : > { %v2366_v44 = vsel %vm6284_vm13, %v4342_v39, %v4343_v33  ;;  %v2365_v19 = vsel %vm6285_vm6, %v2360_v45, %v4342_v39  ;;  %vm6290_vm13 = vcmask 932864   ;;  %vm6291_vm6 = vmmov %vm6289_vm3 }
 0x5bf   : > { %v2138_v35 = vpop.permute.xlu0 %2137  ;;  %v3718_v13 = vpack.c.bf16 %v2366_v44, %v6234_v41  ;;  %v3721_v48 = vpack.c.bf16 %v2365_v19, %v6233_v8  ;;  %v3680_v8 = vld [vmem:[%s6050_s1 + $0x64] sm:$0xf]  ;;  %v4361_v54 = vpop.permute.xlu1 %4360 }
 0x5c0   : > { %v2140_v60 = vsel %vm6286_vm7, %v4348_v63, %v2138_v35  ;;  %v4363_v55 = vunpack.i.h.bf16 %v4361_v54  ;;  %v4362_v40 = vunpack.i.l.bf16 %v4361_v54  ;;  %vm6292_vm7 = vmmov %vm6290_vm13 }
 0x5c1   : > { %v2144_v50 = vsel %vm271_vm12, %v2140_v60, 0.0  ;;  %3719 = vmatprep.subr.msk.bf16.mxu0 %vm4783_vm15, %v3718_v13 }
 0x5c2   : > { %v2160_v51 = vpack.c.bf16 %v2144_v50, %v2144_v50  ;;  %3722 = vmatpush1.bf16.msk.msra.mxu0 %vm4789_vm1, %v3721_v48  ;;  %v2462_v53 = vsel %vm6289_vm3, %v4362_v40, %v4363_v55 }
 0x5c3   : > { %v4351_v52 = vpop.permute.xlu0 %4350  ;;  %v2456_v28 = vpop.permute.xlu1 %2455 }
 0x5c4   : > { %v4353_v41 = vunpack.i.h.bf16 %v4351_v52  ;;  %v4352_v22 = vunpack.i.l.bf16 %v4351_v52  ;;  %3708 = vmatprep.subr.msk.bf16.mxu1 %vm380_vm5, %v2160_v51  ;;  %v2461_v14 = vsel %vm6291_vm6, %v2456_v28, %v4362_v40  ;;  %vm6297_vm6 = vcmask 916480  }
 0x5c5   : > { %2293 = vmatpush1.bf16.msra.mxu1 %v2283_v2 }
 0x5c6   : > { %v2378_v58 = vsel %vm6287_vm0, %v4353_v41, %v2376_v36  ;;  %v2377_v24 = vsel %vm6288_vm2, %v4352_v22, %v4353_v41  ;;  %vm6293_vm0 = vcmask 793600   ;;  %vm6294_vm2 = vcmask 801792  }
 0x5c7   : > { %v2382_v38 = vsel %vm271_vm12, %v2378_v58, 0.0  ;;  %v2381_v56 = vsel %vm270_vm4, %v2377_v24, 0.0  ;;  %v4356_v57 = vpop.permute.xlu0 %4355  ;;  %v4371_v27 = vpop.permute.xlu1 %4370  ;;  %vm6295_vm3 = vmmov %vm6293_vm0 }
 0x5c8   : > { %v4358_v6 = vunpack.i.h.bf16 %v4356_v57  ;;  %v4357_v59 = vunpack.i.l.bf16 %v4356_v57  ;;  %v2388_v30 = vpack.c.bf16 %v2382_v38, %v2382_v38  ;;  %v2387_v46 = vpack.c.bf16 %v2381_v56, %v2381_v56  ;;  %3709 = vmatmul.mubr.msk.bf16.vlgmr.msra.gmra.mrb[0].mxu1 %vm376_vm11, %v3680_v8 }
 0x5c9   : > { %2550 = vmatprep.mubr.bf16.mxu1 %v4565_v5  ;;  %v4373_v61 = vunpack.i.h.bf16 %v4371_v27  ;;  %v4372_v18 = vunpack.i.l.bf16 %v4371_v27 }
 0x5ca   : > { %v2450_v62 = vsel %vm6290_vm13, %v4357_v59, %v4358_v6  ;;  %3723 = vmatprep.subr.msk.bf16.mxu0 %vm380_vm5, %v2388_v30  ;;  %v2395_v21 = vsel %vm380_vm5, %v2387_v46, 0  ;;  %vm6296_vm13 = vmmov %vm6294_vm2 }
 0x5cb   : > { %v2444_v31 = vpop.permute.xlu0 %2443  ;;  %2405 = vmatpush1.bf16.msra.mxu0 %v2395_v21  ;;  %v3727_v0 = vpack.c.bf16 %v2462_v53, %v2450_v62  ;;  %v2580_v63 = vsel %vm6293_vm0, %v4372_v18, %v4373_v61  ;;  %v2574_v15 = vpop.permute.xlu1 %2573  ;;  %vm6299_vm0 = vcmask 785408  }
 0x5cc   : > { %v2449_v4 = vsel %vm6292_vm7, %v2444_v31, %v4357_v59  ;;  %v2579_v33 = vsel %vm6295_vm3, %v2574_v15, %v4372_v18  ;;  %vm6298_vm7 = vmmov %vm6297_vm6 }
 0x5cd   : > { %v3730_v25 = vpack.c.bf16 %v2461_v14, %v2449_v4  ;;  %3728 = vmatprep.subr.msk.bf16.mxu1 %vm4760_vm8, %v3727_v0 }
 0x5ce   : > { %3724 = vmatmul.mubr.msk.bf16.vlgmr.msra.gmra.mrb[4].mxu0 %vm376_vm11, %v3710_v20 }
 0x5cf   : > { %v4366_v3 = vpop.permute.xlu0 %4365  ;;  %3731 = vmatpush1.bf16.msk.msra.mxu1 %vm4768_vm9, %v3730_v25  ;;  %2668 = vmatprep.mubr.bf16.mxu0 %v4565_v5  ;;  %v4381_v47 = vpop.permute.xlu1 %4380 }
 0x5d0   : > { %v4368_v26 = vunpack.i.h.bf16 %v4366_v3  ;;  %v4367_v32 = vunpack.i.l.bf16 %v4366_v3  ;;  %v4383_v19 = vunpack.i.h.bf16 %v4381_v47  ;;  %v4382_v35 = vunpack.i.l.bf16 %v4381_v47  ;;  %v3740_v47 = vld [vmem:[%s6050_s1 + $0x74] sm:$0xf] }
 0x5d2   : > { %v2568_v37 = vsel %vm6294_vm2, %v4367_v32, %v4368_v26  ;;  %v2498_v60 = vsel %vm6297_vm6, %v4382_v35, %v4383_v19  ;;  %vm6300_vm2 = vcmask 900096   ;;  %v3725_v26 = vld [vmem:[%s6050_s1 + $0x70] sm:$0xf]  ;;  %vm6303_vm6 = vcmask 769024  }
 0x5d3   : > { %v2562_v39 = vpop.permute.xlu0 %2561  ;;  %v3742_v42 = vpack.c.bf16 %v2580_v63, %v2568_v37  ;;  %v2492_v50 = vpop.permute.xlu1 %2491  ;;  %vm6301_vm3 = vmmov %vm6300_vm2 }
 0x5d4   : > { %v2567_v45 = vsel %vm6296_vm13, %v2562_v39, %v4367_v32  ;;  %v2497_v51 = vsel %vm6298_vm7, %v2492_v50, %v4382_v35  ;;  %vm6302_vm13 = vmmov %vm6299_vm0 }
 0x5d5   : > { %v3745_v44 = vpack.c.bf16 %v2579_v33, %v2567_v45  ;;  %3743 = vmatprep.subr.msk.bf16.mxu0 %vm4760_vm8, %v3742_v42  ;;  %vm6304_vm7 = vmmov %vm6303_vm6 }
 0x5d7   : > { %v4376_v13 = vpop.permute.xlu0 %4375  ;;  %3746 = vmatpush1.bf16.msk.msra.mxu0 %vm4768_vm9, %v3745_v44  ;;  %v4391_v8 = vpop.permute.xlu1 %4390 }
 0x5d8   : > { %v4378_v12 = vunpack.i.h.bf16 %v4376_v13  ;;  %v4377_v48 = vunpack.i.l.bf16 %v4376_v13  ;;  %v4393_v54 = vunpack.i.h.bf16 %v4391_v8  ;;  %v4392_v58 = vunpack.i.l.bf16 %v4391_v8 }
 0x5da   : > { %v2474_v36 = vsel %vm628_vm10, %v4377_v48, %v4378_v12  ;;  %v2616_v38 = vsel %vm6299_vm0, %v4392_v58, %v4393_v54  ;;  %vm6305_vm0 = vcmask 113664  }
 0x5db   : > { %v2468_v2 = vpop.permute.xlu0 %2467  ;;  %v3733_v52 = vpack.c.bf16 %v2474_v36, %v2498_v60  ;;  %v2484_v56 = vpop.permute.xlu1 %2483 }
 0x5dc   : > { %v2473_v41 = vsel %vm628_vm10, %v2468_v2, %v4377_v48 }
 0x5dd   : > { %v3736_v22 = vpack.c.bf16 %v2473_v41, %v2497_v51  ;;  %3734 = vmatprep.subr.msk.bf16.mxu1 %vm4783_vm15, %v3733_v52 }
 0x5df   : > { %v4386_v24 = vpop.permute.xlu0 %4385  ;;  %3737 = vmatpush1.bf16.msk.msra.mxu1 %vm4789_vm1, %v3736_v22  ;;  %v2610_v53 = vpop.permute.xlu1 %2609 }
 0x5e0   : > { %v4388_v55 = vunpack.i.h.bf16 %v4386_v24  ;;  %v4387_v40 = vunpack.i.l.bf16 %v4386_v24  ;;  %v2615_v21 = vsel %vm6302_vm13, %v2610_v53, %v4392_v58  ;;  %vm6308_vm13 = vcmask 138240  }
 0x5e2   : > { %v2592_v57 = vsel %vm751_vm14, %v4387_v40, %v4388_v55 }
 0x5e3   : > { %v4396_v6 = vpop.permute.xlu0 %4395  ;;  %v3748_v59 = vpack.c.bf16 %v2592_v57, %v2616_v38  ;;  %v2602_v3 = vpop.permute.xlu1 %2601 }
 0x5e4   : > { %v4398_v30 = vunpack.i.h.bf16 %v4396_v6  ;;  %v4397_v46 = vunpack.i.l.bf16 %v4396_v6 }
 0x5e5   : > { %3749 = vmatprep.subr.msk.bf16.mxu0 %vm4783_vm15, %v3748_v59 }
 0x5e6   : > { %v2486_v28 = vsel %vm6300_vm2, %v4398_v30, %v2484_v56  ;;  %v2485_v62 = vsel %vm6301_vm3, %v4397_v46, %v4398_v30  ;;  %vm6306_vm2 = vcmask 146432  }
 0x5e7   : > { %v2490_v14 = vsel %vm271_vm12, %v2486_v28, 0.0  ;;  %v2489_v31 = vsel %vm270_vm4, %v2485_v62, 0.0  ;;  %v2586_v0 = vpop.permute.xlu0 %2585  ;;  %vm6307_vm3 = vmmov %vm6306_vm2 }
 0x5e8   : > { %v2591_v20 = vsel %vm751_vm14, %v2586_v0, %v4387_v40  ;;  %v2506_v4 = vpack.c.bf16 %v2490_v14, %v2490_v14  ;;  %v2505_v25 = vpack.c.bf16 %v2489_v31, %v2489_v31 }
 0x5e9   : > { %v3751_v27 = vpack.c.bf16 %v2591_v20, %v2615_v21 }
 0x5ea   : > { %3738 = vmatprep.subr.msk.bf16.mxu1 %vm380_vm5, %v2506_v4  ;;  %v2513_v61 = vsel %vm380_vm5, %v2505_v25, 0 }
 0x5eb   : > { %v4401_v18 = vpop.permute.xlu0 %4400  ;;  %2523 = vmatpush1.bf16.msra.mxu1 %v2513_v61  ;;  %3752 = vmatpush1.bf16.msk.msra.mxu0 %vm4789_vm1, %v3751_v27 }
 0x5ec   : > { %v4403_v32 = vunpack.i.h.bf16 %v4401_v18  ;;  %v4402_v63 = vunpack.i.l.bf16 %v4401_v18 }
 0x5ee   : > { %v2603_v15 = vsel %vm6303_vm6, %v4402_v63, %v4403_v32  ;;  %v2604_v37 = vsel %vm6304_vm7, %v4403_v32, %v2602_v3  ;;  %3739 = vmatmul.mubr.msk.bf16.vlgmr.msra.gmra.mrb[4].mxu1 %vm376_vm11, %v3725_v26  ;;  %vm6309_vm6 = vmmov %vm6308_vm13  ;;  %vm6310_vm7 = vcmask 121856  }
 0x5ef   : > { %v2607_v33 = vsel %vm270_vm4, %v2603_v15, 0.0  ;;  %v2608_v39 = vsel %vm271_vm12, %v2604_v37, 0.0  ;;  %2871 = vmatprep.mubr.bf16.mxu1 %v4565_v5 }
 0x5f0   : > { %v2624_v42 = vpack.c.bf16 %v2608_v39, %v2608_v39  ;;  %v2623_v45 = vpack.c.bf16 %v2607_v33, %v2607_v33 }
 0x5f2   : > { %3753 = vmatprep.subr.msk.bf16.mxu0 %vm380_vm5, %v2624_v42  ;;  %v2631_v44 = vsel %vm380_vm5, %v2623_v45, 0 }
 0x5f3   : > { %2641 = vmatpush1.bf16.msra.mxu0 %v2631_v44 }
 0x5f6   : > { %3754 = vmatmul.mubr.msk.bf16.vlgmr.msra.gmra.mrb[8].mxu0 %vm376_vm11, %v3740_v47 }
 0x5f7   : > { %2921 = vmatprep.mubr.bf16.mxu0 %v4565_v5 }
 0x5fc   : > { %v2684_v59 = vpop.permute.xlu0 %2683 }
 0x600   : > { %v2765_v25 = vpop.permute.xlu0 %2764 }
 0x604   : > { %v2789_v61 = vpop.permute.xlu0 %2788 }
 0x608   : > { %v5832_v3 = vpop.permute.xlu0 %2698 }
 0x67d   : > { %v2272_v19 = vpop.f32.mrb[0].mxu0 }
 0x67e   : > { %v2274_v35 = vpop.f32.mrb[1].mxu0 }
 0x67f   : > { %v2276_v13 = vpop.f32.mrb[2].mxu0 }
 0x680   : > { %v2277_v12 = vpop.f32.mrb[3].mxu0 }
 0x69b   : > { %v2322_v48 = vpop.f32.mrb[0].mxu1 }
 0x69c   : > { %v2323_v60 = vadd.f32 %v2322_v48, %v2272_v19  ;;  %v2324_v50 = vpop.f32.mrb[1].mxu1 }
 0x69d   : > { %v2325_v36 = vadd.f32 %v2324_v50, %v2274_v35  ;;  %v2326_v51 = vpop.f32.mrb[2].mxu1 }
 0x69e   : > { %v2327_v2 = vpop.f32.mrb[3].mxu1 }
 0x6a1   : > { %v2434_v52 = vpop.f32.mrb[4].mxu0 }
 0x6a2   : > { %v2441_v41 = vadd.f32 %v2434_v52, %v2323_v60  ;;  %v2436_v22 = vpop.f32.mrb[5].mxu0 }
 0x6a3   : > { %v2442_v8 = vadd.f32 %v2436_v22, %v2325_v36  ;;  %v2438_v54 = vpop.f32.mrb[6].mxu0 }
 0x6a4   : > { %v2439_v58 = vpop.f32.mrb[7].mxu0 }
 0x6c1   : > { %v2552_v24 = vpop.f32.mrb[4].mxu1 }
 0x6c2   : > { %v2559_v55 = vadd.f32 %v2552_v24, %v2441_v41  ;;  %v2554_v40 = vpop.f32.mrb[5].mxu1 }
 0x6c3   : > { %v2560_v38 = vadd.f32 %v2554_v40, %v2442_v8  ;;  %v2556_v56 = vpop.f32.mrb[6].mxu1 }
 0x6c4   : > { %v2557_v57 = vpop.f32.mrb[7].mxu1 }
 0x6c9   : > { %v2670_v6 = vpop.f32.mrb[8].mxu0 }
 0x6ca   : > { %v2677_v30 = vadd.f32 %v2670_v6, %v2559_v55  ;;  %v2672_v46 = vpop.f32.mrb[9].mxu0 }
 0x6cb   : > { %v2678_v53 = vadd.f32 %v2672_v46, %v2560_v38  ;;  %v2674_v28 = vpop.f32.mrb[10].mxu0 }
 0x6cc   : > { %v2686_v62 = vadd.f32 %v2684_v59, %v2677_v30  ;;  %v2675_v21 = vpop.f32.mrb[11].mxu0 }
 0x6cd   : > { %v2687_v14 = vadd.f32 %v2684_v59, %v2678_v53 }
 0x6ce   : > { %v5763_v31 = vadd.f32 %v2686_v62, %v850_v10  ;;  %v3831_v10 = vld [vmem:[%s6051_s2 + $0x30] sm:$0xff] }
 0x6cf   : > { %v5767_v0 = vadd.f32 %v2687_v14, %v851_v11  ;;  %v2777_v11 = vpop.permute.xlu1 %2776 }
 0x6d0   : > { %v4410_v20 = vpack.i.bf16 %v5763_v31, %v5504_v23 }
 0x6d1   : > { %v4425_v7 = vpack.i.bf16 %v5767_v0, %v5763_v31  ;;  %v4465_v9 = vpack.i.bf16 %v5542_v1, %v5767_v0 }
 0x6d2   : > { %4411 = vrot.lane.b32.xlu1 %v4410_v20, %s6248_s10  ;;  %4406 = vrot.lane.b32.xlu0 %v4410_v20, %s6241_s27 }
 0x6d3   : > { %v2813_v23 = vpop.permute.xlu1 %2812 }
 0x6d6   : > { %2960 = vrot.lane.b32.xlu1 %v5763_v31, %s6249_s11  ;;  %3044 = vrot.lane.b32.xlu0 %v5763_v31, %s6252_s19 }
 0x6d7   : > { %v5826_v4 = vpop.permute.xlu1 %2710 }
 0x6da   : > { %3056 = vrot.lane.b32.xlu1 %v5763_v31, %s6251_s18  ;;  %3162 = vrot.lane.b32.xlu0 %v5763_v31, %s6254_s21 }
 0x6db   : > { %v5828_v27 = vpop.permute.xlu1 %2942 }
 0x6de   : > { %3174 = vrot.lane.b32.xlu1 %v5763_v31, %s6253_s20  ;;  %3068 = vrot.lane.b32.xlu0 %v5763_v31, %s6256_s22 }
 0x6df   : > { %v5830_v18 = vpop.permute.xlu1 %2746 }
 0x6e2   : > { %3092 = vrot.lane.b32.xlu1 %v5763_v31, %s6255_s17  ;;  %3186 = vrot.lane.b32.xlu0 %v5763_v31, %s6258_s26 }
 0x6e3   : > { %v5834_v26 = vpop.permute.xlu1 %2976 }
 0x6e6   : > { %3210 = vrot.lane.b32.xlu1 %v5763_v31, %s6257_s25  ;;  %4426 = vrot.lane.b32.xlu0 %v4425_v7, %s6240_s24 }
 0x6e7   : > { %v5838_v32 = vpop.permute.xlu1 %3084 }
 0x6ea   : > { %4436 = vrot.lane.b32.xlu0 %v4425_v7, %s6243_s30  ;;  %4416 = vrot.lane.b32.xlu1 %v4425_v7, %s6237_s14 }
 0x6ee   : > { %4446 = vrot.lane.b32.xlu0 %v4425_v7, %s6245_s7  ;;  %4421 = vrot.lane.b32.xlu1 %v4425_v7, %s6238_s15 }
 0x6f2   : > { %4456 = vrot.lane.b32.xlu0 %v4425_v7, %s6247_s9  ;;  %4431 = vrot.lane.b32.xlu1 %v4425_v7, %s6239_s16 }
 0x6f6   : > { %4466 = vrot.lane.b32.xlu0 %v4465_v9, %s6249_s11  ;;  %2804 = vrot.lane.b32.xlu1 %v5767_v0, %s6241_s27 }
 0x6fa   : > { %2738 = vrot.lane.b32.xlu0 %v5767_v0, %s6248_s10  ;;  %4441 = vrot.lane.b32.xlu1 %v4425_v7, %s6242_s29 }
 0x6fe   : > { %4471 = vrot.lane.b32.xlu0 %v4425_v7, %s6250_s13  ;;  %4451 = vrot.lane.b32.xlu1 %v4425_v7, %s6244_s6 }
 0x702   : > { %4476 = vrot.lane.b32.xlu0 %v4465_v9, %s6252_s19  ;;  %4461 = vrot.lane.b32.xlu1 %v4425_v7, %s6246_s8 }
 0x706   : > { %4486 = vrot.lane.b32.xlu0 %v4465_v9, %s6254_s21  ;;  %4481 = vrot.lane.b32.xlu1 %v4465_v9, %s6251_s18 }
 0x70a   : > { %4496 = vrot.lane.b32.xlu0 %v4465_v9, %s6256_s22  ;;  %4491 = vrot.lane.b32.xlu1 %v4465_v9, %s6253_s20 }
 0x70e   : > { %4506 = vrot.lane.b32.xlu0 %v4465_v9, %s6258_s26  ;;  %4501 = vrot.lane.b32.xlu1 %v4465_v9, %s6255_s17 }
 0x712   : > { %4516 = vrot.lane.b32.xlu0 %v4425_v7, %s6259_s28  ;;  %4511 = vrot.lane.b32.xlu1 %v4465_v9, %s6257_s25 }
 0x716   : > { %4521 = vrot.lane.b32.xlu0 %v4425_v7, %s6260_s5  ;;  %3202 = vrot.lane.b32.xlu1 %v5542_v1, %s6260_s5  ;;  %v5836_v1 = vpop.permute.xlu0 %2930 }
 0x71a   : > { %3284 = vperm.xlu0 %4404, %v3831_v10   ;;  %v5840_v63 = vpop.permute.xlu0 %2722 }
 0x744   : > { %v5842_v15 = vpop.permute.xlu1 %4411  ;;  %v4407_v37 = vpop.permute.xlu0 %4406 }
 0x745   : > { %v4409_v50 = vunpack.i.h.bf16 %v4407_v37  ;;  %v4408_v36 = vunpack.i.l.bf16 %v4407_v37  ;;  %v4413_v37 = vunpack.i.l.bf16 %v5842_v15 }
 0x747   : > { %v2806_v54 = vsel %vm6305_vm0, %v4408_v36, %v4409_v50  ;;  %vm6311_vm0 = vmmov %vm6310_vm7 }
 0x748   : > { %v5844_v33 = vpop.permute.xlu1 %2960  ;;  %v5846_v39 = vpop.permute.xlu0 %3044  ;;  %v2810_v28 = vsel %vm270_vm4, %v2806_v54, 0.0 }
 0x74c   : > { %v5848_v42 = vpop.permute.xlu1 %3056  ;;  %v5850_v45 = vpop.permute.xlu0 %3162 }
 0x750   : > { %v5852_v44 = vpop.permute.xlu1 %3174  ;;  %v5854_v47 = vpop.permute.xlu0 %3068 }
 0x754   : > { %v5856_v19 = vpop.permute.xlu1 %3092  ;;  %v5858_v35 = vpop.permute.xlu0 %3186 }
 0x758   : > { %v5860_v13 = vpop.permute.xlu1 %3210  ;;  %v4427_v12 = vpop.permute.xlu0 %4426 }
 0x759   : > { %v4429_v58 = vunpack.i.h.bf16 %v4427_v12  ;;  %v4428_v24 = vunpack.i.l.bf16 %v4427_v12  ;;  %v2826_v12 = vpack.c.bf16 %v2810_v28, %v2810_v28 }
 0x75b   : > { %v2794_v62 = vsel %vm6310_vm7, %v2789_v61, %v4428_v24  ;;  %v2795_v21 = vsel %vm6311_vm0, %v4428_v24, %v4429_v58  ;;  %vm6316_vm7 = vcmask 277504  }
 0x75c   : > { %v4437_v48 = vpop.permute.xlu0 %4436  ;;  %v4417_v60 = vpop.permute.xlu1 %4416  ;;  %vm6317_vm0 = vmmov %vm6316_vm7 }
 0x75d   : > { %v4419_v51 = vunpack.i.h.bf16 %v4417_v60  ;;  %v4418_v2 = vunpack.i.l.bf16 %v4417_v60  ;;  %v4439_v60 = vunpack.i.h.bf16 %v4437_v48  ;;  %v4438_v36 = vunpack.i.l.bf16 %v4437_v48 }
 0x75e   : > { %v2834_v48 = vsel %vm380_vm5, %v2826_v12, 0 }
 0x75f   : > { %v2770_v55 = vsel %vm6306_vm2, %v2765_v25, %v4418_v2  ;;  %v2771_v40 = vsel %vm6307_vm3, %v4418_v2, %v4419_v51  ;;  %vm6312_vm2 = vcmask 130048   ;;  %v4414_v25 = vunpack.i.h.bf16 %v5842_v15 }
 0x760   : > { %v5862_v52 = vpop.permute.xlu0 %4446  ;;  %v4422_v41 = vpop.permute.xlu1 %4421  ;;  %vm6313_vm3 = vmmov %vm6312_vm2  ;;  %v2705_v54 = vsel %vm6317_vm0, %v4438_v36, %v4439_v60  ;;  %vm6323_vm0 = vcmask 1031168  }
 0x761   : > { %v4424_v22 = vunpack.i.h.bf16 %v4422_v41  ;;  %v4423_v8 = vunpack.i.l.bf16 %v4422_v41  ;;  %v4449_v58 = vunpack.i.h.bf16 %v5862_v52  ;;  %v4448_v24 = vunpack.i.l.bf16 %v5862_v52 }
 0x763   : > { %v2782_v38 = vsel %vm6308_vm13, %v2777_v11, %v4423_v8  ;;  %v2783_v56 = vsel %vm6309_vm6, %v4423_v8, %v4424_v22  ;;  %vm6314_vm13 = vcmask 113664   ;;  %vm6315_vm6 = vcmask 244736  }
 0x764   : > { %v3762_v57 = vpack.c.bf16 %v2782_v38, %v2770_v55  ;;  %v5869_v6 = vpop.permute.xlu0 %4456  ;;  %v4432_v59 = vpop.permute.xlu1 %4431  ;;  %v3759_v30 = vpack.c.bf16 %v2783_v56, %v2771_v40  ;;  %v2740_v22 = vsel %vm6315_vm6, %v4413_v37, %v4414_v25 }
 0x765   : > { %v4434_v46 = vunpack.i.h.bf16 %v4432_v59  ;;  %v4433_v53 = vunpack.i.l.bf16 %v4432_v59 }
 0x766   : > { %3760 = vmatprep.subr.msk.bf16.mxu1 %vm4760_vm8, %v3759_v30 }
 0x767   : > { %v2818_v14 = vsel %vm6312_vm2, %v2813_v23, %v4433_v53  ;;  %v2819_v20 = vsel %vm6313_vm3, %v4433_v53, %v4434_v46  ;;  %3763 = vmatpush1.bf16.msk.msra.mxu1 %vm4768_vm9, %v3762_v57  ;;  %vm6318_vm2 = vcmask 269312   ;;  %v5910_v57 = vsel %vm270_vm4, %v2740_v22, 0.0 }
 0x768   : > { %v3768_v7 = vpack.c.bf16 %v2794_v62, %v2818_v14  ;;  %v5881_v9 = vpop.permute.xlu0 %4466  ;;  %v2805_v10 = vpop.permute.xlu1 %2804  ;;  %v3765_v11 = vpack.c.bf16 %v2795_v21, %v2819_v20  ;;  %vm6319_vm3 = vmmov %vm6318_vm2  ;;  %v4459_v20 = vunpack.i.h.bf16 %v5869_v6 }
 0x769   : > { %v2807_v61 = vsel %vm6314_vm13, %v4409_v50, %v2805_v10  ;;  %v2704_v50 = vsel %vm6316_vm7, %v5832_v3, %v4438_v36  ;;  %v4469_v55 = vunpack.i.h.bf16 %v5881_v9  ;;  %v4468_v40 = vunpack.i.l.bf16 %v5881_v9  ;;  %v3757_v3 = vld [vmem:[%s6050_s1 + $0x7c] sm:$0xf] }
 0x76a   : > { %v2811_v23 = vsel %vm271_vm12, %v2807_v61, 0.0  ;;  %3766 = vmatprep.subr.msk.bf16.mxu1 %vm4783_vm15, %v3765_v11  ;;  %vm6320_vm13 = vcmask 15360   ;;  %vm6322_vm7 = vcmask 1039360  }
 0x76b   : > { %v2827_v51 = vpack.c.bf16 %v2811_v23, %v2811_v23  ;;  %3769 = vmatpush1.bf16.msk.msra.mxu1 %vm4789_vm1, %v3768_v7  ;;  %vm6321_vm6 = vmmov %vm6320_vm13  ;;  %v4458_v7 = vunpack.i.l.bf16 %v5869_v6  ;;  %v2967_v9 = vsel %vm6322_vm7, %v4468_v40, %v4469_v55  ;;  %vm6328_vm7 = vcmask 252928  }
 0x76c   : > { %v2739_v2 = vpop.permute.xlu0 %2738  ;;  %v4442_v41 = vpop.permute.xlu1 %4441  ;;  %v2937_v14 = vsel %vm6321_vm6, %v4448_v24, %v4449_v58  ;;  %vm6327_vm6 = vmmov %vm6323_vm0  ;;  %v3794_v22 = vpack.c.bf16 %v2967_v9, %v5767_v0 }
 0x76d   : > { %v4444_v15 = vunpack.i.h.bf16 %v4442_v41  ;;  %v4443_v8 = vunpack.i.l.bf16 %v4442_v41  ;;  %3770 = vmatprep.subr.msk.bf16.mxu1 %vm380_vm5, %v2827_v51  ;;  %v2728_v41 = vsel %vm6328_vm7, %v5840_v63, %v4458_v7 }
 0x76f   : > { %v2716_v38 = vsel %vm6318_vm2, %v5826_v4, %v4443_v8  ;;  %v2717_v56 = vsel %vm6319_vm3, %v4443_v8, %v4444_v15  ;;  %2844 = vmatpush1.bf16.msra.mxu1 %v2834_v48  ;;  %v2936_v4 = vsel %vm6320_vm13, %v5836_v1, %v4448_v24  ;;  %vm6324_vm2 = vcmask 7168  }
 0x770   : > { %v3776_v59 = vpack.c.bf16 %v2716_v38, %v2704_v50  ;;  %v4472_v52 = vpop.permute.xlu0 %4471  ;;  %v4452_v30 = vpop.permute.xlu1 %4451  ;;  %v3773_v46 = vpack.c.bf16 %v2717_v56, %v2705_v54  ;;  %vm6325_vm3 = vmmov %vm6324_vm2  ;;  %vm6326_vm13 = vcmask 244736  }
 0x771   : > { %v4474_v53 = vunpack.i.h.bf16 %v4472_v52  ;;  %v4473_v28 = vunpack.i.l.bf16 %v4472_v52  ;;  %v4454_v62 = vunpack.i.h.bf16 %v4452_v30  ;;  %v4453_v21 = vunpack.i.l.bf16 %v4452_v30 }
 0x772   : > { %3774 = vmatprep.subr.msk.bf16.mxu0 %vm4760_vm8, %v3773_v46  ;;  %3771 = vmatmul.mubr.msk.bf16.vlgmr.msra.gmra.mrb[8].mxu1 %vm376_vm11, %v3757_v3  ;;  %v2741_v37 = vsel %vm6326_vm13, %v4414_v25, %v2739_v2 }
 0x773   : > { %v2978_v10 = vsel %vm6323_vm0, %v4473_v28, %v4474_v53  ;;  %v2948_v11 = vsel %vm6324_vm2, %v5828_v27, %v4453_v21  ;;  %v2949_v1 = vsel %vm6325_vm3, %v4453_v21, %v4454_v62  ;;  %3777 = vmatpush1.bf16.msk.msra.mxu0 %vm4768_vm9, %v3776_v59  ;;  %3033 = vmatprep.mubr.bf16.mxu1 %v4565_v5  ;;  %vm6329_vm0 = vmmov %vm6328_vm7  ;;  %vm6330_vm2 = vcmask 1039360  }
 0x774   : > { %v3791_v6 = vpack.c.bf16 %v2948_v11, %v2936_v4  ;;  %v5928_v61 = vpop.permute.xlu0 %4476  ;;  %v4462_v12 = vpop.permute.xlu1 %4461  ;;  %v3788_v60 = vpack.c.bf16 %v2949_v1, %v2937_v14  ;;  %v2979_v36 = vsel %vm6327_vm6, %v4474_v53, %v5834_v26  ;;  %v2760_v27 = vpack.c.bf16 %v5910_v57, %v5910_v57 }
 0x775   : > { %v4464_v23 = vunpack.i.h.bf16 %v4462_v12  ;;  %v4463_v51 = vunpack.i.l.bf16 %v4462_v12  ;;  %v2729_v25 = vsel %vm6329_vm0, %v4458_v7, %v4459_v20  ;;  %v2982_v2 = vsel %vm270_vm4, %v2978_v10, 0.0  ;;  %v3786_v12 = vld [vmem:[%s6050_s1 + $0x80] sm:$0xf] }
 0x776   : > { %3789 = vmatprep.subr.msk.bf16.mxu1 %vm4760_vm8, %v3788_v60  ;;  %v2966_v26 = vsel %vm6330_vm2, %v5844_v33, %v4468_v40  ;;  %v2745_v15 = vsel %vm271_vm12, %v2741_v37, 0.0  ;;  %vm6331_vm3 = vcmask 261120   ;;  %v2983_v48 = vsel %vm271_vm12, %v2979_v36, 0.0  ;;  %v3756_v37 = vld [vmem:[%s6050_s1 + $0x78] sm:$0xf] }
 0x777   : > { %v2752_v8 = vsel %vm6331_vm3, %v5830_v18, %v4463_v51  ;;  %vm6332_vm13 = vmmov %vm6331_vm3  ;;  %3792 = vmatpush1.bf16.msk.msra.mxu1 %vm4768_vm9, %v3791_v6  ;;  %v4479_v50 = vunpack.i.h.bf16 %v5928_v61  ;;  %v4478_v24 = vunpack.i.l.bf16 %v5928_v61  ;;  %v2988_v40 = vpack.c.bf16 %v2982_v2, %v2982_v2 }
 0x778   : > { %v2753_v63 = vsel %vm6332_vm13, %v4463_v51, %v4464_v23  ;;  %v3782_v0 = vpack.c.bf16 %v2728_v41, %v2752_v8  ;;  %v4487_v54 = vpop.permute.xlu0 %4486  ;;  %v4482_v58 = vpop.permute.xlu1 %4481  ;;  %3795 = vmatprep.subr.msk.bf16.mxu1 %vm4783_vm15, %v3794_v22  ;;  %v3797_v38 = vpack.c.bf16 %v2966_v26, %v5763_v31  ;;  %v2761_v56 = vpack.c.bf16 %v2745_v15, %v2745_v15 }
 0x779   : > { %v3779_v33 = vpack.c.bf16 %v2729_v25, %v2753_v63  ;;  %v4484_v18 = vunpack.i.h.bf16 %v4482_v58  ;;  %v4483_v55 = vunpack.i.l.bf16 %v4482_v58  ;;  %v4489_v3 = vunpack.i.h.bf16 %v4487_v54 }
 0x77a   : > { %v4488_v57 = vunpack.i.l.bf16 %v4487_v54  ;;  %vm6333_vm6 = vcmask 924672   ;;  %v2989_v52 = vpack.c.bf16 %v2983_v48, %v2983_v48  ;;  %v2884_v31 = vsel %vm380_vm5, %v2760_v27, 0 }
 0x77b   : > { %3780 = vmatprep.subr.msk.bf16.mxu0 %vm4783_vm15, %v3779_v33  ;;  %v3063_v59 = vsel %vm6333_vm6, %v4483_v55, %v4484_v18  ;;  %3798 = vmatpush1.bf16.msk.msra.mxu1 %vm4789_vm1, %v3797_v38  ;;  %vm6334_vm7 = vcmask 932864   ;;  %v2996_v21 = vsel %vm380_vm5, %v2988_v40, 0  ;;  %vm6335_vm0 = vcmask 801792   ;;  %vm6337_vm3 = vmmov %vm6333_vm6 }
 0x77c   : > { %3783 = vmatpush1.bf16.msk.msra.mxu0 %vm4789_vm1, %v3782_v0  ;;  %v4497_v30 = vpop.permute.xlu0 %4496  ;;  %v4492_v46 = vpop.permute.xlu1 %4491  ;;  %v3051_v53 = vsel %vm6334_vm7, %v4478_v24, %v4479_v50  ;;  %3799 = vmatprep.subr.msk.bf16.mxu1 %vm380_vm5, %v2989_v52  ;;  %v3168_v4 = vsel %vm6335_vm0, %v5850_v45, %v4488_v57  ;;  %vm6336_vm2 = vmmov %vm6335_vm0  ;;  %v3062_v20 = vsel %vm6337_vm3, %v5848_v42, %v4483_v55  ;;  %vm6338_vm13 = vcmask 793600  }
 0x77d   : > { %3784 = vmatprep.subr.msk.bf16.mxu0 %vm380_vm5, %v2761_v56  ;;  %v4494_v28 = vunpack.i.h.bf16 %v4492_v46  ;;  %v4493_v62 = vunpack.i.l.bf16 %v4492_v46  ;;  %v3169_v14 = vsel %vm6336_vm2, %v4488_v57, %v4489_v3  ;;  %v3803_v7 = vpack.c.bf16 %v3063_v59, %v3051_v53  ;;  %vm6339_vm6 = vmmov %vm6338_vm13 }
 0x77e   : > { %v4499_v9 = vunpack.i.h.bf16 %v4497_v30  ;;  %v4498_v10 = vunpack.i.l.bf16 %v4497_v30  ;;  %vm6340_vm0 = vcmask 916480  }
 0x77f   : > { %v3180_v11 = vsel %vm6338_vm13, %v5852_v44, %v4493_v62  ;;  %v3181_v1 = vsel %vm6339_vm6, %v4493_v62, %v4494_v28  ;;  %3006 = vmatpush1.bf16.msra.mxu1 %v2996_v21  ;;  %v3050_v44 = vsel %vm6334_vm7, %v5846_v39, %v4478_v24  ;;  %vm6341_vm2 = vmmov %vm6340_vm0 }
 0x780   : > { %2894 = vmatpush1.bf16.msra.mxu0 %v2884_v31  ;;  %v3821_v6 = vpack.c.bf16 %v3180_v11, %v3168_v4  ;;  %v4507_v45 = vpop.permute.xlu0 %4506  ;;  %v4502_v61 = vpop.permute.xlu1 %4501  ;;  %v3818_v42 = vpack.c.bf16 %v3181_v1, %v3169_v14  ;;  %v3806_v23 = vpack.c.bf16 %v3062_v20, %v3050_v44  ;;  %v3074_v41 = vsel %vm628_vm10, %v5854_v47, %v4498_v10 }
 0x781   : > { %3804 = vmatprep.subr.msk.bf16.mxu0 %vm4760_vm8, %v3803_v7  ;;  %v4504_v60 = vunpack.i.h.bf16 %v4502_v61  ;;  %v4503_v36 = vunpack.i.l.bf16 %v4502_v61  ;;  %v4509_v51 = vunpack.i.h.bf16 %v4507_v45  ;;  %v4508_v27 = vunpack.i.l.bf16 %v4507_v45 }
 0x782   : > { %3819 = vmatprep.subr.msk.bf16.mxu1 %vm4760_vm8, %v3818_v42  ;;  %v3075_v25 = vsel %vm628_vm10, %v4498_v10, %v4499_v9  ;;  %3800 = vmatmul.mubr.msk.bf16.vlgmr.msra.gmra.mrb[12].mxu1 %vm376_vm11, %v3786_v12  ;;  %vm6342_vm8 = vcmask 900096   ;;  %vm6344_vm10 = vcmask 785408  }
 0x783   : > { %3785 = vmatmul.mubr.msk.bf16.vlgmr.msra.gmra.mrb[12].mxu0 %vm376_vm11, %v3756_v37  ;;  %v3098_v2 = vsel %vm6340_vm0, %v5856_v19, %v4503_v36  ;;  %v3099_v39 = vsel %vm6341_vm2, %v4503_v36, %v4504_v60  ;;  %3822 = vmatpush1.bf16.msk.msra.mxu1 %vm4768_vm9, %v3821_v6  ;;  %v3192_v19 = vsel %vm751_vm14, %v5858_v35, %v4508_v27  ;;  %vm6345_vm3 = vmmov %vm6344_vm10 }
 0x784   : > { %v3812_v22 = vpack.c.bf16 %v3074_v41, %v3098_v2  ;;  %3807 = vmatpush1.bf16.msk.msra.mxu0 %vm4768_vm9, %v3806_v23  ;;  %v4517_v29 = vpop.permute.xlu0 %4516  ;;  %v4512_v26 = vpop.permute.xlu1 %4511  ;;  %v3809_v15 = vpack.c.bf16 %v3075_v25, %v3099_v39  ;;  %3151 = vmatprep.mubr.bf16.mxu0 %v4565_v5  ;;  %v3193_v50 = vsel %vm751_vm14, %v4508_v27, %v4509_v51  ;;  %vm6343_vm9 = vmmov %vm6342_vm8  ;;  %vm6346_vm14 = vcmask 769024  }
 0x785   : > { %v4519_v47 = vunpack.i.h.bf16 %v4517_v29  ;;  %v4518_v8 = vunpack.i.l.bf16 %v4517_v29  ;;  %v4514_v63 = vunpack.i.h.bf16 %v4512_v26  ;;  %v4513_v48 = vunpack.i.l.bf16 %v4512_v26  ;;  %3269 = vmatprep.mubr.bf16.mxu1 %v4565_v5  ;;  %vm6347_vm13 = vmmov %vm6346_vm14 }
 0x786   : > { %3810 = vmatprep.subr.msk.bf16.mxu0 %vm4783_vm15, %v3809_v15 }
 0x787   : > { %v3087_v34 = vsel %vm6342_vm8, %v4519_v47, %v5838_v32  ;;  %v3086_v0 = vsel %vm6343_vm9, %v4518_v8, %v4519_v47  ;;  %v3216_v54 = vsel %vm6344_vm10, %v5860_v13, %v4513_v48  ;;  %v3217_v58 = vsel %vm6345_vm3, %v4513_v48, %v4514_v63 }
 0x788   : > { %v3091_v5 = vsel %vm271_vm12, %v3087_v34, 0.0  ;;  %v3090_v35 = vsel %vm270_vm4, %v3086_v0, 0.0  ;;  %v3827_v33 = vpack.c.bf16 %v3192_v19, %v3216_v54  ;;  %3813 = vmatpush1.bf16.msk.msra.mxu0 %vm4789_vm1, %v3812_v22  ;;  %v4522_v24 = vpop.permute.xlu0 %4521  ;;  %v3203_v18 = vpop.permute.xlu1 %3202  ;;  %v3824_v32 = vpack.c.bf16 %v3193_v50, %v3217_v58 }
 0x789   : > { %v4524_v55 = vunpack.i.h.bf16 %v4522_v24  ;;  %v4523_v40 = vunpack.i.l.bf16 %v4522_v24  ;;  %v3107_v38 = vpack.c.bf16 %v3091_v5, %v3091_v5  ;;  %v3106_v56 = vpack.c.bf16 %v3090_v35, %v3090_v35 }
 0x78a   : > { %3825 = vmatprep.subr.msk.bf16.mxu1 %vm4783_vm15, %v3824_v32 }
 0x78b   : > { %v3204_v13 = vsel %vm6346_vm14, %v4523_v40, %v4524_v55  ;;  %v3205_v3 = vsel %vm6347_vm13, %v4524_v55, %v3203_v18  ;;  %3814 = vmatprep.subr.msk.bf16.mxu0 %vm380_vm5, %v3107_v38  ;;  %3828 = vmatpush1.bf16.msk.msra.mxu1 %vm4789_vm1, %v3827_v33  ;;  %v3114_v57 = vsel %vm380_vm5, %v3106_v56, 0 }
 0x78c   : > { %v3208_v59 = vsel %vm270_vm4, %v3204_v13, 0.0  ;;  %v3209_v52 = vsel %vm271_vm12, %v3205_v3, 0.0  ;;  %3124 = vmatpush1.bf16.msra.mxu0 %v3114_v57 }
 0x78d   : > { %v3225_v30 = vpack.c.bf16 %v3209_v52, %v3209_v52  ;;  %v3224_v46 = vpack.c.bf16 %v3208_v59, %v3208_v59 }
 0x78f   : > { %3815 = vmatmul.mubr.msk.bf16.vlgmr.msra.gmra.mrb[16].mxu0 %vm376_vm11, %v3801_v43  ;;  %3829 = vmatprep.subr.msk.bf16.mxu1 %vm380_vm5, %v3225_v30  ;;  %v3232_v49 = vsel %vm380_vm5, %v3224_v46, 0 }
 0x790   : > { %3242 = vmatpush1.bf16.msra.mxu1 %v3232_v49 }
 0x793   : > { %3830 = vmatmul.mubr.msk.bf16.vlgmr.msra.gmra.mrb[16].mxu1 %vm376_vm11, %v3816_v17 }
 0x799   : > { %v3285_v27 = vpop.permute.xlu0 %3284 }
 0x845   : > { %v2873_v16 = vpop.f32.mrb[8].mxu1 }
 0x846   : > { %v2875_v31 = vpop.f32.mrb[9].mxu1 }
 0x847   : > { %v2877_v53 = vpop.f32.mrb[10].mxu1 }
 0x848   : > { %v2878_v28 = vpop.f32.mrb[11].mxu1 }
 0x855   : > { %v3035_v14 = vpop.f32.mrb[12].mxu1 }
 0x856   : > { %v2923_v62 = vpop.f32.mrb[12].mxu0  ;;  %v3037_v9 = vpop.f32.mrb[13].mxu1 }
 0x857   : > { %v2924_v21 = vadd.f32 %v2923_v62, %v2873_v16  ;;  %v2925_v4 = vpop.f32.mrb[13].mxu0  ;;  %v3039_v1 = vpop.f32.mrb[14].mxu1 }
 0x858   : > { %v2926_v20 = vadd.f32 %v2925_v4, %v2875_v31  ;;  %v2927_v7 = vpop.f32.mrb[14].mxu0  ;;  %v3040_v6 = vpop.f32.mrb[15].mxu1 }
 0x859   : > { %v3042_v10 = vadd.f32 %v3035_v14, %v2924_v21  ;;  %v2928_v11 = vpop.f32.mrb[15].mxu0 }
 0x85a   : > { %v3043_v37 = vadd.f32 %v3037_v9, %v2926_v20 }
 0x862   : > { %v3153_v45 = vpop.f32.mrb[16].mxu0 }
 0x863   : > { %v3160_v61 = vadd.f32 %v3153_v45, %v3042_v10  ;;  %v3155_v42 = vpop.f32.mrb[17].mxu0 }
 0x864   : > { %v3161_v12 = vadd.f32 %v3155_v42, %v3043_v37  ;;  %v3157_v44 = vpop.f32.mrb[18].mxu0 }
 0x865   : > { %v3158_v60 = vpop.f32.mrb[19].mxu0 }
 0x866   : > { %v3271_v36 = vpop.f32.mrb[16].mxu1 }
 0x867   : > { %v3278_v23 = vadd.f32 %v3271_v36, %v3160_v61  ;;  %v3273_v51 = vpop.f32.mrb[17].mxu1 }
 0x868   : > { %v3279_v41 = vadd.f32 %v3273_v51, %v3161_v12  ;;  %v3275_v25 = vpop.f32.mrb[18].mxu1 }
 0x869   : > { %v3287_v2 = vadd.f32 %v3285_v27, %v3278_v23  ;;  %v3276_v39 = vpop.f32.mrb[19].mxu1 }
 0x86a   : > { %v3288_v22 = vadd.f32 %v3285_v27, %v3279_v41 }
 0x86b   : > { %3289 = vst [vmem:[%s4651_s23] sm:$0xff] %v3287_v2 }
 0x86c   : > { %3290 = vst [vmem:[%s4651_s23 + $0x8] sm:$0xff] %v3288_v22 }
 0x86d PF: > { %s13_s12 = sadd.s32 1, %s4543_s12  }
 0x86e   : > { %p10_p5 = scmp.ge.s32.totalorder %s13_s12, 4  }
 0x870   :  { %12 = sbr.rel (!%p10_p5) target bundleno = 2 (0x2), region = 108 }

</bundles_post_ra>
